<compile_context>
chip_gen: v6e
topology: v6e:2x2x1
jax: 0.10.0
libtpu: 0.0.40
codegen_flags: <defaults>
</compile_context>

<pallas_src>
import math
import functools

import jax
import jax.numpy as jnp
from jax.experimental import pallas as pl
from jax.experimental.pallas import tpu as pltpu


@functools.lru_cache(maxsize=None)
def _vmem_limit_bytes():
    """Generation-dependent VMEM budget (review item: don't hardcode 48 MiB)."""
    try:
        cap = getattr(pltpu.get_tpu_info(), "vmem_capacity_bytes", None)
    except Exception:
        cap = None
    if not cap:
        return 48 * 1024 * 1024
    return max(32 * 1024 * 1024, min(int(cap * 0.8), 100 * 1024 * 1024))


# ------------------------------ Pallas kernels ------------------------------


def _conv_kernel(x_ref, w_ref, b_ref, o_ref, *, k_eff, Wi, L, relu):
    """Stride-1 'valid' conv in flat layout: sum of k_eff^2 shifted-slice matmuls.

    x_ref: (1, Hi*Wi, Cin)   bf16 flattened zero-padded (and possibly s2d'd) input
    w_ref: (k_eff*k_eff, Cin, Cout) bf16
    b_ref: (1, Cout) f32
    o_ref: (1, L, Cout) bf16, row r = flat output position (junk columns cropped on host)
    """
    acc = None
    t = 0
    for dh in range(k_eff):
        for dw in range(k_eff):
            off = dh * Wi + dw
            patch = x_ref[0, off:off + L, :]                       # already bf16
            contrib = jnp.dot(patch, w_ref[t], preferred_element_type=jnp.float32)
            acc = contrib if acc is None else acc + contrib
            t += 1
    acc = acc + b_ref[...]                                         # f32 epilogue, once
    if relu:
        acc = jnp.maximum(acc, 0.0)
    o_ref[0] = acc.astype(o_ref.dtype)


def _tail_kernel(*refs, n_blocks, Wi, L, lead):
    """Fused: last 3x3 conv + all ResBlocks + trailing encoder ReLU.

    refs = (x, mask, w_last, b_last, [w1, b1, w2, b2] * n_blocks, out, A, R)
      x     : (1, Hi*Wi, Cin) bf16  padded flat input of the last 3x3 conv
              (already ReLU'd by the previous layer)
      mask  : (1, L, 1) f32 interior indicator in the padded flat layout
      A, R  : (lead + Hi*Wi, C) bf16 VMEM scratch — resident activation and its ReLU.
    `lead` rows of zero padding put the interior base (lead+Wi+1) on a 16-row boundary.
    """
    x_ref, m_ref, wl_ref, bl_ref = refs[0], refs[1], refs[2], refs[3]
    wrefs = refs[4:4 + 4 * n_blocks]
    o_ref = refs[4 + 4 * n_blocks]
    a_ref = refs[5 + 4 * n_blocks]
    r_ref = refs[6 + 4 * n_blocks]

    mask = m_ref[0]                    # (L, 1) f32
    base = lead + Wi + 1               # 16-row aligned interior base inside A / R

    # ---- fused last 3x3 conv (no ReLU on its output, per the PyTorch module) ----
    acc = None
    t = 0
    for dh in range(3):
        for dw in range(3):
            off = dh * Wi + dw
            contrib = jnp.dot(x_ref[0, off:off + L, :], wl_ref[t],
                              preferred_element_type=jnp.float32)
            acc = contrib if acc is None else acc + contrib
            t += 1
    y = acc + bl_ref[...]

    a_ref[...] = jnp.zeros_like(a_ref)                 # true zero padding everywhere
    a_ref[base:base + L, :] = (y * mask).astype(a_ref.dtype)

    # ---- ResBlock chain on the VMEM-resident activation ----
    for blk in range(n_blocks):
        w1_ref, b1_ref, w2_ref, b2_ref = wrefs[4 * blk:4 * blk + 4]

        # Hoisted ReLU: one pass over A into a bf16 scratch; taps are plain slices.
        r_ref[...] = jnp.maximum(a_ref[...], 0).astype(r_ref.dtype)

        acc = None
        t = 0
        for dh in range(3):
            for dw in range(3):
                off = lead + dh * Wi + dw
                contrib = jnp.dot(r_ref[off:off + L, :], w1_ref[t],
                                  preferred_element_type=jnp.float32)
                acc = contrib if acc is None else acc + contrib
                t += 1
        h = jnp.maximum(acc + b1_ref[...], 0.0).astype(jnp.bfloat16)

        # 1x1 conv + bias + residual (residual read straight from resident A).
        y = jnp.dot(h, w2_ref[...], preferred_element_type=jnp.float32)
        y = y + b2_ref[...] + a_ref[base:base + L, :].astype(jnp.float32)

        if blk == n_blocks - 1:
            y = jnp.maximum(y, 0.0)                    # Encoder's trailing nn.ReLU
            o_ref[0] = y.astype(o_ref.dtype)
        else:
            # Masked write-back keeps padding / junk positions exactly zero.
            a_ref[base:base + L, :] = (y * mask).astype(a_ref.dtype)


# ------------------------------ host-side glue ------------------------------


def _prep_conv_input(x_nhwc, k, stride, pad):
    """Pad, (optionally) space-to-depth for strided convs, and flatten spatial dims."""
    xp = jnp.pad(x_nhwc, ((0, 0), (pad, pad), (pad, pad), (0, 0)))
    B, Hp, Wp, C = xp.shape
    if stride > 1:
        assert k % stride == 0 and Hp % stride == 0 and Wp % stride == 0
        s = stride
        xp = (xp.reshape(B, Hp // s, s, Wp // s, s, C)
                .transpose(0, 1, 3, 2, 4, 5)
                .reshape(B, Hp // s, Wp // s, s * s * C))
        k_eff = k // s
    else:
        k_eff = k
    B, Hi, Wi, Ci = xp.shape
    return xp.reshape(B, Hi * Wi, Ci), k_eff, Hi, Wi, Ci


def _crop_flat(out_flat, ho, wo, Wi):
    """Undo the flat layout: (B, L, C) -> (B, ho, wo, C) by dropping junk columns."""
    B, L, cout = out_flat.shape
    y = jnp.pad(out_flat, ((0, 0), (0, ho * Wi - L), (0, 0)))
    return y.reshape(B, ho, Wi, cout)[:, :, :wo, :]


def conv2d_pallas(x_nhwc, layer):
    xflat, k_eff, Hi, Wi, Ci = _prep_conv_input(
        x_nhwc, layer["k"], layer["stride"], layer["pad"])
    B = xflat.shape[0]
    cout = layer["cout"]
    ho = Hi - k_eff + 1
    wo = Wi - k_eff + 1
    L = ho * Wi - (k_eff - 1)

    out = pl.pallas_call(
        functools.partial(_conv_kernel, k_eff=k_eff, Wi=Wi, L=L, relu=layer["relu"]),
        out_shape=jax.ShapeDtypeStruct((B, L, cout), jnp.bfloat16),
        grid=(B,),
        in_specs=[
            pl.BlockSpec((1, Hi * Wi, Ci), lambda i: (i, 0, 0)),
            pl.BlockSpec((k_eff * k_eff, Ci, cout), lambda i: (0, 0, 0)),
            pl.BlockSpec((1, cout), lambda i: (0, 0)),
        ],
        out_specs=pl.BlockSpec((1, L, cout), lambda i: (i, 0, 0)),
        compiler_params=pltpu.CompilerParams(
            dimension_semantics=("parallel",),
            vmem_limit_bytes=_vmem_limit_bytes()),
    )(xflat, layer["w"], layer["b"])
    return _crop_flat(out, ho, wo, Wi)


def tail_pallas(x_nhwc, last_conv, res_params):
    """Last 3x3 conv + ResBlock chain + trailing ReLU, fused in one pallas_call."""
    B, H, W, Cin = x_nhwc.shape
    Hi, Wi = H + 2, W + 2
    L = H * Wi - 2
    C = last_conv["cout"]
    nrc = res_params[0]["w1"].shape[2]
    n = len(res_params)
    lead = (-(Wi + 1)) % 16          # align interior base to the bf16 sublane packing

    xflat = jnp.pad(x_nhwc, ((0, 0), (1, 1), (1, 1), (0, 0))).reshape(B, Hi * Wi, Cin)

    r = jnp.arange(L) + (Wi + 1)
    col, row = r % Wi, r // Wi
    interior = (col >= 1) & (col <= W) & (row >= 1) & (row <= H)
    mask = interior.astype(jnp.float32).reshape(1, L, 1)

    args = [xflat, mask, last_conv["w"], last_conv["b"]]
    in_specs = [pl.BlockSpec((1, Hi * Wi, Cin), lambda i: (i, 0, 0)),
                pl.BlockSpec((1, L, 1), lambda i: (0, 0, 0)),
                pl.BlockSpec((9, Cin, C), lambda i: (0, 0, 0)),
                pl.BlockSpec((1, C), lambda i: (0, 0))]
    for rp in res_params:
        args += [rp["w1"], rp["b1"], rp["w2"], rp["b2"]]
        in_specs += [pl.BlockSpec((9, C, nrc), lambda i: (0, 0, 0)),
                     pl.BlockSpec((1, nrc), lambda i: (0, 0)),
                     pl.BlockSpec((nrc, C), lambda i: (0, 0)),
                     pl.BlockSpec((1, C), lambda i: (0, 0))]

    out = pl.pallas_call(
        functools.partial(_tail_kernel, n_blocks=n, Wi=Wi, L=L, lead=lead),
        out_shape=jax.ShapeDtypeStruct((B, L, C), jnp.bfloat16),
        grid=(B,),
        in_specs=in_specs,
        out_specs=pl.BlockSpec((1, L, C), lambda i: (i, 0, 0)),
        scratch_shapes=[pltpu.VMEM((lead + Hi * Wi, C), jnp.bfloat16),
                        pltpu.VMEM((lead + Hi * Wi, C), jnp.bfloat16)],
        compiler_params=pltpu.CompilerParams(
            dimension_semantics=("parallel",),
            vmem_limit_bytes=_vmem_limit_bytes()),
    )(*args)
    return _crop_flat(out, H, W, Wi)


# -------------------------- parameter construction --------------------------


def _conv_init(key, cin, cout, k):
    """PyTorch-default-style uniform init; weights rounded to bf16 once."""
    kw_, kb_ = jax.random.split(key)
    bound = 1.0 / math.sqrt(cin * k * k)
    w = jax.random.uniform(kw_, (k, k, cin, cout), jnp.float32, -bound, bound)
    b = jax.random.uniform(kb_, (cout,), jnp.float32, -bound, bound)
    return w.astype(jnp.bfloat16), b


def _fold_weight(w, stride):
    """(k,k,cin,cout) -> (k_eff*k_eff, stride*stride*cin, cout), matching the host s2d."""
    k, _, cin, cout = w.shape
    s = max(stride, 1)
    ke = k // s if s > 1 else k
    wn = (w.reshape(ke, s, ke, s, cin, cout)
           .transpose(0, 2, 1, 3, 4, 5)
           .reshape(ke, ke, s * s * cin, cout))
    return wn.reshape(ke * ke, s * s * cin, cout)


def build_encoder_params(key, in_channel, channel, n_res_block, n_res_channel, stride):
    strides = int(math.log2(stride))
    keys = iter(jax.random.split(key, 64))
    convs = []

    def add_conv(cin, cout, k, s, pad):
        w_bf, b = _conv_init(next(keys), cin, cout, k)
        convs.append(dict(
            k=k, stride=s, pad=pad, cout=cout, relu=True,
            w=_fold_weight(w_bf, s),              # (taps, Cin_eff, Cout) bf16
            b=b.reshape(1, cout),                 # (1, Cout) f32
            ref_w=w_bf.astype(jnp.float32),       # original layout for the reference
            ref_b=b))

    if strides == 0:
        add_conv(in_channel, channel // 2, 3, 1, 1)
    for i in range(strides):
        if i == 0:
            add_conv(in_channel, channel // 2, 4, 2, 1)
        elif i + 1 == strides:
            add_conv(channel // 2, channel, 4, 2, 1)
        else:
            add_conv(channel // 2, channel // 2, 4, 2, 1)
    if strides <= 1:
        add_conv(channel // 2, channel, 3, 1, 1)
    else:
        add_conv(channel, channel, 3, 1, 1)
    # The last conv has no ReLU before the ResBlocks; if there are no ResBlocks the
    # Encoder's trailing nn.ReLU fuses into it.
    convs[-1]["relu"] = (n_res_block == 0)

    res = []
    for _ in range(n_res_block):
        w1_bf, b1 = _conv_init(next(keys), channel, n_res_channel, 3)
        w2_bf, b2 = _conv_init(next(keys), n_res_channel, channel, 1)
        res.append(dict(
            w1=_fold_weight(w1_bf, 1),                          # (9, C, nrc) bf16
            b1=b1.reshape(1, n_res_channel),
            w2=w2_bf.reshape(n_res_channel, channel),           # (nrc, C) bf16
            b2=b2.reshape(1, channel),
            ref_w1=w1_bf.astype(jnp.float32), ref_b1=b1,
            ref_w2=w2_bf.astype(jnp.float32), ref_b2=b2))
    return dict(convs=convs, res=res)


# --------------------------------- forward ----------------------------------


def encoder_forward(params, x_nchw):
    x = jnp.transpose(x_nchw, (0, 2, 3, 1)).astype(jnp.bfloat16)  # NCHW -> NHWC, bf16
    convs = params["convs"]
    if params["res"]:
        for layer in convs[:-1]:
            x = conv2d_pallas(x, layer)
        x = tail_pallas(x, convs[-1], params["res"])              # fused tail
    else:
        for layer in convs:
            x = conv2d_pallas(x, layer)
    return jnp.transpose(x, (0, 3, 1, 2)).astype(jnp.float32)     # NHWC -> NCHW


# ---------------------------- pure-JAX reference ----------------------------


def _ref_conv(x, w, b, stride, pad):
    y = jax.lax.conv_general_dilated(
        x, w, (stride, stride), ((pad, pad), (pad, pad)),
        dimension_numbers=("NHWC", "HWIO", "NHWC"))
    return y + b.reshape(1, 1, 1, -1)


def encoder_ref(params, x_nchw):
    x = jnp.transpose(x_nchw, (0, 2, 3, 1))
    for cv in params["convs"]:
        x = _ref_conv(x, cv["ref_w"], cv["ref_b"], cv["stride"], cv["pad"])
        if cv["relu"]:
            x = jax.nn.relu(x)
    for rp in params["res"]:
        h = jax.nn.relu(x)
        h = jax.nn.relu(_ref_conv(h, rp["ref_w1"], rp["ref_b1"], 1, 1))
        h = _ref_conv(h, rp["ref_w2"], rp["ref_b2"], 1, 0)
        x = x + h
    if params["res"]:
        x = jax.nn.relu(x)
    return jnp.transpose(x, (0, 3, 1, 2))


# ----------------------------------- main -----------------------------------


if __name__ == "__main__":
    in_channel, channel, n_res_block, n_res_channel, stride = 4, 32, 2, 8, 4
    key = jax.random.PRNGKey(0)
    kx, kp = jax.random.split(key)

    x = jax.random.normal(kx, (2, in_channel, 16, 16), jnp.float32)
    params = build_encoder_params(kp, in_channel, channel, n_res_block,
                                  n_res_channel, stride)

    fwd = jax.jit(lambda inp: encoder_forward(params, inp))
    out = jax.block_until_ready(fwd(x))
    assert out.shape == (2, channel, 16 // stride, 16 // stride), out.shape

    # Reference: f32 compute with the same bf16-rounded weights and input.
    x_q = x.astype(jnp.bfloat16).astype(jnp.float32)
    ref = jax.block_until_ready(encoder_ref(params, x_q))
    max_err = float(jnp.max(jnp.abs(out - ref)))
    # bf16 MXU inputs + bf16 inter-layer activation streaming (f32 accumulation)
    # => loosened tolerance vs. the pure-f32 reference.
    assert jnp.allclose(out, ref, atol=4e-2, rtol=4e-2), max_err

    print("KERNEL_OK")
</pallas_src>

<mosaic_0001>
module attributes {stable_mosaic.version = 11 : i64} {
  func.func @_conv_kernel(%arg0: i32, %arg1: memref<1x81x16xbf16, #tpu.memory_space<vmem>>, %arg2: memref<4x16x16xbf16, #tpu.memory_space<vmem>>, %arg3: memref<1x16xf32, #tpu.memory_space<vmem>>, %arg4: memref<1x71x16xbf16, #tpu.memory_space<vmem>>) attributes {dimension_semantics = [#tpu.dimension_semantics<parallel>], iteration_bounds = array<i64: 2>, scalar_prefetch = 0 : i64, scratch_operands = 0 : i64, tpu.core_type = #tpu.core_type<tc>, window_params = [{transform_indices = @transform_0, window_bounds = array<i64: 1, 81, 16>}, {pipeline_mode = #tpu.pipeline_mode<synchronous>, transform_indices = @transform_1, window_bounds = array<i64: 4, 16, 16>}, {pipeline_mode = #tpu.pipeline_mode<synchronous>, transform_indices = @transform_2, window_bounds = array<i64: 1, 16>}, {transform_indices = @transform_3, window_bounds = array<i64: 1, 71, 16>}]} {
    %c0 = arith.constant 0 : index
    %c0_0 = arith.constant 0 : index
    %c0_1 = arith.constant 0 : index
    %0 = vector.load %arg1[%c0, %c0_0, %c0_1] : memref<1x81x16xbf16, #tpu.memory_space<vmem>>, vector<1x71x16xbf16>
    %1 = vector.shape_cast %0 : vector<1x71x16xbf16> to vector<71x16xbf16>
    %c0_2 = arith.constant 0 : index
    %c0_3 = arith.constant 0 : index
    %c0_4 = arith.constant 0 : index
    %2 = vector.load %arg2[%c0_2, %c0_3, %c0_4] : memref<4x16x16xbf16, #tpu.memory_space<vmem>>, vector<1x16x16xbf16>
    %3 = vector.shape_cast %2 : vector<1x16x16xbf16> to vector<16x16xbf16>
    %cst = arith.constant dense<0.000000e+00> : vector<71x16xf32>
    %4 = tpu.matmul %1, %3, %cst {dimension_numbers = #tpu.dot_dimension_numbers<[1], [0], [0], [1], [0, 0, 1, 1], [], []>} : vector<71x16xbf16>, vector<16x16xbf16>, vector<71x16xf32> -> vector<71x16xf32>
    %c0_5 = arith.constant 0 : index
    %c1 = arith.constant 1 : index
    %c0_6 = arith.constant 0 : index
    %5 = vector.load %arg1[%c0_5, %c1, %c0_6] : memref<1x81x16xbf16, #tpu.memory_space<vmem>>, vector<1x71x16xbf16>
    %6 = vector.shape_cast %5 : vector<1x71x16xbf16> to vector<71x16xbf16>
    %c1_7 = arith.constant 1 : index
    %c0_8 = arith.constant 0 : index
    %c0_9 = arith.constant 0 : index
    %7 = vector.load %arg2[%c1_7, %c0_8, %c0_9] : memref<4x16x16xbf16, #tpu.memory_space<vmem>>, vector<1x16x16xbf16>
    %8 = vector.shape_cast %7 : vector<1x16x16xbf16> to vector<16x16xbf16>
    %cst_10 = arith.constant dense<0.000000e+00> : vector<71x16xf32>
    %9 = tpu.matmul %6, %8, %cst_10 {dimension_numbers = #tpu.dot_dimension_numbers<[1], [0], [0], [1], [0, 0, 1, 1], [], []>} : vector<71x16xbf16>, vector<16x16xbf16>, vector<71x16xf32> -> vector<71x16xf32>
    %10 = arith.addf %4, %9 : vector<71x16xf32>
    %c0_11 = arith.constant 0 : index
    %c9 = arith.constant 9 : index
    %c0_12 = arith.constant 0 : index
    %11 = vector.load %arg1[%c0_11, %c9, %c0_12] : memref<1x81x16xbf16, #tpu.memory_space<vmem>>, vector<1x71x16xbf16>
    %12 = vector.shape_cast %11 : vector<1x71x16xbf16> to vector<71x16xbf16>
    %c2 = arith.constant 2 : index
    %c0_13 = arith.constant 0 : index
    %c0_14 = arith.constant 0 : index
    %13 = vector.load %arg2[%c2, %c0_13, %c0_14] : memref<4x16x16xbf16, #tpu.memory_space<vmem>>, vector<1x16x16xbf16>
    %14 = vector.shape_cast %13 : vector<1x16x16xbf16> to vector<16x16xbf16>
    %cst_15 = arith.constant dense<0.000000e+00> : vector<71x16xf32>
    %15 = tpu.matmul %12, %14, %cst_15 {dimension_numbers = #tpu.dot_dimension_numbers<[1], [0], [0], [1], [0, 0, 1, 1], [], []>} : vector<71x16xbf16>, vector<16x16xbf16>, vector<71x16xf32> -> vector<71x16xf32>
    %16 = arith.addf %10, %15 : vector<71x16xf32>
    %c0_16 = arith.constant 0 : index
    %c10 = arith.constant 10 : index
    %c0_17 = arith.constant 0 : index
    %17 = vector.load %arg1[%c0_16, %c10, %c0_17] : memref<1x81x16xbf16, #tpu.memory_space<vmem>>, vector<1x71x16xbf16>
    %18 = vector.shape_cast %17 : vector<1x71x16xbf16> to vector<71x16xbf16>
    %c3 = arith.constant 3 : index
    %c0_18 = arith.constant 0 : index
    %c0_19 = arith.constant 0 : index
    %19 = vector.load %arg2[%c3, %c0_18, %c0_19] : memref<4x16x16xbf16, #tpu.memory_space<vmem>>, vector<1x16x16xbf16>
    %20 = vector.shape_cast %19 : vector<1x16x16xbf16> to vector<16x16xbf16>
    %cst_20 = arith.constant dense<0.000000e+00> : vector<71x16xf32>
    %21 = tpu.matmul %18, %20, %cst_20 {dimension_numbers = #tpu.dot_dimension_numbers<[1], [0], [0], [1], [0, 0, 1, 1], [], []>} : vector<71x16xbf16>, vector<16x16xbf16>, vector<71x16xf32> -> vector<71x16xf32>
    %22 = arith.addf %16, %21 : vector<71x16xf32>
    %c0_21 = arith.constant 0 : index
    %c0_22 = arith.constant 0 : index
    %23 = vector.load %arg3[%c0_21, %c0_22] : memref<1x16xf32, #tpu.memory_space<vmem>>, vector<1x16xf32>
    %24 = vector.broadcast %23 : vector<1x16xf32> to vector<71x16xf32>
    %25 = arith.addf %22, %24 : vector<71x16xf32>
    %cst_23 = arith.constant 0.000000e+00 : f32
    %26 = vector.broadcast %cst_23 : f32 to vector<71x16xf32>
    %27 = arith.maximumf %25, %26 : vector<71x16xf32>
    %28 = arith.truncf %27 : vector<71x16xf32> to vector<71x16xbf16>
    %c0_24 = arith.constant 0 : index
    %c0_25 = arith.constant 0 : index
    %c0_26 = arith.constant 0 : index
    %29 = vector.load %arg4[%c0_24, %c0_25, %c0_26] : memref<1x71x16xbf16, #tpu.memory_space<vmem>>, vector<1x71x16xbf16>
    %30 = vector.shape_cast %29 : vector<1x71x16xbf16> to vector<71x16xbf16>
    %31 = vector.shape_cast %28 : vector<71x16xbf16> to vector<1x71x16xbf16>
    tpu.vector_store %arg4[%c0_24, %c0_25, %c0_26], %31 {strides = array<i32>} : memref<1x71x16xbf16, #tpu.memory_space<vmem>>, vector<1x71x16xbf16>,
    return
  }
  func.func @transform_0(%arg0: i32) -> (i32, i32, i32) {
    %c0_i32 = arith.constant 0 : i32
    %c0_i32_0 = arith.constant 0 : i32
    %c0_i32_1 = arith.constant 0 : i32
    return %arg0, %c0_i32, %c0_i32_0 : i32, i32, i32
  }
  func.func @transform_1(%arg0: i32) -> (i32, i32, i32) {
    %c0_i32 = arith.constant 0 : i32
    %c0_i32_0 = arith.constant 0 : i32
    %c0_i32_1 = arith.constant 0 : i32
    %c0_i32_2 = arith.constant 0 : i32
    return %c0_i32, %c0_i32_0, %c0_i32_1 : i32, i32, i32
  }
  func.func @transform_2(%arg0: i32) -> (i32, i32) {
    %c0_i32 = arith.constant 0 : i32
    %c0_i32_0 = arith.constant 0 : i32
    %c0_i32_1 = arith.constant 0 : i32
    return %c0_i32, %c0_i32_0 : i32, i32
  }
  func.func @transform_3(%arg0: i32) -> (i32, i32, i32) {
    %c0_i32 = arith.constant 0 : i32
    %c0_i32_0 = arith.constant 0 : i32
    %c0_i32_1 = arith.constant 0 : i32
    return %arg0, %c0_i32, %c0_i32_0 : i32, i32, i32
  }
}

module attributes {stable_mosaic.version = 11 : i64} {
  func.func @_conv_kernel(%arg0: i32, %arg1: memref<1x25x64xbf16, #tpu.memory_space<vmem>>, %arg2: memref<4x64x32xbf16, #tpu.memory_space<vmem>>, %arg3: memref<1x32xf32, #tpu.memory_space<vmem>>, %arg4: memref<1x19x32xbf16, #tpu.memory_space<vmem>>) attributes {dimension_semantics = [#tpu.dimension_semantics<parallel>], iteration_bounds = array<i64: 2>, scalar_prefetch = 0 : i64, scratch_operands = 0 : i64, tpu.core_type = #tpu.core_type<tc>, window_params = [{transform_indices = @transform_0, window_bounds = array<i64: 1, 25, 64>}, {pipeline_mode = #tpu.pipeline_mode<synchronous>, transform_indices = @transform_1, window_bounds = array<i64: 4, 64, 32>}, {pipeline_mode = #tpu.pipeline_mode<synchronous>, transform_indices = @transform_2, window_bounds = array<i64: 1, 32>}, {transform_indices = @transform_3, window_bounds = array<i64: 1, 19, 32>}]} {
    %c0 = arith.constant 0 : index
    %c0_0 = arith.constant 0 : index
    %c0_1 = arith.constant 0 : index
    %0 = vector.load %arg1[%c0, %c0_0, %c0_1] : memref<1x25x64xbf16, #tpu.memory_space<vmem>>, vector<1x19x64xbf16>
    %1 = vector.shape_cast %0 : vector<1x19x64xbf16> to vector<19x64xbf16>
    %c0_2 = arith.constant 0 : index
    %c0_3 = arith.constant 0 : index
    %c0_4 = arith.constant 0 : index
    %2 = vector.load %arg2[%c0_2, %c0_3, %c0_4] : memref<4x64x32xbf16, #tpu.memory_space<vmem>>, vector<1x64x32xbf16>
    %3 = vector.shape_cast %2 : vector<1x64x32xbf16> to vector<64x32xbf16>
    %cst = arith.constant dense<0.000000e+00> : vector<19x32xf32>
    %4 = tpu.matmul %1, %3, %cst {dimension_numbers = #tpu.dot_dimension_numbers<[1], [0], [0], [1], [0, 0, 1, 1], [], []>} : vector<19x64xbf16>, vector<64x32xbf16>, vector<19x32xf32> -> vector<19x32xf32>
    %c0_5 = arith.constant 0 : index
    %c1 = arith.constant 1 : index
    %c0_6 = arith.constant 0 : index
    %5 = vector.load %arg1[%c0_5, %c1, %c0_6] : memref<1x25x64xbf16, #tpu.memory_space<vmem>>, vector<1x19x64xbf16>
    %6 = vector.shape_cast %5 : vector<1x19x64xbf16> to vector<19x64xbf16>
    %c1_7 = arith.constant 1 : index
    %c0_8 = arith.constant 0 : index
    %c0_9 = arith.constant 0 : index
    %7 = vector.load %arg2[%c1_7, %c0_8, %c0_9] : memref<4x64x32xbf16, #tpu.memory_space<vmem>>, vector<1x64x32xbf16>
    %8 = vector.shape_cast %7 : vector<1x64x32xbf16> to vector<64x32xbf16>
    %cst_10 = arith.constant dense<0.000000e+00> : vector<19x32xf32>
    %9 = tpu.matmul %6, %8, %cst_10 {dimension_numbers = #tpu.dot_dimension_numbers<[1], [0], [0], [1], [0, 0, 1, 1], [], []>} : vector<19x64xbf16>, vector<64x32xbf16>, vector<19x32xf32> -> vector<19x32xf32>
    %10 = arith.addf %4, %9 : vector<19x32xf32>
    %c0_11 = arith.constant 0 : index
    %c5 = arith.constant 5 : index
    %c0_12 = arith.constant 0 : index
    %11 = vector.load %arg1[%c0_11, %c5, %c0_12] : memref<1x25x64xbf16, #tpu.memory_space<vmem>>, vector<1x19x64xbf16>
    %12 = vector.shape_cast %11 : vector<1x19x64xbf16> to vector<19x64xbf16>
    %c2 = arith.constant 2 : index
    %c0_13 = arith.constant 0 : index
    %c0_14 = arith.constant 0 : index
    %13 = vector.load %arg2[%c2, %c0_13, %c0_14] : memref<4x64x32xbf16, #tpu.memory_space<vmem>>, vector<1x64x32xbf16>
    %14 = vector.shape_cast %13 : vector<1x64x32xbf16> to vector<64x32xbf16>
    %cst_15 = arith.constant dense<0.000000e+00> : vector<19x32xf32>
    %15 = tpu.matmul %12, %14, %cst_15 {dimension_numbers = #tpu.dot_dimension_numbers<[1], [0], [0], [1], [0, 0, 1, 1], [], []>} : vector<19x64xbf16>, vector<64x32xbf16>, vector<19x32xf32> -> vector<19x32xf32>
    %16 = arith.addf %10, %15 : vector<19x32xf32>
    %c0_16 = arith.constant 0 : index
    %c6 = arith.constant 6 : index
    %c0_17 = arith.constant 0 : index
    %17 = vector.load %arg1[%c0_16, %c6, %c0_17] : memref<1x25x64xbf16, #tpu.memory_space<vmem>>, vector<1x19x64xbf16>
    %18 = vector.shape_cast %17 : vector<1x19x64xbf16> to vector<19x64xbf16>
    %c3 = arith.constant 3 : index
    %c0_18 = arith.constant 0 : index
    %c0_19 = arith.constant 0 : index
    %19 = vector.load %arg2[%c3, %c0_18, %c0_19] : memref<4x64x32xbf16, #tpu.memory_space<vmem>>, vector<1x64x32xbf16>
    %20 = vector.shape_cast %19 : vector<1x64x32xbf16> to vector<64x32xbf16>
    %cst_20 = arith.constant dense<0.000000e+00> : vector<19x32xf32>
    %21 = tpu.matmul %18, %20, %cst_20 {dimension_numbers = #tpu.dot_dimension_numbers<[1], [0], [0], [1], [0, 0, 1, 1], [], []>} : vector<19x64xbf16>, vector<64x32xbf16>, vector<19x32xf32> -> vector<19x32xf32>
    %22 = arith.addf %16, %21 : vector<19x32xf32>
    %c0_21 = arith.constant 0 : index
    %c0_22 = arith.constant 0 : index
    %23 = vector.load %arg3[%c0_21, %c0_22] : memref<1x32xf32, #tpu.memory_space<vmem>>, vector<1x32xf32>
    %24 = vector.broadcast %23 : vector<1x32xf32> to vector<19x32xf32>
    %25 = arith.addf %22, %24 : vector<19x32xf32>
    %cst_23 = arith.constant 0.000000e+00 : f32
    %26 = vector.broadcast %cst_23 : f32 to vector<19x32xf32>
    %27 = arith.maximumf %25, %26 : vector<19x32xf32>
    %28 = arith.truncf %27 : vector<19x32xf32> to vector<19x32xbf16>
    %c0_24 = arith.constant 0 : index
    %c0_25 = arith.constant 0 : index
    %c0_26 = arith.constant 0 : index
    %29 = vector.load %arg4[%c0_24, %c0_25, %c0_26] : memref<1x19x32xbf16, #tpu.memory_space<vmem>>, vector<1x19x32xbf16>
    %30 = vector.shape_cast %29 : vector<1x19x32xbf16> to vector<19x32xbf16>
    %31 = vector.shape_cast %28 : vector<19x32xbf16> to vector<1x19x32xbf16>
    tpu.vector_store %arg4[%c0_24, %c0_25, %c0_26], %31 {strides = array<i32>} : memref<1x19x32xbf16, #tpu.memory_space<vmem>>, vector<1x19x32xbf16>,
    return
  }
  func.func @transform_0(%arg0: i32) -> (i32, i32, i32) {
    %c0_i32 = arith.constant 0 : i32
    %c0_i32_0 = arith.constant 0 : i32
    %c0_i32_1 = arith.constant 0 : i32
    return %arg0, %c0_i32, %c0_i32_0 : i32, i32, i32
  }
  func.func @transform_1(%arg0: i32) -> (i32, i32, i32) {
    %c0_i32 = arith.constant 0 : i32
    %c0_i32_0 = arith.constant 0 : i32
    %c0_i32_1 = arith.constant 0 : i32
    %c0_i32_2 = arith.constant 0 : i32
    return %c0_i32, %c0_i32_0, %c0_i32_1 : i32, i32, i32
  }
  func.func @transform_2(%arg0: i32) -> (i32, i32) {
    %c0_i32 = arith.constant 0 : i32
    %c0_i32_0 = arith.constant 0 : i32
    %c0_i32_1 = arith.constant 0 : i32
    return %c0_i32, %c0_i32_0 : i32, i32
  }
  func.func @transform_3(%arg0: i32) -> (i32, i32, i32) {
    %c0_i32 = arith.constant 0 : i32
    %c0_i32_0 = arith.constant 0 : i32
    %c0_i32_1 = arith.constant 0 : i32
    return %arg0, %c0_i32, %c0_i32_0 : i32, i32, i32
  }
}

module attributes {stable_mosaic.version = 11 : i64} {
  func.func @_tail_kernel(%arg0: i32, %arg1: memref<1x36x32xbf16, #tpu.memory_space<vmem>>, %arg2: memref<1x22x1xf32, #tpu.memory_space<vmem>>, %arg3: memref<9x32x32xbf16, #tpu.memory_space<vmem>>, %arg4: memref<1x32xf32, #tpu.memory_space<vmem>>, %arg5: memref<9x32x8xbf16, #tpu.memory_space<vmem>>, %arg6: memref<1x8xf32, #tpu.memory_space<vmem>>, %arg7: memref<8x32xbf16, #tpu.memory_space<vmem>>, %arg8: memref<1x32xf32, #tpu.memory_space<vmem>>, %arg9: memref<9x32x8xbf16, #tpu.memory_space<vmem>>, %arg10: memref<1x8xf32, #tpu.memory_space<vmem>>, %arg11: memref<8x32xbf16, #tpu.memory_space<vmem>>, %arg12: memref<1x32xf32, #tpu.memory_space<vmem>>, %arg13: memref<1x22x32xbf16, #tpu.memory_space<vmem>>, %arg14: memref<45x32xbf16, #tpu.memory_space<vmem>>, %arg15: memref<45x32xbf16, #tpu.memory_space<vmem>>) attributes {dimension_semantics = [#tpu.dimension_semantics<parallel>], iteration_bounds = array<i64: 2>, scalar_prefetch = 0 : i64, scratch_operands = 2 : i64, tpu.core_type = #tpu.core_type<tc>, window_params = [{transform_indices = @transform_0, window_bounds = array<i64: 1, 36, 32>}, {pipeline_mode = #tpu.pipeline_mode<synchronous>, transform_indices = @transform_1, window_bounds = array<i64: 1, 22, 1>}, {pipeline_mode = #tpu.pipeline_mode<synchronous>, transform_indices = @transform_2, window_bounds = array<i64: 9, 32, 32>}, {pipeline_mode = #tpu.pipeline_mode<synchronous>, transform_indices = @transform_3, window_bounds = array<i64: 1, 32>}, {pipeline_mode = #tpu.pipeline_mode<synchronous>, transform_indices = @transform_4, window_bounds = array<i64: 9, 32, 8>}, {pipeline_mode = #tpu.pipeline_mode<synchronous>, transform_indices = @transform_5, window_bounds = array<i64: 1, 8>}, {pipeline_mode = #tpu.pipeline_mode<synchronous>, transform_indices = @transform_6, window_bounds = array<i64: 8, 32>}, {pipeline_mode = #tpu.pipeline_mode<synchronous>, transform_indices = @transform_7, window_bounds = array<i64: 1, 32>}, {pipeline_mode = #tpu.pipeline_mode<synchronous>, transform_indices = @transform_8, window_bounds = array<i64: 9, 32, 8>}, {pipeline_mode = #tpu.pipeline_mode<synchronous>, transform_indices = @transform_9, window_bounds = array<i64: 1, 8>}, {pipeline_mode = #tpu.pipeline_mode<synchronous>, transform_indices = @transform_10, window_bounds = array<i64: 8, 32>}, {pipeline_mode = #tpu.pipeline_mode<synchronous>, transform_indices = @transform_11, window_bounds = array<i64: 1, 32>}, {transform_indices = @transform_12, window_bounds = array<i64: 1, 22, 32>}]} {
    %c0 = arith.constant 0 : index
    %c0_0 = arith.constant 0 : index
    %c0_1 = arith.constant 0 : index
    %0 = vector.load %arg2[%c0, %c0_0, %c0_1] : memref<1x22x1xf32, #tpu.memory_space<vmem>>, vector<1x22x1xf32>
    %1 = vector.shape_cast %0 : vector<1x22x1xf32> to vector<22x1xf32>
    %c0_2 = arith.constant 0 : index
    %c0_3 = arith.constant 0 : index
    %c0_4 = arith.constant 0 : index
    %2 = vector.load %arg1[%c0_2, %c0_3, %c0_4] : memref<1x36x32xbf16, #tpu.memory_space<vmem>>, vector<1x22x32xbf16>
    %3 = vector.shape_cast %2 : vector<1x22x32xbf16> to vector<22x32xbf16>
    %c0_5 = arith.constant 0 : index
    %c0_6 = arith.constant 0 : index
    %c0_7 = arith.constant 0 : index
    %4 = vector.load %arg3[%c0_5, %c0_6, %c0_7] : memref<9x32x32xbf16, #tpu.memory_space<vmem>>, vector<1x32x32xbf16>
    %5 = vector.shape_cast %4 : vector<1x32x32xbf16> to vector<32x32xbf16>
    %cst = arith.constant dense<0.000000e+00> : vector<22x32xf32>
    %6 = tpu.matmul %3, %5, %cst {dimension_numbers = #tpu.dot_dimension_numbers<[1], [0], [0], [1], [0, 0, 1, 1], [], []>} : vector<22x32xbf16>, vector<32x32xbf16>, vector<22x32xf32> -> vector<22x32xf32>
    %c0_8 = arith.constant 0 : index
    %c1 = arith.constant 1 : index
    %c0_9 = arith.constant 0 : index
    %7 = vector.load %arg1[%c0_8, %c1, %c0_9] : memref<1x36x32xbf16, #tpu.memory_space<vmem>>, vector<1x22x32xbf16>
    %8 = vector.shape_cast %7 : vector<1x22x32xbf16> to vector<22x32xbf16>
    %c1_10 = arith.constant 1 : index
    %c0_11 = arith.constant 0 : index
    %c0_12 = arith.constant 0 : index
    %9 = vector.load %arg3[%c1_10, %c0_11, %c0_12] : memref<9x32x32xbf16, #tpu.memory_space<vmem>>, vector<1x32x32xbf16>
    %10 = vector.shape_cast %9 : vector<1x32x32xbf16> to vector<32x32xbf16>
    %cst_13 = arith.constant dense<0.000000e+00> : vector<22x32xf32>
    %11 = tpu.matmul %8, %10, %cst_13 {dimension_numbers = #tpu.dot_dimension_numbers<[1], [0], [0], [1], [0, 0, 1, 1], [], []>} : vector<22x32xbf16>, vector<32x32xbf16>, vector<22x32xf32> -> vector<22x32xf32>
    %12 = arith.addf %6, %11 : vector<22x32xf32>
    %c0_14 = arith.constant 0 : index
    %c2 = arith.constant 2 : index
    %c0_15 = arith.constant 0 : index
    %13 = vector.load %arg1[%c0_14, %c2, %c0_15] : memref<1x36x32xbf16, #tpu.memory_space<vmem>>, vector<1x22x32xbf16>
    %14 = vector.shape_cast %13 : vector<1x22x32xbf16> to vector<22x32xbf16>
    %c2_16 = arith.constant 2 : index
    %c0_17 = arith.constant 0 : index
    %c0_18 = arith.constant 0 : index
    %15 = vector.load %arg3[%c2_16, %c0_17, %c0_18] : memref<9x32x32xbf16, #tpu.memory_space<vmem>>, vector<1x32x32xbf16>
    %16 = vector.shape_cast %15 : vector<1x32x32xbf16> to vector<32x32xbf16>
    %cst_19 = arith.constant dense<0.000000e+00> : vector<22x32xf32>
    %17 = tpu.matmul %14, %16, %cst_19 {dimension_numbers = #tpu.dot_dimension_numbers<[1], [0], [0], [1], [0, 0, 1, 1], [], []>} : vector<22x32xbf16>, vector<32x32xbf16>, vector<22x32xf32> -> vector<22x32xf32>
    %18 = arith.addf %12, %17 : vector<22x32xf32>
    %c0_20 = arith.constant 0 : index
    %c6 = arith.constant 6 : index
    %c0_21 = arith.constant 0 : index
    %19 = vector.load %arg1[%c0_20, %c6, %c0_21] : memref<1x36x32xbf16, #tpu.memory_space<vmem>>, vector<1x22x32xbf16>
    %20 = vector.shape_cast %19 : vector<1x22x32xbf16> to vector<22x32xbf16>
    %c3 = arith.constant 3 : index
    %c0_22 = arith.constant 0 : index
    %c0_23 = arith.constant 0 : index
    %21 = vector.load %arg3[%c3, %c0_22, %c0_23] : memref<9x32x32xbf16, #tpu.memory_space<vmem>>, vector<1x32x32xbf16>
    %22 = vector.shape_cast %21 : vector<1x32x32xbf16> to vector<32x32xbf16>
    %cst_24 = arith.constant dense<0.000000e+00> : vector<22x32xf32>
    %23 = tpu.matmul %20, %22, %cst_24 {dimension_numbers = #tpu.dot_dimension_numbers<[1], [0], [0], [1], [0, 0, 1, 1], [], []>} : vector<22x32xbf16>, vector<32x32xbf16>, vector<22x32xf32> -> vector<22x32xf32>
    %24 = arith.addf %18, %23 : vector<22x32xf32>
    %c0_25 = arith.constant 0 : index
    %c7 = arith.constant 7 : index
    %c0_26 = arith.constant 0 : index
    %25 = vector.load %arg1[%c0_25, %c7, %c0_26] : memref<1x36x32xbf16, #tpu.memory_space<vmem>>, vector<1x22x32xbf16>
    %26 = vector.shape_cast %25 : vector<1x22x32xbf16> to vector<22x32xbf16>
    %c4 = arith.constant 4 : index
    %c0_27 = arith.constant 0 : index
    %c0_28 = arith.constant 0 : index
    %27 = vector.load %arg3[%c4, %c0_27, %c0_28] : memref<9x32x32xbf16, #tpu.memory_space<vmem>>, vector<1x32x32xbf16>
    %28 = vector.shape_cast %27 : vector<1x32x32xbf16> to vector<32x32xbf16>
    %cst_29 = arith.constant dense<0.000000e+00> : vector<22x32xf32>
    %29 = tpu.matmul %26, %28, %cst_29 {dimension_numbers = #tpu.dot_dimension_numbers<[1], [0], [0], [1], [0, 0, 1, 1], [], []>} : vector<22x32xbf16>, vector<32x32xbf16>, vector<22x32xf32> -> vector<22x32xf32>
    %30 = arith.addf %24, %29 : vector<22x32xf32>
    %c0_30 = arith.constant 0 : index
    %c8 = arith.constant 8 : index
    %c0_31 = arith.constant 0 : index
    %31 = vector.load %arg1[%c0_30, %c8, %c0_31] : memref<1x36x32xbf16, #tpu.memory_space<vmem>>, vector<1x22x32xbf16>
    %32 = vector.shape_cast %31 : vector<1x22x32xbf16> to vector<22x32xbf16>
    %c5 = arith.constant 5 : index
    %c0_32 = arith.constant 0 : index
    %c0_33 = arith.constant 0 : index
    %33 = vector.load %arg3[%c5, %c0_32, %c0_33] : memref<9x32x32xbf16, #tpu.memory_space<vmem>>, vector<1x32x32xbf16>
    %34 = vector.shape_cast %33 : vector<1x32x32xbf16> to vector<32x32xbf16>
    %cst_34 = arith.constant dense<0.000000e+00> : vector<22x32xf32>
    %35 = tpu.matmul %32, %34, %cst_34 {dimension_numbers = #tpu.dot_dimension_numbers<[1], [0], [0], [1], [0, 0, 1, 1], [], []>} : vector<22x32xbf16>, vector<32x32xbf16>, vector<22x32xf32> -> vector<22x32xf32>
    %36 = arith.addf %30, %35 : vector<22x32xf32>
    %c0_35 = arith.constant 0 : index
    %c12 = arith.constant 12 : index
    %c0_36 = arith.constant 0 : index
    %37 = vector.load %arg1[%c0_35, %c12, %c0_36] : memref<1x36x32xbf16, #tpu.memory_space<vmem>>, vector<1x22x32xbf16>
    %38 = vector.shape_cast %37 : vector<1x22x32xbf16> to vector<22x32xbf16>
    %c6_37 = arith.constant 6 : index
    %c0_38 = arith.constant 0 : index
    %c0_39 = arith.constant 0 : index
    %39 = vector.load %arg3[%c6_37, %c0_38, %c0_39] : memref<9x32x32xbf16, #tpu.memory_space<vmem>>, vector<1x32x32xbf16>
    %40 = vector.shape_cast %39 : vector<1x32x32xbf16> to vector<32x32xbf16>
    %cst_40 = arith.constant dense<0.000000e+00> : vector<22x32xf32>
    %41 = tpu.matmul %38, %40, %cst_40 {dimension_numbers = #tpu.dot_dimension_numbers<[1], [0], [0], [1], [0, 0, 1, 1], [], []>} : vector<22x32xbf16>, vector<32x32xbf16>, vector<22x32xf32> -> vector<22x32xf32>
    %42 = arith.addf %36, %41 : vector<22x32xf32>
    %c0_41 = arith.constant 0 : index
    %c13 = arith.constant 13 : index
    %c0_42 = arith.constant 0 : index
    %43 = vector.load %arg1[%c0_41, %c13, %c0_42] : memref<1x36x32xbf16, #tpu.memory_space<vmem>>, vector<1x22x32xbf16>
    %44 = vector.shape_cast %43 : vector<1x22x32xbf16> to vector<22x32xbf16>
    %c7_43 = arith.constant 7 : index
    %c0_44 = arith.constant 0 : index
    %c0_45 = arith.constant 0 : index
    %45 = vector.load %arg3[%c7_43, %c0_44, %c0_45] : memref<9x32x32xbf16, #tpu.memory_space<vmem>>, vector<1x32x32xbf16>
    %46 = vector.shape_cast %45 : vector<1x32x32xbf16> to vector<32x32xbf16>
    %cst_46 = arith.constant dense<0.000000e+00> : vector<22x32xf32>
    %47 = tpu.matmul %44, %46, %cst_46 {dimension_numbers = #tpu.dot_dimension_numbers<[1], [0], [0], [1], [0, 0, 1, 1], [], []>} : vector<22x32xbf16>, vector<32x32xbf16>, vector<22x32xf32> -> vector<22x32xf32>
    %48 = arith.addf %42, %47 : vector<22x32xf32>
    %c0_47 = arith.constant 0 : index
    %c14 = arith.constant 14 : index
    %c0_48 = arith.constant 0 : index
    %49 = vector.load %arg1[%c0_47, %c14, %c0_48] : memref<1x36x32xbf16, #tpu.memory_space<vmem>>, vector<1x22x32xbf16>
    %50 = vector.shape_cast %49 : vector<1x22x32xbf16> to vector<22x32xbf16>
    %c8_49 = arith.constant 8 : index
    %c0_50 = arith.constant 0 : index
    %c0_51 = arith.constant 0 : index
    %51 = vector.load %arg3[%c8_49, %c0_50, %c0_51] : memref<9x32x32xbf16, #tpu.memory_space<vmem>>, vector<1x32x32xbf16>
    %52 = vector.shape_cast %51 : vector<1x32x32xbf16> to vector<32x32xbf16>
    %cst_52 = arith.constant dense<0.000000e+00> : vector<22x32xf32>
    %53 = tpu.matmul %50, %52, %cst_52 {dimension_numbers = #tpu.dot_dimension_numbers<[1], [0], [0], [1], [0, 0, 1, 1], [], []>} : vector<22x32xbf16>, vector<32x32xbf16>, vector<22x32xf32> -> vector<22x32xf32>
    %54 = arith.addf %48, %53 : vector<22x32xf32>
    %c0_53 = arith.constant 0 : index
    %c0_54 = arith.constant 0 : index
    %55 = vector.load %arg4[%c0_53, %c0_54] : memref<1x32xf32, #tpu.memory_space<vmem>>, vector<1x32xf32>
    %56 = vector.broadcast %55 : vector<1x32xf32> to vector<22x32xf32>
    %57 = arith.addf %54, %56 : vector<22x32xf32>
    %cst_55 = arith.constant 0.000000e+00 : bf16
    %58 = vector.broadcast %cst_55 : bf16 to vector<45x32xbf16>
    %c0_56 = arith.constant 0 : index
    %c0_57 = arith.constant 0 : index
    %59 = vector.load %arg14[%c0_56, %c0_57] : memref<45x32xbf16, #tpu.memory_space<vmem>>, vector<45x32xbf16>
    tpu.vector_store %arg14[%c0_56, %c0_57], %58 {strides = array<i32>} : memref<45x32xbf16, #tpu.memory_space<vmem>>, vector<45x32xbf16>,
    %60 = vector.broadcast %1 : vector<22x1xf32> to vector<22x32xf32>
    %61 = arith.mulf %57, %60 : vector<22x32xf32>
    %62 = arith.truncf %61 : vector<22x32xf32> to vector<22x32xbf16>
    %c16 = arith.constant 16 : index
    %c0_58 = arith.constant 0 : index
    %63 = vector.load %arg14[%c16, %c0_58] : memref<45x32xbf16, #tpu.memory_space<vmem>>, vector<22x32xbf16>
    tpu.vector_store %arg14[%c16, %c0_58], %62 {strides = array<i32>} : memref<45x32xbf16, #tpu.memory_space<vmem>>, vector<22x32xbf16>,
    %c0_59 = arith.constant 0 : index
    %c0_60 = arith.constant 0 : index
    %64 = vector.load %arg14[%c0_59, %c0_60] : memref<45x32xbf16, #tpu.memory_space<vmem>>, vector<45x32xbf16>
    %cst_61 = arith.constant 0.000000e+00 : bf16
    %65 = vector.broadcast %cst_61 : bf16 to vector<45x32xbf16>
    %66 = arith.maximumf %64, %65 : vector<45x32xbf16>
    %c0_62 = arith.constant 0 : index
    %c0_63 = arith.constant 0 : index
    %67 = vector.load %arg15[%c0_62, %c0_63] : memref<45x32xbf16, #tpu.memory_space<vmem>>, vector<45x32xbf16>
    tpu.vector_store %arg15[%c0_62, %c0_63], %66 {strides = array<i32>} : memref<45x32xbf16, #tpu.memory_space<vmem>>, vector<45x32xbf16>,
    %c9 = arith.constant 9 : index
    %c0_64 = arith.constant 0 : index
    %68 = vector.load %arg15[%c9, %c0_64] : memref<45x32xbf16, #tpu.memory_space<vmem>>, vector<22x32xbf16>
    %c0_65 = arith.constant 0 : index
    %c0_66 = arith.constant 0 : index
    %c0_67 = arith.constant 0 : index
    %69 = vector.load %arg5[%c0_65, %c0_66, %c0_67] : memref<9x32x8xbf16, #tpu.memory_space<vmem>>, vector<1x32x8xbf16>
    %70 = vector.shape_cast %69 : vector<1x32x8xbf16> to vector<32x8xbf16>
    %cst_68 = arith.constant dense<0.000000e+00> : vector<22x8xf32>
    %71 = tpu.matmul %68, %70, %cst_68 {dimension_numbers = #tpu.dot_dimension_numbers<[1], [0], [0], [1], [0, 0, 1, 1], [], []>} : vector<22x32xbf16>, vector<32x8xbf16>, vector<22x8xf32> -> vector<22x8xf32>
    %c10 = arith.constant 10 : index
    %c0_69 = arith.constant 0 : index
    %72 = vector.load %arg15[%c10, %c0_69] : memref<45x32xbf16, #tpu.memory_space<vmem>>, vector<22x32xbf16>
    %c1_70 = arith.constant 1 : index
    %c0_71 = arith.constant 0 : index
    %c0_72 = arith.constant 0 : index
    %73 = vector.load %arg5[%c1_70, %c0_71, %c0_72] : memref<9x32x8xbf16, #tpu.memory_space<vmem>>, vector<1x32x8xbf16>
    %74 = vector.shape_cast %73 : vector<1x32x8xbf16> to vector<32x8xbf16>
    %cst_73 = arith.constant dense<0.000000e+00> : vector<22x8xf32>
    %75 = tpu.matmul %72, %74, %cst_73 {dimension_numbers = #tpu.dot_dimension_numbers<[1], [0], [0], [1], [0, 0, 1, 1], [], []>} : vector<22x32xbf16>, vector<32x8xbf16>, vector<22x8xf32> -> vector<22x8xf32>
    %76 = arith.addf %71, %75 : vector<22x8xf32>
    %c11 = arith.constant 11 : index
    %c0_74 = arith.constant 0 : index
    %77 = vector.load %arg15[%c11, %c0_74] : memref<45x32xbf16, #tpu.memory_space<vmem>>, vector<22x32xbf16>
    %c2_75 = arith.constant 2 : index
    %c0_76 = arith.constant 0 : index
    %c0_77 = arith.constant 0 : index
    %78 = vector.load %arg5[%c2_75, %c0_76, %c0_77] : memref<9x32x8xbf16, #tpu.memory_space<vmem>>, vector<1x32x8xbf16>
    %79 = vector.shape_cast %78 : vector<1x32x8xbf16> to vector<32x8xbf16>
    %cst_78 = arith.constant dense<0.000000e+00> : vector<22x8xf32>
    %80 = tpu.matmul %77, %79, %cst_78 {dimension_numbers = #tpu.dot_dimension_numbers<[1], [0], [0], [1], [0, 0, 1, 1], [], []>} : vector<22x32xbf16>, vector<32x8xbf16>, vector<22x8xf32> -> vector<22x8xf32>
    %81 = arith.addf %76, %80 : vector<22x8xf32>
    %c15 = arith.constant 15 : index
    %c0_79 = arith.constant 0 : index
    %82 = vector.load %arg15[%c15, %c0_79] : memref<45x32xbf16, #tpu.memory_space<vmem>>, vector<22x32xbf16>
    %c3_80 = arith.constant 3 : index
    %c0_81 = arith.constant 0 : index
    %c0_82 = arith.constant 0 : index
    %83 = vector.load %arg5[%c3_80, %c0_81, %c0_82] : memref<9x32x8xbf16, #tpu.memory_space<vmem>>, vector<1x32x8xbf16>
    %84 = vector.shape_cast %83 : vector<1x32x8xbf16> to vector<32x8xbf16>
    %cst_83 = arith.constant dense<0.000000e+00> : vector<22x8xf32>
    %85 = tpu.matmul %82, %84, %cst_83 {dimension_numbers = #tpu.dot_dimension_numbers<[1], [0], [0], [1], [0, 0, 1, 1], [], []>} : vector<22x32xbf16>, vector<32x8xbf16>, vector<22x8xf32> -> vector<22x8xf32>
    %86 = arith.addf %81, %85 : vector<22x8xf32>
    %c16_84 = arith.constant 16 : index
    %c0_85 = arith.constant 0 : index
    %87 = vector.load %arg15[%c16_84, %c0_85] : memref<45x32xbf16, #tpu.memory_space<vmem>>, vector<22x32xbf16>
    %c4_86 = arith.constant 4 : index
    %c0_87 = arith.constant 0 : index
    %c0_88 = arith.constant 0 : index
    %88 = vector.load %arg5[%c4_86, %c0_87, %c0_88] : memref<9x32x8xbf16, #tpu.memory_space<vmem>>, vector<1x32x8xbf16>
    %89 = vector.shape_cast %88 : vector<1x32x8xbf16> to vector<32x8xbf16>
    %cst_89 = arith.constant dense<0.000000e+00> : vector<22x8xf32>
    %90 = tpu.matmul %87, %89, %cst_89 {dimension_numbers = #tpu.dot_dimension_numbers<[1], [0], [0], [1], [0, 0, 1, 1], [], []>} : vector<22x32xbf16>, vector<32x8xbf16>, vector<22x8xf32> -> vector<22x8xf32>
    %91 = arith.addf %86, %90 : vector<22x8xf32>
    %c17 = arith.constant 17 : index
    %c0_90 = arith.constant 0 : index
    %92 = vector.load %arg15[%c17, %c0_90] : memref<45x32xbf16, #tpu.memory_space<vmem>>, vector<22x32xbf16>
    %c5_91 = arith.constant 5 : index
    %c0_92 = arith.constant 0 : index
    %c0_93 = arith.constant 0 : index
    %93 = vector.load %arg5[%c5_91, %c0_92, %c0_93] : memref<9x32x8xbf16, #tpu.memory_space<vmem>>, vector<1x32x8xbf16>
    %94 = vector.shape_cast %93 : vector<1x32x8xbf16> to vector<32x8xbf16>
    %cst_94 = arith.constant dense<0.000000e+00> : vector<22x8xf32>
    %95 = tpu.matmul %92, %94, %cst_94 {dimension_numbers = #tpu.dot_dimension_numbers<[1], [0], [0], [1], [0, 0, 1, 1], [], []>} : vector<22x32xbf16>, vector<32x8xbf16>, vector<22x8xf32> -> vector<22x8xf32>
    %96 = arith.addf %91, %95 : vector<22x8xf32>
    %c21 = arith.constant 21 : index
    %c0_95 = arith.constant 0 : index
    %97 = vector.load %arg15[%c21, %c0_95] : memref<45x32xbf16, #tpu.memory_space<vmem>>, vector<22x32xbf16>
    %c6_96 = arith.constant 6 : index
    %c0_97 = arith.constant 0 : index
    %c0_98 = arith.constant 0 : index
    %98 = vector.load %arg5[%c6_96, %c0_97, %c0_98] : memref<9x32x8xbf16, #tpu.memory_space<vmem>>, vector<1x32x8xbf16>
    %99 = vector.shape_cast %98 : vector<1x32x8xbf16> to vector<32x8xbf16>
    %cst_99 = arith.constant dense<0.000000e+00> : vector<22x8xf32>
    %100 = tpu.matmul %97, %99, %cst_99 {dimension_numbers = #tpu.dot_dimension_numbers<[1], [0], [0], [1], [0, 0, 1, 1], [], []>} : vector<22x32xbf16>, vector<32x8xbf16>, vector<22x8xf32> -> vector<22x8xf32>
    %101 = arith.addf %96, %100 : vector<22x8xf32>
    %c22 = arith.constant 22 : index
    %c0_100 = arith.constant 0 : index
    %102 = vector.load %arg15[%c22, %c0_100] : memref<45x32xbf16, #tpu.memory_space<vmem>>, vector<22x32xbf16>
    %c7_101 = arith.constant 7 : index
    %c0_102 = arith.constant 0 : index
    %c0_103 = arith.constant 0 : index
    %103 = vector.load %arg5[%c7_101, %c0_102, %c0_103] : memref<9x32x8xbf16, #tpu.memory_space<vmem>>, vector<1x32x8xbf16>
    %104 = vector.shape_cast %103 : vector<1x32x8xbf16> to vector<32x8xbf16>
    %cst_104 = arith.constant dense<0.000000e+00> : vector<22x8xf32>
    %105 = tpu.matmul %102, %104, %cst_104 {dimension_numbers = #tpu.dot_dimension_numbers<[1], [0], [0], [1], [0, 0, 1, 1], [], []>} : vector<22x32xbf16>, vector<32x8xbf16>, vector<22x8xf32> -> vector<22x8xf32>
    %106 = arith.addf %101, %105 : vector<22x8xf32>
    %c23 = arith.constant 23 : index
    %c0_105 = arith.constant 0 : index
    %107 = vector.load %arg15[%c23, %c0_105] : memref<45x32xbf16, #tpu.memory_space<vmem>>, vector<22x32xbf16>
    %c8_106 = arith.constant 8 : index
    %c0_107 = arith.constant 0 : index
    %c0_108 = arith.constant 0 : index
    %108 = vector.load %arg5[%c8_106, %c0_107, %c0_108] : memref<9x32x8xbf16, #tpu.memory_space<vmem>>, vector<1x32x8xbf16>
    %109 = vector.shape_cast %108 : vector<1x32x8xbf16> to vector<32x8xbf16>
    %cst_109 = arith.constant dense<0.000000e+00> : vector<22x8xf32>
    %110 = tpu.matmul %107, %109, %cst_109 {dimension_numbers = #tpu.dot_dimension_numbers<[1], [0], [0], [1], [0, 0, 1, 1], [], []>} : vector<22x32xbf16>, vector<32x8xbf16>, vector<22x8xf32> -> vector<22x8xf32>
    %111 = arith.addf %106, %110 : vector<22x8xf32>
    %c0_110 = arith.constant 0 : index
    %c0_111 = arith.constant 0 : index
    %112 = vector.load %arg6[%c0_110, %c0_111] : memref<1x8xf32, #tpu.memory_space<vmem>>, vector<1x8xf32>
    %113 = vector.broadcast %112 : vector<1x8xf32> to vector<22x8xf32>
    %114 = arith.addf %111, %113 : vector<22x8xf32>
    %cst_112 = arith.constant 0.000000e+00 : f32
    %115 = vector.broadcast %cst_112 : f32 to vector<22x8xf32>
    %116 = arith.maximumf %114, %115 : vector<22x8xf32>
    %117 = arith.truncf %116 : vector<22x8xf32> to vector<22x8xbf16>
    %c0_113 = arith.constant 0 : index
    %c0_114 = arith.constant 0 : index
    %118 = vector.load %arg7[%c0_113, %c0_114] : memref<8x32xbf16, #tpu.memory_space<vmem>>, vector<8x32xbf16>
    %cst_115 = arith.constant dense<0.000000e+00> : vector<22x32xf32>
    %119 = tpu.matmul %117, %118, %cst_115 {dimension_numbers = #tpu.dot_dimension_numbers<[1], [0], [0], [1], [0, 0, 1, 1], [], []>} : vector<22x8xbf16>, vector<8x32xbf16>, vector<22x32xf32> -> vector<22x32xf32>
    %c0_116 = arith.constant 0 : index
    %c0_117 = arith.constant 0 : index
    %120 = vector.load %arg8[%c0_116, %c0_117] : memref<1x32xf32, #tpu.memory_space<vmem>>, vector<1x32xf32>
    %121 = vector.broadcast %120 : vector<1x32xf32> to vector<22x32xf32>
    %122 = arith.addf %119, %121 : vector<22x32xf32>
    %c16_118 = arith.constant 16 : index
    %c0_119 = arith.constant 0 : index
    %123 = vector.load %arg14[%c16_118, %c0_119] : memref<45x32xbf16, #tpu.memory_space<vmem>>, vector<22x32xbf16>
    %124 = arith.extf %123 : vector<22x32xbf16> to vector<22x32xf32>
    %125 = arith.addf %122, %124 : vector<22x32xf32>
    %126 = vector.broadcast %1 : vector<22x1xf32> to vector<22x32xf32>
    %127 = arith.mulf %125, %126 : vector<22x32xf32>
    %128 = arith.truncf %127 : vector<22x32xf32> to vector<22x32xbf16>
    %c16_120 = arith.constant 16 : index
    %c0_121 = arith.constant 0 : index
    %129 = vector.load %arg14[%c16_120, %c0_121] : memref<45x32xbf16, #tpu.memory_space<vmem>>, vector<22x32xbf16>
    tpu.vector_store %arg14[%c16_120, %c0_121], %128 {strides = array<i32>} : memref<45x32xbf16, #tpu.memory_space<vmem>>, vector<22x32xbf16>,
    %c0_122 = arith.constant 0 : index
    %c0_123 = arith.constant 0 : index
    %130 = vector.load %arg14[%c0_122, %c0_123] : memref<45x32xbf16, #tpu.memory_space<vmem>>, vector<45x32xbf16>
    %cst_124 = arith.constant 0.000000e+00 : bf16
    %131 = vector.broadcast %cst_124 : bf16 to vector<45x32xbf16>
    %132 = arith.maximumf %130, %131 : vector<45x32xbf16>
    %c0_125 = arith.constant 0 : index
    %c0_126 = arith.constant 0 : index
    %133 = vector.load %arg15[%c0_125, %c0_126] : memref<45x32xbf16, #tpu.memory_space<vmem>>, vector<45x32xbf16>
    tpu.vector_store %arg15[%c0_125, %c0_126], %132 {strides = array<i32>} : memref<45x32xbf16, #tpu.memory_space<vmem>>, vector<45x32xbf16>,
    %c9_127 = arith.constant 9 : index
    %c0_128 = arith.constant 0 : index
    %134 = vector.load %arg15[%c9_127, %c0_128] : memref<45x32xbf16, #tpu.memory_space<vmem>>, vector<22x32xbf16>
    %c0_129 = arith.constant 0 : index
    %c0_130 = arith.constant 0 : index
    %c0_131 = arith.constant 0 : index
    %135 = vector.load %arg9[%c0_129, %c0_130, %c0_131] : memref<9x32x8xbf16, #tpu.memory_space<vmem>>, vector<1x32x8xbf16>
    %136 = vector.shape_cast %135 : vector<1x32x8xbf16> to vector<32x8xbf16>
    %cst_132 = arith.constant dense<0.000000e+00> : vector<22x8xf32>
    %137 = tpu.matmul %134, %136, %cst_132 {dimension_numbers = #tpu.dot_dimension_numbers<[1], [0], [0], [1], [0, 0, 1, 1], [], []>} : vector<22x32xbf16>, vector<32x8xbf16>, vector<22x8xf32> -> vector<22x8xf32>
    %c10_133 = arith.constant 10 : index
    %c0_134 = arith.constant 0 : index
    %138 = vector.load %arg15[%c10_133, %c0_134] : memref<45x32xbf16, #tpu.memory_space<vmem>>, vector<22x32xbf16>
    %c1_135 = arith.constant 1 : index
    %c0_136 = arith.constant 0 : index
    %c0_137 = arith.constant 0 : index
    %139 = vector.load %arg9[%c1_135, %c0_136, %c0_137] : memref<9x32x8xbf16, #tpu.memory_space<vmem>>, vector<1x32x8xbf16>
    %140 = vector.shape_cast %139 : vector<1x32x8xbf16> to vector<32x8xbf16>
    %cst_138 = arith.constant dense<0.000000e+00> : vector<22x8xf32>
    %141 = tpu.matmul %138, %140, %cst_138 {dimension_numbers = #tpu.dot_dimension_numbers<[1], [0], [0], [1], [0, 0, 1, 1], [], []>} : vector<22x32xbf16>, vector<32x8xbf16>, vector<22x8xf32> -> vector<22x8xf32>
    %142 = arith.addf %137, %141 : vector<22x8xf32>
    %c11_139 = arith.constant 11 : index
    %c0_140 = arith.constant 0 : index
    %143 = vector.load %arg15[%c11_139, %c0_140] : memref<45x32xbf16, #tpu.memory_space<vmem>>, vector<22x32xbf16>
    %c2_141 = arith.constant 2 : index
    %c0_142 = arith.constant 0 : index
    %c0_143 = arith.constant 0 : index
    %144 = vector.load %arg9[%c2_141, %c0_142, %c0_143] : memref<9x32x8xbf16, #tpu.memory_space<vmem>>, vector<1x32x8xbf16>
    %145 = vector.shape_cast %144 : vector<1x32x8xbf16> to vector<32x8xbf16>
    %cst_144 = arith.constant dense<0.000000e+00> : vector<22x8xf32>
    %146 = tpu.matmul %143, %145, %cst_144 {dimension_numbers = #tpu.dot_dimension_numbers<[1], [0], [0], [1], [0, 0, 1, 1], [], []>} : vector<22x32xbf16>, vector<32x8xbf16>, vector<22x8xf32> -> vector<22x8xf32>
    %147 = arith.addf %142, %146 : vector<22x8xf32>
    %c15_145 = arith.constant 15 : index
    %c0_146 = arith.constant 0 : index
    %148 = vector.load %arg15[%c15_145, %c0_146] : memref<45x32xbf16, #tpu.memory_space<vmem>>, vector<22x32xbf16>
    %c3_147 = arith.constant 3 : index
    %c0_148 = arith.constant 0 : index
    %c0_149 = arith.constant 0 : index
    %149 = vector.load %arg9[%c3_147, %c0_148, %c0_149] : memref<9x32x8xbf16, #tpu.memory_space<vmem>>, vector<1x32x8xbf16>
    %150 = vector.shape_cast %149 : vector<1x32x8xbf16> to vector<32x8xbf16>
    %cst_150 = arith.constant dense<0.000000e+00> : vector<22x8xf32>
    %151 = tpu.matmul %148, %150, %cst_150 {dimension_numbers = #tpu.dot_dimension_numbers<[1], [0], [0], [1], [0, 0, 1, 1], [], []>} : vector<22x32xbf16>, vector<32x8xbf16>, vector<22x8xf32> -> vector<22x8xf32>
    %152 = arith.addf %147, %151 : vector<22x8xf32>
    %c16_151 = arith.constant 16 : index
    %c0_152 = arith.constant 0 : index
    %153 = vector.load %arg15[%c16_151, %c0_152] : memref<45x32xbf16, #tpu.memory_space<vmem>>, vector<22x32xbf16>
    %c4_153 = arith.constant 4 : index
    %c0_154 = arith.constant 0 : index
    %c0_155 = arith.constant 0 : index
    %154 = vector.load %arg9[%c4_153, %c0_154, %c0_155] : memref<9x32x8xbf16, #tpu.memory_space<vmem>>, vector<1x32x8xbf16>
    %155 = vector.shape_cast %154 : vector<1x32x8xbf16> to vector<32x8xbf16>
    %cst_156 = arith.constant dense<0.000000e+00> : vector<22x8xf32>
    %156 = tpu.matmul %153, %155, %cst_156 {dimension_numbers = #tpu.dot_dimension_numbers<[1], [0], [0], [1], [0, 0, 1, 1], [], []>} : vector<22x32xbf16>, vector<32x8xbf16>, vector<22x8xf32> -> vector<22x8xf32>
    %157 = arith.addf %152, %156 : vector<22x8xf32>
    %c17_157 = arith.constant 17 : index
    %c0_158 = arith.constant 0 : index
    %158 = vector.load %arg15[%c17_157, %c0_158] : memref<45x32xbf16, #tpu.memory_space<vmem>>, vector<22x32xbf16>
    %c5_159 = arith.constant 5 : index
    %c0_160 = arith.constant 0 : index
    %c0_161 = arith.constant 0 : index
    %159 = vector.load %arg9[%c5_159, %c0_160, %c0_161] : memref<9x32x8xbf16, #tpu.memory_space<vmem>>, vector<1x32x8xbf16>
    %160 = vector.shape_cast %159 : vector<1x32x8xbf16> to vector<32x8xbf16>
    %cst_162 = arith.constant dense<0.000000e+00> : vector<22x8xf32>
    %161 = tpu.matmul %158, %160, %cst_162 {dimension_numbers = #tpu.dot_dimension_numbers<[1], [0], [0], [1], [0, 0, 1, 1], [], []>} : vector<22x32xbf16>, vector<32x8xbf16>, vector<22x8xf32> -> vector<22x8xf32>
    %162 = arith.addf %157, %161 : vector<22x8xf32>
    %c21_163 = arith.constant 21 : index
    %c0_164 = arith.constant 0 : index
    %163 = vector.load %arg15[%c21_163, %c0_164] : memref<45x32xbf16, #tpu.memory_space<vmem>>, vector<22x32xbf16>
    %c6_165 = arith.constant 6 : index
    %c0_166 = arith.constant 0 : index
    %c0_167 = arith.constant 0 : index
    %164 = vector.load %arg9[%c6_165, %c0_166, %c0_167] : memref<9x32x8xbf16, #tpu.memory_space<vmem>>, vector<1x32x8xbf16>
    %165 = vector.shape_cast %164 : vector<1x32x8xbf16> to vector<32x8xbf16>
    %cst_168 = arith.constant dense<0.000000e+00> : vector<22x8xf32>
    %166 = tpu.matmul %163, %165, %cst_168 {dimension_numbers = #tpu.dot_dimension_numbers<[1], [0], [0], [1], [0, 0, 1, 1], [], []>} : vector<22x32xbf16>, vector<32x8xbf16>, vector<22x8xf32> -> vector<22x8xf32>
    %167 = arith.addf %162, %166 : vector<22x8xf32>
    %c22_169 = arith.constant 22 : index
    %c0_170 = arith.constant 0 : index
    %168 = vector.load %arg15[%c22_169, %c0_170] : memref<45x32xbf16, #tpu.memory_space<vmem>>, vector<22x32xbf16>
    %c7_171 = arith.constant 7 : index
    %c0_172 = arith.constant 0 : index
    %c0_173 = arith.constant 0 : index
    %169 = vector.load %arg9[%c7_171, %c0_172, %c0_173] : memref<9x32x8xbf16, #tpu.memory_space<vmem>>, vector<1x32x8xbf16>
    %170 = vector.shape_cast %169 : vector<1x32x8xbf16> to vector<32x8xbf16>
    %cst_174 = arith.constant dense<0.000000e+00> : vector<22x8xf32>
    %171 = tpu.matmul %168, %170, %cst_174 {dimension_numbers = #tpu.dot_dimension_numbers<[1], [0], [0], [1], [0, 0, 1, 1], [], []>} : vector<22x32xbf16>, vector<32x8xbf16>, vector<22x8xf32> -> vector<22x8xf32>
    %172 = arith.addf %167, %171 : vector<22x8xf32>
    %c23_175 = arith.constant 23 : index
    %c0_176 = arith.constant 0 : index
    %173 = vector.load %arg15[%c23_175, %c0_176] : memref<45x32xbf16, #tpu.memory_space<vmem>>, vector<22x32xbf16>
    %c8_177 = arith.constant 8 : index
    %c0_178 = arith.constant 0 : index
    %c0_179 = arith.constant 0 : index
    %174 = vector.load %arg9[%c8_177, %c0_178, %c0_179] : memref<9x32x8xbf16, #tpu.memory_space<vmem>>, vector<1x32x8xbf16>
    %175 = vector.shape_cast %174 : vector<1x32x8xbf16> to vector<32x8xbf16>
    %cst_180 = arith.constant dense<0.000000e+00> : vector<22x8xf32>
    %176 = tpu.matmul %173, %175, %cst_180 {dimension_numbers = #tpu.dot_dimension_numbers<[1], [0], [0], [1], [0, 0, 1, 1], [], []>} : vector<22x32xbf16>, vector<32x8xbf16>, vector<22x8xf32> -> vector<22x8xf32>
    %177 = arith.addf %172, %176 : vector<22x8xf32>
    %c0_181 = arith.constant 0 : index
    %c0_182 = arith.constant 0 : index
    %178 = vector.load %arg10[%c0_181, %c0_182] : memref<1x8xf32, #tpu.memory_space<vmem>>, vector<1x8xf32>
    %179 = vector.broadcast %178 : vector<1x8xf32> to vector<22x8xf32>
    %180 = arith.addf %177, %179 : vector<22x8xf32>
    %cst_183 = arith.constant 0.000000e+00 : f32
    %181 = vector.broadcast %cst_183 : f32 to vector<22x8xf32>
    %182 = arith.maximumf %180, %181 : vector<22x8xf32>
    %183 = arith.truncf %182 : vector<22x8xf32> to vector<22x8xbf16>
    %c0_184 = arith.constant 0 : index
    %c0_185 = arith.constant 0 : index
    %184 = vector.load %arg11[%c0_184, %c0_185] : memref<8x32xbf16, #tpu.memory_space<vmem>>, vector<8x32xbf16>
    %cst_186 = arith.constant dense<0.000000e+00> : vector<22x32xf32>
    %185 = tpu.matmul %183, %184, %cst_186 {dimension_numbers = #tpu.dot_dimension_numbers<[1], [0], [0], [1], [0, 0, 1, 1], [], []>} : vector<22x8xbf16>, vector<8x32xbf16>, vector<22x32xf32> -> vector<22x32xf32>
    %c0_187 = arith.constant 0 : index
    %c0_188 = arith.constant 0 : index
    %186 = vector.load %arg12[%c0_187, %c0_188] : memref<1x32xf32, #tpu.memory_space<vmem>>, vector<1x32xf32>
    %187 = vector.broadcast %186 : vector<1x32xf32> to vector<22x32xf32>
    %188 = arith.addf %185, %187 : vector<22x32xf32>
    %c16_189 = arith.constant 16 : index
    %c0_190 = arith.constant 0 : index
    %189 = vector.load %arg14[%c16_189, %c0_190] : memref<45x32xbf16, #tpu.memory_space<vmem>>, vector<22x32xbf16>
    %190 = arith.extf %189 : vector<22x32xbf16> to vector<22x32xf32>
    %191 = arith.addf %188, %190 : vector<22x32xf32>
    %cst_191 = arith.constant 0.000000e+00 : f32
    %192 = vector.broadcast %cst_191 : f32 to vector<22x32xf32>
    %193 = arith.maximumf %191, %192 : vector<22x32xf32>
    %194 = arith.truncf %193 : vector<22x32xf32> to vector<22x32xbf16>
    %c0_192 = arith.constant 0 : index
    %c0_193 = arith.constant 0 : index
    %c0_194 = arith.constant 0 : index
    %195 = vector.load %arg13[%c0_192, %c0_193, %c0_194] : memref<1x22x32xbf16, #tpu.memory_space<vmem>>, vector<1x22x32xbf16>
    %196 = vector.shape_cast %195 : vector<1x22x32xbf16> to vector<22x32xbf16>
    %197 = vector.shape_cast %194 : vector<22x32xbf16> to vector<1x22x32xbf16>
    tpu.vector_store %arg13[%c0_192, %c0_193, %c0_194], %197 {strides = array<i32>} : memref<1x22x32xbf16, #tpu.memory_space<vmem>>, vector<1x22x32xbf16>,
    return
  }
  func.func @transform_0(%arg0: i32) -> (i32, i32, i32) {
    %c0_i32 = arith.constant 0 : i32
    %c0_i32_0 = arith.constant 0 : i32
    %c0_i32_1 = arith.constant 0 : i32
    return %arg0, %c0_i32, %c0_i32_0 : i32, i32, i32
  }
  func.func @transform_1(%arg0: i32) -> (i32, i32, i32) {
    %c0_i32 = arith.constant 0 : i32
    %c0_i32_0 = arith.constant 0 : i32
    %c0_i32_1 = arith.constant 0 : i32
    %c0_i32_2 = arith.constant 0 : i32
    return %c0_i32, %c0_i32_0, %c0_i32_1 : i32, i32, i32
  }
  func.func @transform_2(%arg0: i32) -> (i32, i32, i32) {
    %c0_i32 = arith.constant 0 : i32
    %c0_i32_0 = arith.constant 0 : i32
    %c0_i32_1 = arith.constant 0 : i32
    %c0_i32_2 = arith.constant 0 : i32
    return %c0_i32, %c0_i32_0, %c0_i32_1 : i32, i32, i32
  }
  func.func @transform_3(%arg0: i32) -> (i32, i32) {
    %c0_i32 = arith.constant 0 : i32
    %c0_i32_0 = arith.constant 0 : i32
    %c0_i32_1 = arith.constant 0 : i32
    return %c0_i32, %c0_i32_0 : i32, i32
  }
  func.func @transform_4(%arg0: i32) -> (i32, i32, i32) {
    %c0_i32 = arith.constant 0 : i32
    %c0_i32_0 = arith.constant 0 : i32
    %c0_i32_1 = arith.constant 0 : i32
    %c0_i32_2 = arith.constant 0 : i32
    return %c0_i32, %c0_i32_0, %c0_i32_1 : i32, i32, i32
  }
  func.func @transform_5(%arg0: i32) -> (i32, i32) {
    %c0_i32 = arith.constant 0 : i32
    %c0_i32_0 = arith.constant 0 : i32
    %c0_i32_1 = arith.constant 0 : i32
    return %c0_i32, %c0_i32_0 : i32, i32
  }
  func.func @transform_6(%arg0: i32) -> (i32, i32) {
    %c0_i32 = arith.constant 0 : i32
    %c0_i32_0 = arith.constant 0 : i32
    %c0_i32_1 = arith.constant 0 : i32
    return %c0_i32, %c0_i32_0 : i32, i32
  }
  func.func @transform_7(%arg0: i32) -> (i32, i32) {
    %c0_i32 = arith.constant 0 : i32
    %c0_i32_0 = arith.constant 0 : i32
    %c0_i32_1 = arith.constant 0 : i32
    return %c0_i32, %c0_i32_0 : i32, i32
  }
  func.func @transform_8(%arg0: i32) -> (i32, i32, i32) {
    %c0_i32 = arith.constant 0 : i32
    %c0_i32_0 = arith.constant 0 : i32
    %c0_i32_1 = arith.constant 0 : i32
    %c0_i32_2 = arith.constant 0 : i32
    return %c0_i32, %c0_i32_0, %c0_i32_1 : i32, i32, i32
  }
  func.func @transform_9(%arg0: i32) -> (i32, i32) {
    %c0_i32 = arith.constant 0 : i32
    %c0_i32_0 = arith.constant 0 : i32
    %c0_i32_1 = arith.constant 0 : i32
    return %c0_i32, %c0_i32_0 : i32, i32
  }
  func.func @transform_10(%arg0: i32) -> (i32, i32) {
    %c0_i32 = arith.constant 0 : i32
    %c0_i32_0 = arith.constant 0 : i32
    %c0_i32_1 = arith.constant 0 : i32
    return %c0_i32, %c0_i32_0 : i32, i32
  }
  func.func @transform_11(%arg0: i32) -> (i32, i32) {
    %c0_i32 = arith.constant 0 : i32
    %c0_i32_0 = arith.constant 0 : i32
    %c0_i32_1 = arith.constant 0 : i32
    return %c0_i32, %c0_i32_0 : i32, i32
  }
  func.func @transform_12(%arg0: i32) -> (i32, i32, i32) {
    %c0_i32 = arith.constant 0 : i32
    %c0_i32_0 = arith.constant 0 : i32
    %c0_i32_1 = arith.constant 0 : i32
    return %arg0, %c0_i32, %c0_i32_0 : i32, i32, i32
  }
}

</mosaic_0001>

<bundles_post_ra>
// kernel: _lambda_.3
= control target key start
LH: loop header
LB: loop body
LE: loop exit
PB: predicated region body
PF: predicated region fallthrough
CT: control target
= control target key end

     0   :  { %s1135_s12 = smov 0   ;;  %s1338_s0 = inlined_call_operand.vmem [shape: bf16[2,81,16], index: 0, kind: input, shape index: {}]   ;;  %s1339_s1 = inlined_call_operand.vmem [shape: bf16[4,16,16], index: 1, kind: input, shape index: {}]   ;;  %s1340_s2 = inlined_call_operand.vmem [shape: f32[1,16], index: 2, kind: input, shape index: {}]   ;;  %s1341_s3 = inlined_call_operand.vmem [shape: bf16[2,71,16], index: 3, kind: output, shape index: {}]  }
   0x1 LB: > { %s889_s13 = sadd.s32 4294967295, %s1111_s12   ;;  %p893_p0 = scmp.ge.s32.totalorder %s1111_s12, 1  ;;  %s1111_s12 = sphi %s1135_s12, %s13_s12  }
   0x2   : > { %p137_p1 = scmp.lt.s32.totalorder %s1111_s12, 3 }
   0x4   : > { %p138_p2 = pnand %p893_p0, %p137_p1 }
   0x5   : > { %p161_p3 = scmp.lt.s32.totalorder (!%p138_p2), %s889_s13, 1 }
   0x6   : > { %141 = sbr.rel (%p138_p2) target bundleno = 300 (0x12c), region = 32 }
   0xb   : > { %v1086_v0 = vld [vmem:[%s1339_s1] sm:$0xff]   ;;  %v1113_v1 = vmov 0.0   ;;  %v1087_v2 = vld [vmem:[%s1339_s1 + $0x8] sm:$0xff]   ;;  %vm1114_vm0 = vmmov 0   ;;  %s1343_s13 = smov (!%p161_p3, %s889_s13), 1  ;;  %vm255_vm1 = vcmask 130048  }
   0xc   : > { %1008 = vmatprep.subr.bf16.mxu1 %v1113_v1  ;;  %986 = vmatprep.subr.bf16.mxu0 %v1113_v1  ;;  %s1074_s18 = smul.u32 44, %s1343_s13  ;;  %v1091_v3 = vld [vmem:[%s1339_s1 + $0x18] sm:$0xff]   ;;  %vm209_vm2 = vsmask.f32 7424  ;;  %v1090_v12 = vld [vmem:[%s1339_s1 + $0x10] sm:$0xff]   ;;  %vm645_vm3 = vcmask 1046528  }
   0xd   : > { %1009 = vmatpush3.bf16.msra.mxu1 %v1086_v0  ;;  %1010 = vmatprep.mubr.msk.bf16.mxu1 %vm1114_vm0, %v1113_v1  ;;  %s1075_s28 = smul.u32 36, %s1343_s13  ;;  %vm819_vm4 = vcmask 125952   ;;  %vm829_vm5 = vsmask.f32 3328 }
   0xe   : > { %987 = vmatpush3.bf16.msra.mxu0 %v1087_v2  ;;  %988 = vmatprep.mubr.msk.bf16.mxu0 %vm1114_vm0, %v1113_v1  ;;  %s1163_s21 = scalar_lea.vmem %s1338_s0, %s1074_s18  ;;  %vm830_vm6 = vmand %vm819_vm4, %vm829_vm5 }
   0xf   : > { %1030 = vmatprep.subr.bf16.mxu0 %v1113_v1  ;;  %1052 = vmatprep.subr.bf16.mxu1 %v1113_v1  ;;  %v1088_v4 = vld [vmem:[%s1163_s21] sm:$0xff]   ;;  %v1089_v5 = vld [vmem:[%s1163_s21 + $0x8] sm:$0xff]   ;;  %v1092_v9 = vld [vmem:[%s1163_s21 + $0x10] sm:$0xff]   ;;  %s1297_s4 = scalar_lea.vmem %s1341_s3, %s1075_s28 }
  0x10   : > { %1011 = vmatmul.mubr.msk.bf16.vlgmr.msra.gmra.mxu1 %vm255_vm1, %v1088_v4  ;;  %v211_v6 = vshrl.u32 %v1088_v4, 16  ;;  %v213_v7 = vshll.u32 %v1088_v4, 16  ;;  %v218_v8 = vshll.u32 %v1089_v5, 16  ;;  %v222_v14 = vshrl.u32 %v1089_v5, 16  ;;  %v1093_v19 = vld [vmem:[%s1163_s21 + $0x18] sm:$0xff]   ;;  %v1097_v41 = vld [vmem:[%s1163_s21 + $0x4] sm:$0xff]  }
  0x11   : > { %1053 = vmatpush3.bf16.msra.mxu1 %v1091_v3  ;;  %1014 = vmatprep.mubr.msk.bf16.mxu1 %vm1114_vm0, %v1113_v1  ;;  %v226_v15 = vshll.u32 %v1092_v9, 16  ;;  %v230_v20 = vshrl.u32 %v1092_v9, 16  ;;  %v234_v22 = vshll.u32 %v1093_v19, 16  ;;  %v1102_v23 = vld [vmem:[%s1163_s21 + $0x1c] sm:$0xff]   ;;  %v1189_v26 = vld [vmem:[%s1163_s21 + $0x24] ss:$0 sps:$4 sm:$0xff]  }
  0x12   : > { %v215_v10 = vrot.slane %v213_v7, 1  ;;  %v220_v11 = vrot.slane %v218_v8, 1  ;;  %v490_v24 = vshll.u32 %v1102_v23, 16  ;;  %v494_v25 = vshrl.u32 %v1102_v23, 16  ;;  %v1094_v29 = vld [vmem:[%s1163_s21 + $0x20] ss:$0 sps:$4 sm:$0xff]  }
  0x13   : > { %v228_v18 = vrot.slane %v226_v15, 1  ;;  %v236_v28 = vrot.slane %v234_v22, 1  ;;  %v498_v31 = vshll.u32 %v1189_v26, 16  ;;  %v238_v35 = vshrl.u32 %v1093_v19, 16  ;;  %v1095_v42 = vld [vmem:[%s1163_s21 + $0x4] sm:$0xfe]  }
  0x14   : > { %v216_v13 = vor.u32 %v215_v10, %v211_v6  ;;  %v224_v17 = vor.u32 %v222_v14, %v220_v11  ;;  %v1195_v30 = vrot.slane %v490_v24, 1  ;;  %v242_v36 = vshll.u32 %v1094_v29, 16  ;;  %v1096_v43 = vld [vmem:[%s1163_s21 + $0xc] sm:$0xff]   ;;  %v1099_v54 = vld [vmem:[%s1163_s21 + $0x14] sm:$0xff]   ;;  %v1101_v63 = vld [vmem:[%s1163_s21 + $0x1c] sm:$0xff]  }
  0x15   : > { %v232_v27 = vor.u32 %v230_v20, %v228_v18  ;;  %v1201_v33 = vrot.slane %v498_v31, 1  ;;  %v240_v38 = vor.u32 %v238_v35, %v236_v28  ;;  %v246_v44 = vshrl.u32 %v1094_v29, 16  ;;  %v1098_v45 = vld [vmem:[%s1163_s21 + $0xc] sm:$0xff]   ;;  %v1100_v57 = vld [vmem:[%s1163_s21 + $0x14] sm:$0xff]   ;;  %v1103_v7 = vld [vmem:[%s1163_s21 + $0x24] sm:$0x1f]  }
  0x16   : > { %v221_v16 = vsel %vm209_vm2, %v216_v13, %v220_v11  ;;  %v229_v21 = vsel %vm209_vm2, %v224_v17, %v228_v18  ;;  %v496_v32 = vor.u32 %v494_v25, %v1195_v30  ;;  %v244_v39 = vrot.slane %v242_v36, 1 }
  0x17   : > { %989 = vmatmul.mubr.msk.bf16.vlgmr.msra.gmra.mxu0 %vm255_vm1, %v221_v16  ;;  %v237_v34 = vsel %vm209_vm2, %v232_v27, %v236_v28  ;;  %v469_v46 = vshll.u32 %v1097_v41, 16  ;;  %v646_v47 = vrot.slane %v1095_v42, 1  ;;  %v647_v48 = vrot.slane %v1096_v43, 1 }
  0x18   : > { %1031 = vmatpush3.bf16.msra.mxu0 %v1090_v12  ;;  %1015 = vmatmul.mubr.msk.bf16.gmra.mxu1 %vm255_vm1, %v1089_v5  ;;  %v1206_v37 = vsel %vm209_vm2, %v496_v32, %v1201_v33  ;;  %v245_v40 = vsel %vm209_vm2, %v240_v38, %v244_v39  ;;  %v248_v49 = vor.u32 %v246_v44, %v244_v39  ;;  %v467_v50 = vshrl.u32 %v1097_v41, 16 }
  0x19   : > { %992 = vmatprep.mubr.msk.bf16.mxu0 %vm1114_vm0, %v1113_v1  ;;  %1018 = vmatprep.mubr.msk.bf16.mxu1 %vm1114_vm0, %v1113_v1  ;;  %v471_v51 = vrot.slane %v469_v46, 1  ;;  %v474_v52 = vshll.u32 %v1098_v45, 16  ;;  %v648_v53 = vsel %vm645_vm3, %v646_v47, %v647_v48  ;;  %v649_v58 = vrot.slane %v1099_v54, 1 }
  0x1a   : > { %v478_v60 = vshrl.u32 %v1098_v45, 16  ;;  %v482_v61 = vshll.u32 %v1100_v57, 16  ;;  %v651_v3 = vrot.slane %v1101_v63, 1  ;;  %v486_v5 = vshrl.u32 %v1100_v57, 16 }
  0x1b   : > { %v472_v55 = vor.u32 %v471_v51, %v467_v50  ;;  %v476_v56 = vrot.slane %v474_v52, 1  ;;  %v650_v62 = vsel %vm645_vm3, %v647_v48, %v649_v58  ;;  %v502_v12 = vshrl.u32 %v1189_v26, 16 }
  0x1c   : > { %v484_v2 = vrot.slane %v482_v61, 1  ;;  %v652_v6 = vsel %vm645_vm3, %v649_v58, %v651_v3  ;;  %v1290_v61 = vld [vmem:[%s1340_s2] ss:$0 sm:$0xff] }
  0x1d   : > { %v477_v59 = vsel %vm209_vm2, %v472_v55, %v476_v56  ;;  %v480_v0 = vor.u32 %v478_v60, %v476_v56  ;;  %v504_v13 = vor.u32 %v502_v12, %v1201_v33 }
  0x1e   : > { %v488_v8 = vor.u32 %v486_v5, %v484_v2 }
  0x1f   : > { %993 = vmatmul.mubr.msk.bf16.gmra.mxu0 %vm255_vm1, %v229_v21  ;;  %v485_v4 = vsel %vm209_vm2, %v480_v0, %v484_v2 }
  0x20   : > { %1019 = vmatmul.mubr.msk.bf16.gmra.mxu1 %vm255_vm1, %v1092_v9  ;;  %996 = vmatprep.mubr.msk.bf16.mxu0 %vm1114_vm0, %v1113_v1  ;;  %v653_v9 = vrot.slane %v1103_v7, 1  ;;  %v493_v10 = vsel %vm209_vm2, %v488_v8, %v1195_v30 }
  0x21   : > { %1022 = vmatprep.mubr.msk.bf16.mxu1 %vm1114_vm0, %v1113_v1 }
  0x22   : > { %v654_v11 = vsel %vm645_vm3, %v651_v3, %v653_v9 }
  0x27   : > { %997 = vmatmul.mubr.msk.bf16.gmra.mxu0 %vm255_vm1, %v237_v34 }
  0x28   : > { %1023 = vmatmul.mubr.msk.bf16.gmra.mxu1 %vm255_vm1, %v1093_v19  ;;  %1000 = vmatprep.mubr.msk.bf16.mxu0 %vm1114_vm0, %v1113_v1 }
  0x29   : > { %1026 = vmatprep.mubr.msk.bf16.mxu1 %vm1114_vm0, %v1113_v1 }
  0x2f   : > { %1001 = vmatmul.mubr.msk.bf16.gmra.mxu0 %vm255_vm1, %v245_v40 }
  0x30   : > { %1027 = vmatmul.mubr.msk.bf16.gmra.mxu1 %vm255_vm1, %v1094_v29  ;;  %1004 = vmatprep.mubr.msk.bf16.mxu0 %vm1114_vm0, %v1113_v1 }
  0x31   : > { %1054 = vmatprep.mubr.msk.bf16.mxu1 %vm1114_vm0, %v1113_v1 }
  0x37   : > { %1005 = vmatmul.mubr.msk.bf16.gmra.mxu0 %vm255_vm1, %v248_v49 }
  0x38   : > { %1055 = vmatmul.mubr.msk.bf16.vlgmr.msra.gmra.mxu1 %vm255_vm1, %v648_v53  ;;  %1032 = vmatprep.mubr.msk.bf16.mxu0 %vm1114_vm0, %v1113_v1 }
  0x39   : > { %1058 = vmatprep.mubr.msk.bf16.mxu1 %vm1114_vm0, %v1113_v1 }
  0x3f   : > { %1033 = vmatmul.mubr.msk.bf16.vlgmr.msra.gmra.mxu0 %vm255_vm1, %v477_v59 }
  0x40   : > { %1059 = vmatmul.mubr.msk.bf16.gmra.mxu1 %vm255_vm1, %v650_v62  ;;  %1036 = vmatprep.mubr.msk.bf16.mxu0 %vm1114_vm0, %v1113_v1 }
  0x41   : > { %1062 = vmatprep.mubr.msk.bf16.mxu1 %vm1114_vm0, %v1113_v1 }
  0x47   : > { %1037 = vmatmul.mubr.msk.bf16.gmra.mxu0 %vm255_vm1, %v485_v4 }
  0x48   : > { %1063 = vmatmul.mubr.msk.bf16.gmra.mxu1 %vm255_vm1, %v652_v6  ;;  %1040 = vmatprep.mubr.msk.bf16.mxu0 %vm1114_vm0, %v1113_v1 }
  0x49   : > { %1066 = vmatprep.mubr.msk.bf16.mxu1 %vm1114_vm0, %v1113_v1 }
  0x4f   : > { %1041 = vmatmul.mubr.msk.bf16.gmra.mxu0 %vm255_vm1, %v493_v10 }
  0x50   : > { %1067 = vmatmul.mubr.msk.bf16.gmra.mxu1 %vm255_vm1, %v654_v11  ;;  %1044 = vmatprep.mubr.msk.bf16.mxu0 %vm1114_vm0, %v1113_v1 }
  0x51   : > { %1070 = vmatprep.mubr.msk.bf16.mxu1 %vm1114_vm0, %v1113_v1 }
  0x57   : > { %1045 = vmatmul.mubr.msk.bf16.gmra.mxu0 %vm255_vm1, %v1206_v37 }
  0x58   : > { %1071 = vmatmul.mubr.msk.bf16.gmra.mxu1 %vm255_vm1, %v653_v9  ;;  %1048 = vmatprep.mubr.msk.bf16.mxu0 %vm1114_vm0, %v1113_v1 }
  0x5f   : > { %1049 = vmatmul.mubr.msk.bf16.gmra.mxu0 %vm255_vm1, %v504_v13 }
  0xd0   : > { %v393_v14 = vpop.f32.mrf.mxu1 }
  0xd2   : > { %v1012_v15 = vpop.f32.mrf.mxu1 }
  0xd4   : > { %v396_v16 = vpop.f32.mrf.mxu1 }
  0xd6   : > { %v1013_v17 = vpop.f32.mrf.mxu1 }
  0xd7   : > { %v305_v18 = vpop.f32.mrf.mxu0 }
  0xd8   : > { %v401_v19 = vpop.f32.mrf.mxu1  ;;  %v394_v56 = vadd.f32 %v393_v14, %v305_v18 }
  0xd9   : > { %v990_v20 = vpop.f32.mrf.mxu0 }
  0xda   : > { %v1016_v21 = vpop.f32.mrf.mxu1 }
  0xdb   : > { %v308_v22 = vpop.f32.mrf.mxu0 }
  0xdc   : > { %v404_v23 = vpop.f32.mrf.mxu1  ;;  %v397_v63 = vadd.f32 %v396_v16, %v308_v22 }
  0xdd   : > { %v991_v24 = vpop.f32.mrf.mxu0 }
  0xde   : > { %v1017_v25 = vpop.f32.mrf.mxu1 }
  0xdf   : > { %v313_v26 = vpop.f32.mrf.mxu0 }
  0xe0   : > { %v1269_v27 = vpop.f32.mrf.mxu1  ;;  %v402_v8 = vadd.f32 %v401_v19, %v313_v26 }
  0xe1   : > { %v994_v1 = vpop.f32.mrf.mxu0 }
  0xe2   : > { %v1020_v28 = vpop.f32.mrf.mxu1 }
  0xe3   : > { %v316_v29 = vpop.f32.mrf.mxu0 }
  0xe4   : > { %v1271_v30 = vpop.f32.mrf.mxu1  ;;  %v405_v18 = vadd.f32 %v404_v23, %v316_v29 }
  0xe5   : > { %v995_v31 = vpop.f32.mrf.mxu0 }
  0xe6   : > { %v1021_v32 = vpop.f32.mrf.mxu1 }
  0xe7   : > { %v321_v33 = vpop.f32.mrf.mxu0 }
  0xe8   : > { %v1273_v34 = vpop.f32.mrf.mxu1  ;;  %v410_v31 = vadd.f32 %v1269_v27, %v321_v33 }
  0xe9   : > { %v998_v35 = vpop.f32.mrf.mxu0 }
  0xea   : > { %v1024_v36 = vpop.f32.mrf.mxu1 }
  0xeb   : > { %v1275_v37 = vpop.f32.mrf.mxu0 }
  0xec   : > { %v1277_v38 = vpop.f32.mrf.mxu1 }
  0xed   : > { %v999_v39 = vpop.f32.mrf.mxu0 }
  0xee   : > { %v1025_v40 = vpop.f32.mrf.mxu1 }
  0xef   : > { %v1279_v41 = vpop.f32.mrf.mxu0 }
  0xf0   : > { %v1281_v42 = vpop.f32.mrf.mxu1 }
  0xf1   : > { %v1002_v43 = vpop.f32.mrf.mxu0 }
  0xf2   : > { %v1028_v44 = vpop.f32.mrf.mxu1 }
  0xf3   : > { %v1283_v45 = vpop.f32.mrf.mxu0 }
  0xf4   : > { %v428_v46 = vpop.f32.mrf.mxu1 }
  0xf5   : > { %v1003_v47 = vpop.f32.mrf.mxu0  ;;  %v413_v46 = vadd.f32 %v1271_v30, %v1275_v37 }
  0xf6   : > { %v1029_v48 = vpop.f32.mrf.mxu1 }
  0xf7   : > { %v1285_v49 = vpop.f32.mrf.mxu0 }
  0xf8   : > { %v710_v50 = vpop.f32.mrf.mxu1 }
  0xf9   : > { %v1006_v51 = vpop.f32.mrf.mxu0 }
  0xfa   : > { %v1056_v52 = vpop.f32.mrf.mxu1 }
  0xfb   : > { %v340_v53 = vpop.f32.mrf.mxu0 }
  0xfc   : > { %v713_v54 = vpop.f32.mrf.mxu1 }
  0xfd   : > { %v1007_v55 = vpop.f32.mrf.mxu0 }
  0xfe   : > { %v1057_v57 = vpop.f32.mrf.mxu1  ;;  %v418_v55 = vadd.f32 %v1273_v34, %v1279_v41 }
  0xff   : > { %v560_v58 = vpop.f32.mrf.mxu0 }
 0x100   : > { %v598_v59 = vadd.f32 %v560_v58, %v394_v56  ;;  %v718_v60 = vpop.f32.mrf.mxu1 }
 0x101   : > { %v1034_v62 = vpop.f32.mrf.mxu0 }
 0x102   : > { %v748_v0 = vadd.f32 %v710_v50, %v598_v59  ;;  %v1060_v2 = vpop.f32.mrf.mxu1 }
 0x103   : > { %v563_v3 = vpop.f32.mrf.mxu0 }
 0x104   : > { %v764_v4 = vadd.f32 %v1290_v61, %v748_v0  ;;  %v599_v5 = vadd.f32 %v563_v3, %v397_v63  ;;  %v721_v6 = vpop.f32.mrf.mxu1  ;;  %v421_v0 = vadd.f32 %v1277_v38, %v1283_v45 }
 0x105   : > { %v1035_v7 = vpop.f32.mrf.mxu0 }
 0x106   : > { %v773_v9 = vmax.f32 %v764_v4, 0.0  ;;  %v749_v10 = vadd.f32 %v713_v54, %v599_v5  ;;  %v1061_v11 = vpop.f32.mrf.mxu1 }
 0x107   : > { %v568_v12 = vpop.f32.mrf.mxu0 }
 0x108   : > { %v953_v13 = vpack.c.bf16 %v773_v9, %v773_v9  ;;  %v765_v14 = vadd.f32 %v1290_v61, %v749_v10  ;;  %v600_v15 = vadd.f32 %v568_v12, %v402_v8  ;;  %v726_v16 = vpop.f32.mrf.mxu1  ;;  %v426_v9 = vadd.f32 %v1281_v42, %v1285_v49 }
 0x109   : > { %v1038_v17 = vpop.f32.mrf.mxu0 }
 0x10a   : > { %820 = vst.msk [vmem:[%s1297_s4] sm:$0xf] %vm819_vm4, %v953_v13  ;;  %v774_v19 = vmax.f32 %v765_v14, 0.0  ;;  %v750_v20 = vadd.f32 %v718_v60, %v600_v15  ;;  %v1064_v21 = vpop.f32.mrf.mxu1 }
 0x10b   : > { %v571_v22 = vpop.f32.mrf.mxu0  ;;  %v831_v21 = vld [vmem:[%s1297_s4 + $0x20] sm:$0xf] }
 0x10c   : > { %v954_v24 = vpack.c.bf16 %v774_v19, %v774_v19  ;;  %v766_v25 = vadd.f32 %v1290_v61, %v750_v20  ;;  %v601_v26 = vadd.f32 %v571_v22, %v405_v18  ;;  %v729_v1 = vpop.f32.mrf.mxu1 }
 0x10d   : > { %v1039_v28 = vpop.f32.mrf.mxu0 }
 0x10e   : > { %821 = vst.msk [vmem:[%s1297_s4 + $0x4] sm:$0xf] %vm819_vm4, %v954_v24  ;;  %v775_v32 = vmax.f32 %v766_v25, 0.0  ;;  %v751_v35 = vadd.f32 %v721_v6, %v601_v26  ;;  %v1065_v23 = vpop.f32.mrf.mxu1 }
 0x10f   : > { %v576_v29 = vpop.f32.mrf.mxu0 }
 0x110   : > { %v955_v36 = vpack.c.bf16 %v775_v32, %v775_v32  ;;  %v767_v39 = vadd.f32 %v1290_v61, %v751_v35  ;;  %v602_v40 = vadd.f32 %v576_v29, %v410_v31  ;;  %v734_v43 = vpop.f32.mrf.mxu1 }
 0x111   : > { %v1042_v44 = vpop.f32.mrf.mxu0 }
 0x112   : > { %822 = vst.msk [vmem:[%s1297_s4 + $0x8] sm:$0xf] %vm819_vm4, %v955_v36  ;;  %v776_v47 = vmax.f32 %v767_v39, 0.0  ;;  %v752_v27 = vadd.f32 %v726_v16, %v602_v40  ;;  %v1068_v33 = vpop.f32.mrf.mxu1 }
 0x113   : > { %v579_v48 = vpop.f32.mrf.mxu0 }
 0x114   : > { %v956_v50 = vpack.c.bf16 %v776_v47, %v776_v47  ;;  %v768_v51 = vadd.f32 %v1290_v61, %v752_v27  ;;  %v603_v52 = vadd.f32 %v579_v48, %v413_v46  ;;  %v737_v53 = vpop.f32.mrf.mxu1 }
 0x115   : > { %v1043_v54 = vpop.f32.mrf.mxu0 }
 0x116   : > { %823 = vst.msk [vmem:[%s1297_s4 + $0xc] sm:$0xf] %vm819_vm4, %v956_v50  ;;  %v777_v56 = vmax.f32 %v768_v51, 0.0  ;;  %v753_v30 = vadd.f32 %v729_v1, %v603_v52  ;;  %v1069_v37 = vpop.f32.mrf.mxu1 }
 0x117   : > { %v584_v57 = vpop.f32.mrf.mxu0 }
 0x118   : > { %v957_v58 = vpack.c.bf16 %v777_v56, %v777_v56  ;;  %v769_v59 = vadd.f32 %v1290_v61, %v753_v30  ;;  %v604_v60 = vadd.f32 %v584_v57, %v418_v55  ;;  %v742_v62 = vpop.f32.mrf.mxu1 }
 0x119   : > { %v1046_v63 = vpop.f32.mrf.mxu0 }
 0x11a   : > { %824 = vst.msk [vmem:[%s1297_s4 + $0x10] sm:$0xf] %vm819_vm4, %v957_v58  ;;  %v778_v2 = vmax.f32 %v769_v59, 0.0  ;;  %v754_v34 = vadd.f32 %v734_v43, %v604_v60  ;;  %v1072_v41 = vpop.f32.mrf.mxu1 }
 0x11b   : > { %v587_v3 = vpop.f32.mrf.mxu0 }
 0x11c   : > { %v958_v4 = vpack.c.bf16 %v778_v2, %v778_v2  ;;  %v770_v5 = vadd.f32 %v1290_v61, %v754_v34  ;;  %v605_v6 = vadd.f32 %v587_v3, %v421_v0  ;;  %v745_v7 = vpop.f32.mrf.mxu1 }
 0x11d   : > { %v1047_v8 = vpop.f32.mrf.mxu0 }
 0x11e   : > { %825 = vst.msk [vmem:[%s1297_s4 + $0x14] sm:$0xf] %vm819_vm4, %v958_v4  ;;  %v779_v10 = vmax.f32 %v770_v5, 0.0  ;;  %v755_v38 = vadd.f32 %v737_v53, %v605_v6  ;;  %v1073_v45 = vpop.f32.mrf.mxu1 }
 0x11f   : > { %v592_v11 = vpop.f32.mrf.mxu0 }
 0x120   : > { %v959_v12 = vpack.c.bf16 %v779_v10, %v779_v10  ;;  %v771_v13 = vadd.f32 %v1290_v61, %v755_v38  ;;  %v606_v14 = vadd.f32 %v592_v11, %v426_v9 }
 0x121   : > { %v1050_v15 = vpop.f32.mrf.mxu0 }
 0x122   : > { %826 = vst.msk [vmem:[%s1297_s4 + $0x18] sm:$0xf] %vm819_vm4, %v959_v12  ;;  %v780_v16 = vmax.f32 %v771_v13, 0.0  ;;  %v756_v17 = vadd.f32 %v742_v62, %v606_v14 }
 0x123   : > { %v595_v18 = vpop.f32.mrf.mxu0 }
 0x124   : > { %v960_v42 = vpack.c.bf16 %v780_v16, %v780_v16  ;;  %v772_v49 = vadd.f32 %v1290_v61, %v756_v17 }
 0x125   : > { %v1051_v19 = vpop.f32.mrf.mxu0 }
 0x126   : > { %827 = vst.msk [vmem:[%s1297_s4 + $0x1c] sm:$0xf] %vm819_vm4, %v960_v42  ;;  %v781_v20 = vmax.f32 %v772_v49, 0.0 }
 0x128   : > { %v961_v22 = vpack.c.bf16 %v781_v20, %v781_v20 }
 0x12a   : > { %v832_v24 = vsel %vm830_vm6, %v961_v22, %v831_v21 }
 0x12b   : > { %833 = vst [vmem:[%s1297_s4 + $0x20] sm:$0xf] %v832_v24 }
 0x12c PF: > { %s13_s12 = sadd.s32 1, %s1111_s12  }
 0x12d   : > { %p10_p4 = scmp.ge.s32.totalorder %s13_s12, 4  }
 0x12f   :  { %12 = sbr.rel (!%p10_p4) target bundleno = 1 (0x1), region = 65 }

// kernel: _lambda_.4
= control target key start
LH: loop header
LB: loop body
LE: loop exit
PB: predicated region body
PF: predicated region fallthrough
CT: control target
= control target key end

     0   :  { %s888_s12 = smov 0   ;;  %s979_s0 = inlined_call_operand.vmem [shape: bf16[2,25,64], index: 0, kind: input, shape index: {}]   ;;  %s980_s1 = inlined_call_operand.vmem [shape: bf16[4,64,32], index: 1, kind: input, shape index: {}]   ;;  %s981_s2 = inlined_call_operand.vmem [shape: f32[1,32], index: 2, kind: input, shape index: {}]   ;;  %s982_s3 = inlined_call_operand.vmem [shape: bf16[2,19,32], index: 3, kind: output, shape index: {}]  }
   0x1 LB: > { %s685_s13 = sadd.s32 4294967295, %s866_s12   ;;  %p689_p0 = scmp.ge.s32.totalorder %s866_s12, 1  ;;  %s866_s12 = sphi %s888_s12, %s13_s12  }
   0x2   : > { %p137_p1 = scmp.lt.s32.totalorder %s866_s12, 3 }
   0x4   : > { %p138_p2 = pnand %p689_p0, %p137_p1 }
   0x5   : > { %p161_p3 = scmp.lt.s32.totalorder (!%p138_p2), %s685_s13, 1 }
   0x6   : > { %141 = sbr.rel (%p138_p2) target bundleno = 254 (0xfe), region = 32 }
   0xb   : > { %v838_v0 = vld [vmem:[%s980_s1 + $0x38] sm:$0xff]   ;;  %v840_v2 = vld [vmem:[%s980_s1 + $0x30] sm:$0xff]   ;;  %s984_s13 = smov (!%p161_p3, %s685_s13), 1  ;;  %v842_v4 = vld [vmem:[%s980_s1 + $0x28] sm:$0xff]   ;;  %vm240_vm0 = vcmask 523264   ;;  %vm510_vm2 = vcmask 1044480  }
   0xc   : > { %v839_v1 = vld [vmem:[%s980_s1 + $0x18] sm:$0xff]   ;;  %781 = vmatprep.subr.bf16.mxu0 %v838_v0  ;;  %v841_v3 = vld [vmem:[%s980_s1 + $0x10] sm:$0xff]   ;;  %s753_s24 = sshll.u32 %s984_s13, 4  ;;  %v843_v5 = vld [vmem:[%s980_s1 + $0x8] sm:$0xff]   ;;  %vm200_vm1 = vsmask.f32 7424 }
   0xd   : > { %793 = vmatprep.subr.bf16.mxu1 %v839_v1  ;;  %782 = vmatpush3.bf16.msra.mxu0 %v838_v0  ;;  %s920_s29 = scalar_lea.vmem %s979_s0, %s753_s24  ;;  %v844_v6 = vld [vmem:[%s980_s1 + $0x20] sm:$0xff]   ;;  %v848_v16 = vld [vmem:[%s980_s1 + $0x58] sm:$0xff]   ;;  %v850_v22 = vld [vmem:[%s980_s1 + $0x50] sm:$0xff]   ;;  %vm388_vm3 = vsmask.f32 5376  ;;  %s829_s25 = smul.u32 12, %s984_s13 }
   0xe   : > { %794 = vmatpush3.bf16.msra.mxu1 %v839_v1  ;;  %783 = vmatprep.subr.bf16.mxu0 %v840_v2  ;;  %v172_v7 = vld [vmem:[%s920_s29] sm:$0xf]  ;;  %v173_v8 = vld [vmem:[%s920_s29 + $0x4] sm:$0xf]  ;;  %v849_v19 = vld [vmem:[%s980_s1 + $0x78] sm:$0xff]   ;;  %vm624_vm4 = vcmask 254976  }
   0xf   : > { %795 = vmatprep.subr.bf16.mxu1 %v841_v3  ;;  %v845_v9 = vld [vmem:[%s980_s1] sm:$0xff]   ;;  %v701_v10 = vcombine.low %v172_v7, %v173_v8  ;;  %v847_v11 = vld [vmem:[%s920_s29 + $0x8] ss:$0 sps:$4 sm:$0x33]   ;;  %v851_v24 = vld [vmem:[%s980_s1 + $0x70] sm:$0xff]   ;;  %s170_s30 = scalar_lea.vmem %s982_s3, %s829_s25  ;;  %vm621_vm7 = vcmask 257024  }
  0x10   : > { %v209_v14 = vshll.u32 %v847_v11, 16  ;;  %v213_v15 = vshrl.u32 %v847_v11, 16  ;;  %v371_v25 = vld [vmem:[%s920_s29] sm:$0xc]  ;;  %v852_v26 = vld [vmem:[%s980_s1 + $0x48] sm:$0xff]  }
  0x11   : > { %784 = vmatpush3.bf16.msra.mxu0 %v840_v2  ;;  %v202_v12 = vshrl.u32 %v701_v10, 16  ;;  %v204_v13 = vshll.u32 %v701_v10, 16  ;;  %801 = vmatprep.mubr.msk.bf16.mxu1 %vm240_vm0, %v701_v10  ;;  %v853_v27 = vld [vmem:[%s980_s1 + $0x68] sm:$0xff]   ;;  %v723_v28 = vcombine.low %v371_v25, %v173_v8  ;;  %v858_v34 = vld [vmem:[%s920_s29] sm:$0xf8]  }
  0x12   : > { %796 = vmatpush3.bf16.msra.mxu1 %v841_v3  ;;  %785 = vmatprep.subr.bf16.mxu0 %v842_v4  ;;  %v211_v18 = vrot.slane %v209_v14, 1  ;;  %v857_v29 = vld [vmem:[%s920_s29 + $0x8] ss:$0 sps:$4 sm:$0xff]   ;;  %v511_v40 = vrot.slane %v858_v34, 3  ;;  %v854_v42 = vld [vmem:[%s980_s1 + $0x40] sm:$0xff]  }
  0x13   : > { %797 = vmatprep.subr.bf16.mxu1 %v843_v5  ;;  %v206_v17 = vrot.slane %v204_v13, 1  ;;  %v390_v30 = vshrl.u32 %v723_v28, 16  ;;  %v393_v31 = vshll.u32 %v723_v28, 16  ;;  %v398_v32 = vshrl.u32 %v857_v29, 16  ;;  %v859_v35 = vld [vmem:[%s920_s29 + $0x8] sm:$0x1f]  }
  0x14   : > { %v215_v21 = vor.u32 %v213_v15, %v211_v18  ;;  %v401_v33 = vshll.u32 %v857_v29, 16  ;;  %v512_v41 = vrot.slane %v859_v35, 3  ;;  %v855_v43 = vld [vmem:[%s980_s1 + $0x60] sm:$0xff]   ;;  %vm625_vm5 = vsmask.f32 1280 }
  0x15   : > { %786 = vmatpush3.bf16.msra.mxu0 %v842_v4  ;;  %v207_v20 = vor.u32 %v206_v17, %v202_v12  ;;  %v392_v36 = vrot.slane %v390_v30, 2  ;;  %v395_v37 = vrot.slane %v393_v31, 3  ;;  %v400_v38 = vrot.slane %v398_v32, 2  ;;  %v747_v61 = vld [vmem:[%s981_s2] ss:$0 sm:$0xff]  ;;  %vm626_vm6 = vmand %vm624_vm4, %vm625_vm5 }
  0x16   : > { %798 = vmatpush3.bf16.msra.mxu1 %v843_v5  ;;  %787 = vmatprep.subr.bf16.mxu0 %v844_v6  ;;  %v403_v39 = vrot.slane %v401_v33, 3  ;;  %v513_v46 = vsel %vm510_vm2, %v511_v40, %v512_v41 }
  0x17   : > { %799 = vmatprep.subr.bf16.mxu1 %v845_v9  ;;  %v212_v23 = vsel %vm200_vm1, %v207_v20, %v211_v18  ;;  %v396_v44 = vor.u32 %v395_v37, %v392_v36 }
  0x18   : > { %789 = vmatprep.mubr.msk.bf16.mxu0 %vm240_vm0, %v212_v23  ;;  %v404_v45 = vor.u32 %v403_v39, %v400_v38 }
  0x19   : > { %788 = vmatpush3.bf16.msra.mxu0 %v844_v6 }
  0x1a   : > { %800 = vmatpush3.bf16.msra.mxu1 %v845_v9  ;;  %805 = vmatprep.subr.bf16.mxu0 %v848_v16  ;;  %v405_v47 = vsel %vm388_vm3, %v396_v44, %v404_v45 }
  0x1b   : > { %817 = vmatprep.subr.bf16.mxu1 %v849_v19 }
  0x1c   : > { %790 = vmatmul.mubr.msk.bf16.vlgmr.msra.gmra.mxu0 %vm240_vm0, %v215_v21 }
  0x1d   : > { %802 = vmatmul.mubr.msk.bf16.vlgmr.msra.gmra.mxu1 %vm240_vm0, %v847_v11  ;;  %806 = vmatpush3.bf16.msra.mxu0 %v848_v16  ;;  %v627_v11 = vld [vmem:[%s170_s30 + $0x8] sm:$0x3] }
  0x1e   : > { %818 = vmatpush3.bf16.msra.mxu1 %v849_v19  ;;  %807 = vmatprep.subr.bf16.mxu0 %v850_v22 }
  0x1f   : > { %819 = vmatprep.subr.bf16.mxu1 %v851_v24  ;;  %825 = vmatprep.mubr.msk.bf16.mxu1 %vm240_vm0, %v513_v46 }
  0x20   : > { %813 = vmatprep.mubr.msk.bf16.mxu0 %vm240_vm0, %v405_v47 }
  0x21   : > { %808 = vmatpush3.bf16.msra.mxu0 %v850_v22 }
  0x22   : > { %820 = vmatpush3.bf16.msra.mxu1 %v851_v24  ;;  %809 = vmatprep.subr.bf16.mxu0 %v852_v26 }
  0x23   : > { %821 = vmatprep.subr.bf16.mxu1 %v853_v27 }
  0x25   : > { %810 = vmatpush3.bf16.msra.mxu0 %v852_v26 }
  0x26   : > { %822 = vmatpush3.bf16.msra.mxu1 %v853_v27  ;;  %811 = vmatprep.subr.bf16.mxu0 %v854_v42 }
  0x27   : > { %823 = vmatprep.subr.bf16.mxu1 %v855_v43 }
  0x29   : > { %812 = vmatpush3.bf16.msra.mxu0 %v854_v42 }
  0x2a   : > { %824 = vmatpush3.bf16.msra.mxu1 %v855_v43 }
  0x2c   : > { %814 = vmatmul.mubr.msk.bf16.vlgmr.msra.gmra.mxu0 %vm240_vm0, %v404_v45 }
  0x2d   : > { %826 = vmatmul.mubr.msk.bf16.vlgmr.msra.gmra.mxu1 %vm240_vm0, %v512_v41 }
  0xdc   : > { %v791_v48 = vpop.f32.mrf.mxu0 }
  0xdd   : > { %v803_v49 = vpop.f32.mrf.mxu1 }
  0xde   : > { %v281_v50 = vpop.f32.mrf.mxu0  ;;  %v366_v56 = vadd.f32 %v803_v49, %v791_v48 }
  0xdf   : > { %v357_v51 = vpop.f32.mrf.mxu1 }
  0xe0   : > { %v792_v52 = vpop.f32.mrf.mxu0  ;;  %v358_v59 = vadd.f32 %v357_v51, %v281_v50 }
  0xe1   : > { %v804_v53 = vpop.f32.mrf.mxu1 }
  0xe2   : > { %v284_v54 = vpop.f32.mrf.mxu0 }
  0xe3   : > { %v360_v55 = vpop.f32.mrf.mxu1 }
  0xe4   : > { %v361_v4 = vadd.f32 %v360_v55, %v284_v54 }
  0xec   : > { %v815_v57 = vpop.f32.mrf.mxu0 }
  0xed   : > { %v827_v58 = vpop.f32.mrf.mxu1  ;;  %v486_v60 = vadd.f32 %v815_v57, %v366_v56 }
  0xee   : > { %v470_v62 = vpop.f32.mrf.mxu0 }
  0xef   : > { %v578_v63 = vpop.f32.mrf.mxu1  ;;  %v594_v0 = vadd.f32 %v827_v58, %v486_v60  ;;  %v484_v1 = vadd.f32 %v470_v62, %v358_v59 }
  0xf0   : > { %v816_v2 = vpop.f32.mrf.mxu0 }
  0xf1   : > { %v828_v3 = vpop.f32.mrf.mxu1  ;;  %v604_v5 = vadd.f32 %v747_v61, %v594_v0  ;;  %v592_v6 = vadd.f32 %v578_v63, %v484_v1 }
  0xf2   : > { %v473_v7 = vpop.f32.mrf.mxu0 }
  0xf3   : > { %v607_v8 = vmax.f32 %v604_v5, 0.0  ;;  %v602_v9 = vadd.f32 %v747_v61, %v592_v6  ;;  %v485_v10 = vadd.f32 %v473_v7, %v361_v4  ;;  %v581_v12 = vpop.f32.mrf.mxu1 }
  0xf5   : > { %v756_v13 = vpack.c.bf16 %v607_v8, %v607_v8  ;;  %v605_v14 = vmax.f32 %v602_v9, 0.0  ;;  %v593_v15 = vadd.f32 %v581_v12, %v485_v10 }
  0xf7   : > { %v628_v16 = vsel %vm626_vm6, %v756_v13, %v627_v11  ;;  %v754_v17 = vpack.c.bf16 %v605_v14, %v605_v14  ;;  %v603_v18 = vadd.f32 %v747_v61, %v593_v15 }
  0xf8   : > { %629 = vst [vmem:[%s170_s30 + $0x8] sm:$0x3] %v628_v16 }
  0xf9   : > { %622 = vst.msk [vmem:[%s170_s30] sm:$0xf] %vm621_vm7, %v754_v17  ;;  %v606_v19 = vmax.f32 %v603_v18, 0.0 }
  0xfb   : > { %v755_v20 = vpack.c.bf16 %v606_v19, %v606_v19 }
  0xfd   : > { %623 = vst.msk [vmem:[%s170_s30 + $0x4] sm:$0xf] %vm621_vm7, %v755_v20 }
  0xfe PF: > { %s13_s12 = sadd.s32 1, %s866_s12  }
  0xff   : > { %p10_p4 = scmp.ge.s32.totalorder %s13_s12, 4  }
 0x101   :  { %12 = sbr.rel (!%p10_p4) target bundleno = 1 (0x1), region = 65 }

// kernel: _lambda_.5
= control target key start
LH: loop header
LB: loop body
LE: loop exit
PB: predicated region body
PF: predicated region fallthrough
CT: control target
= control target key end

     0   :  { %s4045_s21 = smov 0   ;;  %s4507_s0 = inlined_call_operand.vmem [shape: bf16[2,36,32], index: 0, kind: input, shape index: {}]   ;;  %s4508_s1 = inlined_call_operand.vmem [shape: f32[1,22,1], index: 1, kind: input, shape index: {}]   ;;  %s4509_s2 = inlined_call_operand.vmem [shape: bf16[9,32,32], index: 2, kind: input, shape index: {}]   ;;  %s4510_s3 = inlined_call_operand.vmem [shape: f32[1,32], index: 3, kind: input, shape index: {}]   ;;  %s4511_s4 = inlined_call_operand.vmem [shape: bf16[9,32,8], index: 4, kind: input, shape index: {}]   ;;  %s4512_s5 = inlined_call_operand.vmem [shape: f32[1,8], index: 5, kind: input, shape index: {}]   ;;  %s4513_s6 = inlined_call_operand.vmem [shape: bf16[8,32], index: 6, kind: input, shape index: {}]   ;;  %s4514_s7 = inlined_call_operand.vmem [shape: f32[1,32], index: 7, kind: input, shape index: {}]   ;;  %s4515_s8 = inlined_call_operand.vmem [shape: bf16[9,32,8], index: 8, kind: input, shape index: {}]   ;;  %s4516_s9 = inlined_call_operand.vmem [shape: f32[1,8], index: 9, kind: input, shape index: {}]   ;;  %s4517_s10 = inlined_call_operand.vmem [shape: bf16[8,32], index: 10, kind: input, shape index: {}]   ;;  %s4518_s11 = inlined_call_operand.vmem [shape: f32[1,32], index: 11, kind: input, shape index: {}]   ;;  %s4519_s12 = inlined_call_operand.vmem [shape: bf16[2,22,32], index: 12, kind: output, shape index: {}]  }
   0x1 LB: > { %s3230_s22 = sadd.s32 4294967295, %s3977_s21   ;;  %p3234_p0 = scmp.ge.s32.totalorder %s3977_s21, 1  ;;  %s3977_s21 = sphi %s4045_s21, %s22_s21  }
   0x2   : > { %p362_p1 = scmp.lt.s32.totalorder %s3977_s21, 3 }
   0x4   : > { %p363_p2 = pnand %p3234_p0, %p362_p1 }
   0x5   : > { %p404_p3 = scmp.lt.s32.totalorder (!%p363_p2), %s3230_s22, 1 }
   0x6   : > { %366 = sbr.rel (%p363_p2) target bundleno = 1204 (0x4b4), region = 68 }
   0xb   : > { %v3878_v0 = vld [vmem:[%s4509_s2 + $0x18] sm:$0xff]   ;;  %v3879_v1 = vld [vmem:[%s4509_s2 + $0x8] sm:$0xff]   ;;  %v3880_v2 = vld [vmem:[%s4509_s2 + $0x10] sm:$0xff]   ;;  %s4523_s22 = smov (!%p404_p3, %s3230_s22), 1  ;;  %vm467_vm0 = vcmask 261120   ;;  %vm599_vm2 = vcmask 1046528  }
   0xc   : > { %3635 = vmatprep.subr.bf16.mxu0 %v3878_v0  ;;  %3643 = vmatprep.subr.bf16.mxu1 %v3879_v1  ;;  %v3881_v3 = vld [vmem:[%s4509_s2] sm:$0xff]   ;;  %s3865_s13 = smul.u32 20, %s4523_s22  ;;  %v3884_v4 = vld [vmem:[%s4509_s2 + $0x28] sm:$0xff]   ;;  %v3886_v5 = vld [vmem:[%s4509_s2 + $0x38] sm:$0xff]   ;;  %vm439_vm1 = vsmask.f32 7424 }
   0xd   : > { %3636 = vmatpush3.bf16.msra.mxu0 %v3878_v0  ;;  %3644 = vmatpush3.bf16.msra.mxu1 %v3879_v1  ;;  %v3888_v11 = vld [vmem:[%s4509_s2 + $0x30] sm:$0xff]   ;;  %v3893_v30 = vld [vmem:[%s4509_s2 + $0x58] sm:$0xff]   ;;  %vm691_vm3 = vcmask 1044480   ;;  %v3887_v33 = vld [vmem:[%s4509_s2 + $0x20] sm:$0xff]   ;;  %v3979_v48 = vmov 0   ;;  %vm955_vm5 = vcmask 1045504  }
   0xe   : > { %3637 = vmatprep.subr.bf16.mxu0 %v3880_v2  ;;  %3645 = vmatprep.subr.bf16.mxu1 %v3881_v3  ;;  %s4074_s18 = scalar_lea.vmem %s4507_s0, %s3865_s13  ;;  %v3895_v40 = vld [vmem:[%s4509_s2 + $0x50] sm:$0xff]   ;;  %v3892_v45 = vld [vmem:[%s4509_s2 + $0x48] sm:$0xff]   ;;  %v3894_v49 = vld [vmem:[%s4509_s2 + $0x40] sm:$0xff]   ;;  %vm773_vm4 = vsmask.f32 4352  ;;  %vm1215_vm7 = vcmask 257024  }
   0xf   : > { %v418_v6 = vld [vmem:[%s4074_s18] sm:$0xf]  ;;  %v419_v7 = vld [vmem:[%s4074_s18 + $0x4] sm:$0xf]  ;;  %v4082_v9 = vld [vmem:[%s4074_s18 + $0x8] ss:$0 sps:$4 sm:$0xff]   ;;  %3876 = vset.pattern.permute.xlu0 %v3979_v48  ;;  %3877 = vset.pattern.permute.xlu1 %v3979_v48 }
  0x10   : > { %v3241_v8 = vcombine.low %v418_v6, %v419_v7  ;;  %v3885_v10 = vld [vmem:[%s4074_s18 + $0x8] ss:$0 sps:$4 sm:$0x77]   ;;  %v448_v14 = vshll.u32 %v4082_v9, 16  ;;  %v452_v15 = vshrl.u32 %v4082_v9, 16  ;;  %v601_v17 = vrot.slane %v4082_v9, 1 }
  0x11   : > { %3638 = vmatpush3.bf16.msra.mxu0 %v3880_v2  ;;  %3646 = vmatpush3.bf16.msra.mxu1 %v3881_v3  ;;  %v590_v16 = vld [vmem:[%s4074_s18] sm:$0xe]  ;;  %v673_v22 = vld [vmem:[%s4074_s18 + $0x4] sm:$0xf]  ;;  %v674_v23 = vld [vmem:[%s4074_s18 + $0x8] sm:$0xf] }
  0x12   : > { %3651 = vmatprep.subr.bf16.mxu0 %v3884_v4  ;;  %3659 = vmatprep.subr.bf16.mxu1 %v3886_v5  ;;  %v441_v12 = vshrl.u32 %v3241_v8, 16  ;;  %v443_v13 = vshll.u32 %v3241_v8, 16  ;;  %v672_v18 = vld [vmem:[%s4074_s18] sm:$0x8]  ;;  %v450_v20 = vrot.slane %v448_v14, 1  ;;  %v3256_v21 = vcombine.low %v590_v16, %v419_v7  ;;  %v3900_v58 = vld [vmem:[%s4509_s2 + $0x78] sm:$0xff]  }
  0x13   : > { %3647 = vmatprep.mubr.msk.bf16.mxu1 %vm467_vm0, %v3241_v8  ;;  %v675_v24 = vld [vmem:[%s4074_s18 + $0xc] sm:$0x3]  ;;  %v3265_v25 = vcombine.low %v672_v18, %v673_v22  ;;  %v3284_v42 = vcombine.low %v673_v22, %v674_v23  ;;  %v936_v53 = vld [vmem:[%s4074_s18 + $0x4] sm:$0xc]  ;;  %v937_v54 = vld [vmem:[%s4074_s18 + $0x8] sm:$0xf] }
  0x14   : > { %3648 = vmatmul.mubr.msk.bf16.vlgmr.msra.gmra.mxu1 %vm467_vm0, %v3885_v10  ;;  %v445_v19 = vrot.slane %v443_v13, 1  ;;  %v454_v27 = vor.u32 %v452_v15, %v450_v20  ;;  %v600_v28 = vrot.slane %v3256_v21, 1  ;;  %v3266_v29 = vcombine.low %v674_v23, %v675_v24  ;;  %v4110_v36 = vld [vmem:[%s4074_s18 + $0xc] sm:$0x7]  ;;  %v939_v56 = vld [vmem:[%s4074_s18 + $0x10] sm:$0x1] }
  0x15   : > { %3660 = vmatpush3.bf16.msra.mxu1 %v3886_v5  ;;  %v692_v31 = vrot.slane %v3265_v25, 3  ;;  %v775_v37 = vshrl.u32 %v3265_v25, 16  ;;  %v778_v38 = vshll.u32 %v3265_v25, 16  ;;  %v3275_v41 = vcombine.low %v674_v23, %v4110_v36  ;;  %v938_v55 = vld [vmem:[%s4074_s18 + $0xc] sm:$0xf]  ;;  %v3902_v63 = vld [vmem:[%s4509_s2 + $0x70] sm:$0xff]  }
  0x16   : > { %3661 = vmatprep.subr.bf16.mxu1 %v3888_v11  ;;  %v446_v26 = vor.u32 %v445_v19, %v441_v12  ;;  %v602_v34 = vsel %vm599_vm2, %v600_v28, %v601_v17  ;;  %v693_v35 = vrot.slane %v3266_v29, 3  ;;  %v3294_v59 = vcombine.low %v936_v53, %v937_v54  ;;  %v1028_v61 = vld [vmem:[%s4074_s18 + $0x10] sm:$0x3]  ;;  %v3898_v2 = vld [vmem:[%s4509_s2 + $0x68] sm:$0xff]   ;;  %v1124_v5 = vld [vmem:[%s4074_s18 + $0x4] sm:$0x8] }
  0x17   : > { %v777_v43 = vrot.slane %v775_v37, 3  ;;  %v780_v44 = vrot.slane %v778_v38, 4  ;;  %v783_v46 = vshrl.u32 %v3275_v41, 16  ;;  %v786_v47 = vshll.u32 %v3275_v41, 16  ;;  %v415_v10 = vld [vmem:[%s4508_s1] sm:$0xff]  ;;  %v416_v15 = vld [vmem:[%s4508_s1 + $0x8] sm:$0xff] }
  0x18   : > { %v451_v32 = vsel %vm439_vm1, %v446_v26, %v450_v20  ;;  %v694_v39 = vsel %vm691_vm3, %v692_v31, %v693_v35  ;;  %v3295_v60 = vcombine.low %v938_v55, %v939_v56  ;;  %v3285_v62 = vcombine.low %v4110_v36, %v4110_v36  ;;  %1229 = vperm.xlu0 %3876, %v415_v10   ;;  %v3901_v20 = vld [vmem:[%s4509_s2 + $0x60] sm:$0xff]   ;;  %v3906_v25 = vld [vmem:[%s4509_s2 + $0x88] sm:$0xff]   ;;  %v1224_v29 = vld [vmem:[#allocation2 + $0x14] sm:$0x7]  ;;  %s3866_s28 = smul.u32 12, %s4523_s22 }
  0x19   : > { %3662 = vmatpush3.bf16.msra.mxu1 %v3888_v11  ;;  %3639 = vmatprep.mubr.msk.bf16.mxu0 %vm467_vm0, %v451_v32  ;;  %v781_v50 = vor.u32 %v780_v44, %v777_v43  ;;  %v785_v51 = vrot.slane %v783_v46, 3  ;;  %v788_v52 = vrot.slane %v786_v47, 4  ;;  %v3304_v0 = vcombine.low %v938_v55, %v1028_v61  ;;  %v417_v11 = vld [vmem:[%s4508_s1 + $0x10] sm:$0x3f]  ;;  %v3907_v26 = vld [vmem:[%s4509_s2 + $0x80] sm:$0xff]   ;;  %v3909_v37 = vld [vmem:[%s4511_s4 + $0x18] sm:$0xff]  }
  0x1a   : > { %3675 = vmatprep.subr.bf16.mxu1 %v3893_v30  ;;  %3640 = vmatmul.mubr.msk.bf16.vlgmr.msra.gmra.mxu0 %vm467_vm0, %v454_v27  ;;  %v956_v3 = vrot.slane %v3294_v59, 2  ;;  %vm1037_vm6 = vsmask.f32 5376  ;;  %v1042_v6 = vshll.u32 %v3294_v59, 16  ;;  %v3313_v9 = vcombine.low %v1124_v5, %v937_v54  ;;  %1216 = vst.msk [vmem:[#allocation2] sm:$0xf] %vm1215_vm7, %v3979_v48  ;;  %s413_s30 = scalar_lea.vmem %s4519_s12, %s3866_s28 }
  0x1b   : > { %3652 = vmatpush3.bf16.msra.mxu0 %v3884_v4  ;;  %3655 = vmatprep.mubr.msk.bf16.mxu0 %vm467_vm0, %v602_v34  ;;  %v789_v57 = vor.u32 %v788_v52, %v785_v51  ;;  %v1039_v4 = vshrl.u32 %v3294_v59, 16  ;;  %v1047_v7 = vshrl.u32 %v3304_v0, 16  ;;  %v1050_v8 = vshll.u32 %v3304_v0, 16  ;;  %1218 = vst.msk [vmem:[#allocation2 + $0x8] sm:$0xf] %vm1215_vm7, %v3979_v48  ;;  %v3910_v38 = vld [vmem:[%s4511_s4 + $0x8] sm:$0xff]  }
  0x1c   : > { %3653 = vmatprep.subr.bf16.mxu0 %v3887_v33  ;;  %3663 = vmatprep.mubr.msk.bf16.mxu1 %vm467_vm0, %v694_v39  ;;  %v957_v12 = vrot.slane %v3295_v60, 2  ;;  %v1134_v14 = vrot.slane %v3304_v0, 3  ;;  %v1044_v16 = vrot.slane %v1042_v6, 3  ;;  %v1133_v19 = vrot.slane %v3313_v9, 3  ;;  %1217 = vst.msk [vmem:[#allocation2 + $0x4] sm:$0xf] %vm1215_vm7, %v3979_v48 }
  0x1d   : > { %3664 = vmatmul.mubr.msk.bf16.vlgmr.msra.gmra.mxu1 %vm467_vm0, %v693_v35  ;;  %v790_v1 = vsel %vm773_vm4, %v781_v50, %v789_v57  ;;  %v1041_v13 = vrot.slane %v1039_v4, 2  ;;  %v1052_v18 = vrot.slane %v1050_v8, 3  ;;  %1239 = vperm.xlu1 %3877, %v417_v11   ;;  %vm1221_vm8 = vcmask 256000   ;;  %1219 = vst.msk [vmem:[#allocation2 + $0xc] sm:$0xf] %vm1215_vm7, %v3979_v48  ;;  %v3911_v39 = vld [vmem:[%s4511_s4 + $0x10] sm:$0xff]  }
  0x1e   : > { %3676 = vmatpush3.bf16.msra.mxu1 %v3893_v30  ;;  %3679 = vmatprep.mubr.msk.bf16.mxu1 %vm467_vm0, %v3284_v42  ;;  %v958_v23 = vsel %vm955_vm5, %v956_v3, %v957_v12  ;;  %v1135_v27 = vsel %vm691_vm3, %v1133_v19, %v1134_v14  ;;  %vm1222_vm9 = vsmask.f32 2304  ;;  %1220 = vst.msk [vmem:[#allocation2 + $0x10] sm:$0xf] %vm1215_vm7, %v3979_v48  ;;  %v4219_v44 = vld [vmem:[%s4511_s4 + $0x28] sm:$0xff]   ;;  %v4227_v46 = vld [vmem:[%s4511_s4 + $0x38] sm:$0xff]  }
  0x1f   : > { %3654 = vmatpush3.bf16.msra.mxu0 %v3887_v33  ;;  %3677 = vmatprep.subr.bf16.mxu1 %v3895_v40  ;;  %v1045_v21 = vor.u32 %v1044_v16, %v1041_v13  ;;  %vm4192_vm10 = vmand %vm1221_vm8, %vm1222_vm9  ;;  %v1279_v33 = vld [vmem:[#allocation3 + $0x14] sm:$0x7]  ;;  %vm1475_vm11 = vsmask.f32 6400  ;;  %vm2140_vm12 = vcmask 1043456   ;;  %vm2133_vm13 = vcmask 64512  }
  0x20   : > { %3667 = vmatprep.subr.bf16.mxu0 %v3892_v45  ;;  %1234 = vperm.xlu0 %3876, %v416_v15   ;;  %v1225_v30 = vsel %vm4192_vm10, 0, %v1224_v29 }
  0x21   : > { %1226 = vst [vmem:[#allocation2 + $0x14] sm:$0x7] %v1225_v30 }
  0x22   : > { %3656 = vmatmul.mubr.msk.bf16.vlgmr.msra.gmra.mxu0 %vm467_vm0, %v601_v17  ;;  %3678 = vmatpush3.bf16.msra.mxu1 %v3895_v40  ;;  %v1049_v17 = vrot.slane %v1047_v7, 2  ;;  %v3912_v40 = vld [vmem:[%s4511_s4] sm:$0xff]  }
  0x23   : > { %3668 = vmatpush3.bf16.msra.mxu0 %v3892_v45  ;;  %3671 = vmatprep.mubr.msk.bf16.mxu0 %vm467_vm0, %v790_v1  ;;  %v1263_v35 = vld [vmem:[#allocation2 + $0x4] sm:$0xf] }
  0x24   : > { %3669 = vmatprep.subr.bf16.mxu0 %v3894_v49  ;;  %3691 = vmatprep.subr.bf16.mxu1 %v3900_v58  ;;  %v1053_v22 = vor.u32 %v1052_v18, %v1049_v17  ;;  %v1269_v36 = vmax.bf16 %v3979_v48, %v1263_v35  ;;  %v2221_v50 = vld [vmem:[#allocation2 + $0x4] sm:$0xf] }
  0x25   : > { %3680 = vmatmul.mubr.msk.bf16.vlgmr.msra.gmra.mxu1 %vm467_vm0, %v3285_v62  ;;  %v2227_v52 = vmax.bf16 %v3979_v48, %v2221_v50 }
  0x26   : > { %3692 = vmatpush3.bf16.msra.mxu1 %v3900_v58  ;;  %v1054_v24 = vsel %vm1037_vm6, %v1045_v21, %v1053_v22  ;;  %1275 = vst.msk [vmem:[#allocation3 + $0x4] sm:$0xf] %vm1215_vm7, %v1269_v36 }
  0x27   : > { %3670 = vmatpush3.bf16.msra.mxu0 %v3894_v49  ;;  %3693 = vmatprep.subr.bf16.mxu1 %v3902_v63 }
  0x28   : > { %3683 = vmatprep.subr.bf16.mxu0 %v3898_v2  ;;  %3695 = vmatprep.mubr.msk.bf16.mxu1 %vm467_vm0, %v1054_v24  ;;  %v1267_v31 = vld [vmem:[#allocation2 + $0x14] sm:$0x7] }
  0x29   : > { %v1273_v32 = vmax.bf16 %v3979_v48, %v1267_v31  ;;  %v2225_v41 = vld [vmem:[#allocation2 + $0x14] sm:$0x7] }
  0x2a   : > { %3672 = vmatmul.mubr.msk.bf16.vlgmr.msra.gmra.mxu0 %vm467_vm0, %v789_v57  ;;  %3694 = vmatpush3.bf16.msra.mxu1 %v3902_v63  ;;  %v2231_v42 = vmax.bf16 %v3979_v48, %v2225_v41 }
  0x2b   : > { %3684 = vmatpush3.bf16.msra.mxu0 %v3898_v2  ;;  %3687 = vmatprep.mubr.msk.bf16.mxu0 %vm467_vm0, %v958_v23  ;;  %v1280_v34 = vsel %vm4192_vm10, %v1273_v32, %v1279_v33 }
  0x2c   : > { %3685 = vmatprep.subr.bf16.mxu0 %v3901_v20  ;;  %1281 = vst [vmem:[#allocation3 + $0x14] sm:$0x7] %v1280_v34  ;;  %3707 = vmatprep.subr.bf16.mxu1 %v3909_v37 }
  0x2d   : > { %3696 = vmatmul.mubr.msk.bf16.vlgmr.msra.gmra.mxu1 %vm467_vm0, %v1053_v22  ;;  %v4234_v51 = vld [vmem:[#allocation3 + $0x4] sm:$0xe] }
  0x2e   : > { %3708 = vmatpush3.bf16.msra.mxu1 %v3909_v37  ;;  %v4237_v53 = vld [vmem:[#allocation3 + $0x4] sm:$0xf] }
  0x2f   : > { %3686 = vmatpush3.bf16.msra.mxu0 %v3901_v20  ;;  %3709 = vmatprep.subr.bf16.mxu1 %v3911_v39  ;;  %v4239_v54 = vld [vmem:[#allocation3 + $0x4] sm:$0xe] }
  0x30   : > { %3699 = vmatprep.subr.bf16.mxu0 %v3906_v25  ;;  %v4241_v55 = vld [vmem:[#allocation3 + $0x4] sm:$0x8] }
  0x31   : > { %2233 = vst.msk [vmem:[#allocation3 + $0x4] sm:$0xf] %vm1215_vm7, %v2227_v52 }
  0x32   : > { %3688 = vmatmul.mubr.msk.bf16.vlgmr.msra.gmra.mxu0 %vm467_vm0, %v957_v12  ;;  %3710 = vmatpush3.bf16.msra.mxu1 %v3911_v39 }
  0x33   : > { %3700 = vmatpush3.bf16.msra.mxu0 %v3906_v25  ;;  %3703 = vmatprep.mubr.msk.bf16.mxu0 %vm467_vm0, %v1135_v27  ;;  %v2237_v43 = vld [vmem:[#allocation3 + $0x14] sm:$0x7] }
  0x34   : > { %3701 = vmatprep.subr.bf16.mxu0 %v3907_v26  ;;  %v2238_v45 = vsel %vm4192_vm10, %v2231_v42, %v2237_v43  ;;  %3723 = vmatprep.subr.bf16.mxu1 %v4219_v44  ;;  %v4230_v47 = vld [vmem:[#allocation3 + $0x14] sm:$0x3]  ;;  %v3318_v42 = vld [vmem:[%s4510_s3] ss:$0 sm:$0xff] }
  0x35   : > { %v4232_v49 = vld [vmem:[#allocation3 + $0x14] sm:$0x7] }
  0x36   : > { %2239 = vst [vmem:[#allocation3 + $0x14] sm:$0x7] %v2238_v45 }
  0x37   : > { %3702 = vmatpush3.bf16.msra.mxu0 %v3907_v26 }
  0x38   : > { %3715 = vmatprep.subr.bf16.mxu0 %v3910_v38 }
  0x3a   : > { %3704 = vmatmul.mubr.msk.bf16.vlgmr.msra.gmra.mxu0 %vm467_vm0, %v1134_v14 }
  0x3b   : > { %3716 = vmatpush3.bf16.msra.mxu0 %v3910_v38 }
  0x3c   : > { %3717 = vmatprep.subr.bf16.mxu0 %v3912_v40 }
  0x3f   : > { %3718 = vmatpush3.bf16.msra.mxu0 %v3912_v40 }
  0x40   : > { %3731 = vmatprep.subr.bf16.mxu0 %v4227_v46 }
  0xd4   : > { %v3649_v56 = vpop.f32.mrf.mxu1 }
  0xd6   : > { %v576_v57 = vpop.f32.mrf.mxu1 }
  0xd8   : > { %v3650_v58 = vpop.f32.mrf.mxu1 }
  0xda   : > { %v579_v59 = vpop.f32.mrf.mxu1  ;;  %v3641_v60 = vpop.f32.mrf.mxu0 }
  0xdb   : > { %v585_v8 = vadd.f32 %v3649_v56, %v3641_v60  ;;  %v4247_v56 = vpop.permute.xlu1 %1239 }
  0xdc   : > { %v508_v61 = vpop.f32.mrf.mxu0 }
  0xdd   : > { %v3665_v62 = vpop.f32.mrf.mxu1  ;;  %v577_v11 = vadd.f32 %v576_v57, %v508_v61  ;;  %v4249_v57 = vpop.permute.xlu0 %1229 }
  0xde   : > { %v3642_v63 = vpop.f32.mrf.mxu0 }
  0xdf   : > { %v747_v0 = vpop.f32.mrf.mxu1 }
  0xe0   : > { %v511_v1 = vpop.f32.mrf.mxu0 }
  0xe1   : > { %v3666_v2 = vpop.f32.mrf.mxu1  ;;  %v580_v18 = vadd.f32 %v579_v59, %v511_v1 }
  0xe2   : > { %v3657_v3 = vpop.f32.mrf.mxu0 }
  0xe3   : > { %v750_v4 = vpop.f32.mrf.mxu1  ;;  %v671_v12 = vadd.f32 %v3657_v3, %v585_v8 }
  0xe4   : > { %v655_v5 = vpop.f32.mrf.mxu0 }
  0xe5   : > { %v3681_v6 = vpop.f32.mrf.mxu1  ;;  %v669_v15 = vadd.f32 %v655_v5, %v577_v11  ;;  %v763_v19 = vadd.f32 %v3665_v62, %v671_v12 }
  0xe6   : > { %v3658_v7 = vpop.f32.mrf.mxu0 }
  0xe7   : > { %v919_v9 = vpop.f32.mrf.mxu1  ;;  %v761_v22 = vadd.f32 %v747_v0, %v669_v15  ;;  %v4254_v7 = vpop.permute.xlu0 %1234 }
  0xe8   : > { %v658_v10 = vpop.f32.mrf.mxu0 }
  0xe9   : > { %v3682_v13 = vpop.f32.mrf.mxu1  ;;  %v670_v23 = vadd.f32 %v658_v10, %v580_v18 }
  0xea   : > { %v3673_v14 = vpop.f32.mrf.mxu0 }
  0xeb   : > { %v922_v16 = vpop.f32.mrf.mxu1  ;;  %v859_v24 = vadd.f32 %v3673_v14, %v763_v19  ;;  %v762_v30 = vadd.f32 %v750_v4, %v670_v23 }
  0xec   : > { %v843_v17 = vpop.f32.mrf.mxu0 }
  0xed   : > { %v3697_v20 = vpop.f32.mrf.mxu1  ;;  %v857_v27 = vadd.f32 %v843_v17, %v761_v22  ;;  %v935_v31 = vadd.f32 %v3681_v6, %v859_v24 }
  0xee   : > { %v3674_v21 = vpop.f32.mrf.mxu0 }
  0xef   : > { %v1107_v25 = vpop.f32.mrf.mxu1  ;;  %v933_v33 = vadd.f32 %v919_v9, %v857_v27 }
  0xf0   : > { %v846_v26 = vpop.f32.mrf.mxu0 }
  0xf1   : > { %v3698_v28 = vpop.f32.mrf.mxu1  ;;  %v858_v34 = vadd.f32 %v846_v26, %v762_v30 }
  0xf2   : > { %v3689_v29 = vpop.f32.mrf.mxu0 }
  0xf3   : > { %v1027_v35 = vadd.f32 %v3689_v29, %v935_v31  ;;  %v934_v39 = vadd.f32 %v922_v16, %v858_v34  ;;  %v1110_v60 = vpop.f32.mrf.mxu1 }
  0xf4   : > { %v1011_v32 = vpop.f32.mrf.mxu0 }
  0xf5   : > { %v1025_v37 = vadd.f32 %v1011_v32, %v933_v33  ;;  %v1123_v40 = vadd.f32 %v3697_v20, %v1027_v35 }
  0xf6   : > { %v3690_v36 = vpop.f32.mrf.mxu0 }
  0xf7   : > { %v1121_v43 = vadd.f32 %v1107_v25, %v1025_v37 }
  0xf8   : > { %v1014_v38 = vpop.f32.mrf.mxu0 }
  0xf9   : > { %v1026_v45 = vadd.f32 %v1014_v38, %v934_v39 }
  0xfa   : > { %v3705_v41 = vpop.f32.mrf.mxu0 }
  0xfb   : > { %v1204_v50 = vadd.f32 %v3705_v41, %v1123_v40  ;;  %v1122_v62 = vadd.f32 %v1110_v60, %v1026_v45 }
  0xfc   : > { %v1188_v52 = vpop.f32.mrf.mxu0 }
  0xfd   : > { %v1202_v58 = vadd.f32 %v1188_v52, %v1121_v43  ;;  %v1214_v59 = vadd.f32 %v3318_v42, %v1204_v50 }
  0xfe   : > { %v3706_v61 = vpop.f32.mrf.mxu0 }
  0xff   : > { %v1212_v63 = vadd.f32 %v3318_v42, %v1202_v58  ;;  %v1244_v0 = vmul.f32 %v4247_v56, %v1214_v59 }
 0x100   : > { %v1191_v1 = vpop.f32.mrf.mxu0 }
 0x101   : > { %v1242_v2 = vmul.f32 %v4249_v57, %v1212_v63  ;;  %v3504_v3 = vpack.c.bf16 %v1244_v0, %v1244_v0  ;;  %v1203_v4 = vadd.f32 %v1191_v1, %v1122_v62  ;;  %v3923_v0 = vld [vmem:[%s4511_s4 + $0x30] sm:$0xff]  }
 0x103   : > { %v3502_v5 = vpack.c.bf16 %v1242_v2, %v1242_v2  ;;  %1261 = vst.msk [vmem:[#allocation2 + $0x10] sm:$0x7] %vm1221_vm8, %v3504_v3  ;;  %v1213_v6 = vadd.f32 %v3318_v42, %v1203_v4 }
 0x105   : > { %1258 = vst.msk [vmem:[#allocation2 + $0x8] sm:$0xf] %vm1215_vm7, %v3502_v5  ;;  %v1243_v8 = vmul.f32 %v4254_v7, %v1213_v6 }
 0x107   : > { %v3503_v9 = vpack.c.bf16 %v1243_v8, %v1243_v8  ;;  %v3924_v8 = vld [vmem:[%s4511_s4 + $0x48] sm:$0xff]  }
 0x109   : > { %1259 = vst.msk [vmem:[#allocation2 + $0xc] sm:$0xf] %vm1215_vm7, %v3503_v9 }
 0x10a   : > { %v1266_v10 = vld [vmem:[#allocation2 + $0x10] sm:$0xf] }
 0x10b   : > { %v1272_v11 = vmax.bf16 %v3979_v48, %v1266_v10 }
 0x10c   : > { %v1264_v12 = vld [vmem:[#allocation2 + $0x8] sm:$0xf] }
 0x10d   : > { %v1270_v13 = vmax.bf16 %v3979_v48, %v1264_v12  ;;  %1278 = vst.msk [vmem:[#allocation3 + $0x10] sm:$0xf] %vm1215_vm7, %v1272_v11 }
 0x10f   : > { %1276 = vst.msk [vmem:[#allocation3 + $0x8] sm:$0xf] %vm1215_vm7, %v1270_v13 }
 0x110   : > { %v1265_v14 = vld [vmem:[#allocation2 + $0xc] sm:$0xf] }
 0x111   : > { %v1271_v15 = vmax.bf16 %v3979_v48, %v1265_v14 }
 0x113   : > { %1277 = vst.msk [vmem:[#allocation3 + $0xc] sm:$0xf] %vm1215_vm7, %v1271_v15 }
 0x114   : > { %v1459_v24 = vld [vmem:[#allocation3 + $0x10] sm:$0x1] }
 0x115   : > { %v4269_v33 = vld [vmem:[#allocation3 + $0x10] sm:$0x7] }
 0x116   : > { %v1283_v16 = vld [vmem:[#allocation3 + $0x8] sm:$0xf]  ;;  %v4276_v43 = vld [vmem:[#allocation3 + $0x10] sm:$0xf] }
 0x117   : > { %v1457_v17 = vld [vmem:[#allocation3 + $0x8] sm:$0xf]  ;;  %v3326_v18 = vcombine.low %v4234_v51, %v1283_v16  ;;  %v3332_v19 = vcombine.low %v4237_v53, %v1283_v16  ;;  %v4284_v1 = vld [vmem:[#allocation3 + $0x10] ss:$0 sps:$4 sm:$0xff]   ;;  %v4294_v10 = vcombine.low %v4276_v43, %v4230_v47  ;;  %v3925_v47 = vld [vmem:[%s4511_s4 + $0x58] sm:$0xff]  }
 0x118   : > { %v3341_v20 = vcombine.low %v4239_v54, %v1457_v17  ;;  %v3351_v28 = vcombine.low %v4241_v55, %v1457_v17  ;;  %v3918_v55 = vld [vmem:[%s4511_s4 + $0x20] sm:$0xff]   ;;  %v1753_v13 = vshll.u32 %v4284_v1, 16 }
 0x119   : > { %v1303_v21 = vrot.slane %v3326_v18, 1  ;;  %v1376_v22 = vshrl.u32 %v3332_v19, 16  ;;  %v1378_v23 = vshll.u32 %v3332_v19, 16  ;;  %v1829_v6 = vld [vmem:[#allocation3 + $0x8] sm:$0xc] }
 0x11a   : > { %v1477_v25 = vshrl.u32 %v3341_v20, 16  ;;  %v3914_v26 = vld [vmem:[#allocation3 + $0xc] ss:$0 sps:$4 sm:$0xff]   ;;  %v1480_v32 = vshll.u32 %v3341_v20, 16  ;;  %v1576_v41 = vshrl.u32 %v3351_v28, 16  ;;  %v1579_v42 = vshll.u32 %v3351_v28, 16 }
 0x11b   : > { %v1458_v27 = vld [vmem:[#allocation3 + $0xc] sm:$0xf]  ;;  %v1380_v29 = vrot.slane %v1378_v23, 1  ;;  %v1304_v51 = vrot.slane %v3914_v26, 1  ;;  %v1383_v53 = vshll.u32 %v3914_v26, 16  ;;  %v1387_v34 = vshrl.u32 %v3914_v26, 16 }
 0x11c   : > { %v3342_v30 = vcombine.low %v1458_v27, %v1459_v24  ;;  %v1479_v31 = vrot.slane %v1477_v25, 1  ;;  %v3352_v54 = vcombine.low %v1458_v27, %v4269_v33  ;;  %v1482_v36 = vrot.slane %v1480_v32, 2  ;;  %v1830_v59 = vld [vmem:[#allocation3 + $0xc] sm:$0xf]  ;;  %v1934_v24 = vld [vmem:[#allocation3 + $0x8] sm:$0x8] }
 0x11d   : > { %v1381_v35 = vor.u32 %v1380_v29, %v1376_v22  ;;  %v1305_v39 = vsel %vm599_vm2, %v1303_v21, %v1304_v51  ;;  %v1385_v40 = vrot.slane %v1383_v53, 1  ;;  %v1578_v62 = vrot.slane %v1576_v41, 3  ;;  %v3926_v22 = vld [vmem:[%s4511_s4 + $0x40] sm:$0xff]   ;;  %v3928_v25 = vld [vmem:[%s4511_s4 + $0x50] sm:$0xff]  }
 0x11e   : > { %v1485_v37 = vshrl.u32 %v3342_v30, 16  ;;  %v1488_v38 = vshll.u32 %v3342_v30, 16  ;;  %3711 = vmatprep.mubr.msk.bf16.mxu1 %vm467_vm0, %v1305_v39  ;;  %v1483_v45 = vor.u32 %v1482_v36, %v1479_v31  ;;  %v1584_v58 = vshrl.u32 %v3352_v54, 16  ;;  %v3929_v30 = vld [vmem:[%s4511_s4 + $0x68] sm:$0xff]   ;;  %v3933_v39 = vld [vmem:[%s4511_s4 + $0x60] sm:$0xff]  }
 0x11f   : > { %3712 = vmatmul.mubr.msk.bf16.vlgmr.msra.gmra.mxu1 %vm467_vm0, %v1304_v51  ;;  %v1386_v60 = vsel %vm439_vm1, %v1381_v35, %v1385_v40  ;;  %v1389_v61 = vor.u32 %v1387_v34, %v1385_v40  ;;  %v1581_v63 = vrot.slane %v1579_v42, 4  ;;  %v1587_v4 = vshll.u32 %v3352_v54, 16  ;;  %v3932_v54 = vld [vmem:[%s4511_s4 + $0x78] sm:$0xff]  }
 0x120   : > { %v1487_v50 = vrot.slane %v1485_v37, 1  ;;  %v1490_v52 = vrot.slane %v1488_v38, 2  ;;  %3724 = vmatpush3.bf16.msra.mxu1 %v4219_v44  ;;  %3719 = vmatprep.mubr.msk.bf16.mxu0 %vm467_vm0, %v1386_v60  ;;  %v1586_v3 = vrot.slane %v1584_v58, 3  ;;  %v3361_v5 = vcombine.low %v1457_v17, %v1458_v27 }
 0x121   : > { %3720 = vmatmul.mubr.msk.bf16.vlgmr.msra.gmra.mxu0 %vm467_vm0, %v1389_v61  ;;  %3725 = vmatprep.subr.bf16.mxu1 %v3918_v55  ;;  %v3380_v9 = vcombine.low %v1829_v6, %v1830_v59  ;;  %v1589_v11 = vrot.slane %v1587_v4, 4  ;;  %v1582_v16 = vor.u32 %v1581_v63, %v1578_v62  ;;  %v1860_v20 = vshll.u32 %v4294_v10, 16 }
 0x122   : > { %v1491_v2 = vor.u32 %v1490_v52, %v1487_v50  ;;  %3732 = vmatpush3.bf16.msra.mxu0 %v4227_v46  ;;  %v1748_v12 = vshll.u32 %v3361_v5, 16  ;;  %v1746_v18 = vshrl.u32 %v3361_v5, 16  ;;  %v1857_v46 = vshrl.u32 %v4294_v10, 16 }
 0x123   : > { %3733 = vmatprep.subr.bf16.mxu0 %v3923_v0  ;;  %v1849_v14 = vshrl.u32 %v3380_v9, 16  ;;  %v1852_v15 = vshll.u32 %v3380_v9, 16  ;;  %v1590_v17 = vor.u32 %v1589_v11, %v1586_v3  ;;  %v3390_v28 = vcombine.low %v1934_v24, %v1830_v59  ;;  %v3936_v59 = vld [vmem:[%s4511_s4 + $0x88] sm:$0xff]  }
 0x124   : > { %v1492_v44 = vsel %vm1475_vm11, %v1483_v45, %v1491_v2  ;;  %3726 = vmatpush3.bf16.msra.mxu1 %v3918_v55  ;;  %v1750_v19 = vrot.slane %v1748_v12, 1  ;;  %v1755_v29 = vrot.slane %v1753_v13, 1  ;;  %v1859_v31 = vrot.slane %v1857_v46, 2 }
 0x125   : > { %3727 = vmatprep.mubr.msk.bf16.mxu1 %vm467_vm0, %v1492_v44  ;;  %3739 = vmatprep.subr.bf16.mxu1 %v3924_v8  ;;  %v1591_v21 = vsel %vm773_vm4, %v1582_v16, %v1590_v17  ;;  %v1851_v26 = vrot.slane %v1849_v14, 2  ;;  %v1854_v27 = vrot.slane %v1852_v15, 3  ;;  %v1862_v32 = vrot.slane %v1860_v20, 3 }
 0x126   : > { %3734 = vmatpush3.bf16.msra.mxu0 %v3923_v0  ;;  %v1751_v23 = vor.u32 %v1750_v19, %v1746_v18  ;;  %3735 = vmatprep.mubr.msk.bf16.mxu0 %vm467_vm0, %v1591_v21  ;;  %v3399_v51 = vcombine.low %v4276_v43, %v4232_v49  ;;  %v2025_v35 = vshrl.u32 %v3390_v28, 16  ;;  %v2028_v36 = vshll.u32 %v3390_v28, 16  ;;  %v3938_v0 = vld [vmem:[%s4511_s4 + $0x80] sm:$0xff]  }
 0x127   : > { %3728 = vmatmul.mubr.msk.bf16.vlgmr.msra.gmra.mxu1 %vm467_vm0, %v1491_v2  ;;  %3747 = vmatprep.subr.bf16.mxu0 %v3925_v47  ;;  %v1855_v34 = vor.u32 %v1854_v27, %v1851_v26  ;;  %v1757_v37 = vshrl.u32 %v4284_v1, 16  ;;  %v3362_v49 = vcombine.low %v4269_v33, %v4269_v33  ;;  %v1863_v38 = vor.u32 %v1862_v32, %v1859_v31  ;;  %v3935_v33 = vld [vmem:[%s4511_s4 + $0x70] sm:$0xff]   ;;  %v2125_v2 = vld [vmem:[%s4513_s6] sm:$0xf] }
 0x128   : > { %3740 = vmatpush3.bf16.msra.mxu1 %v3924_v8  ;;  %3743 = vmatprep.mubr.msk.bf16.mxu1 %vm467_vm0, %v3361_v5  ;;  %v1756_v53 = vsel %vm439_vm1, %v1751_v23, %v1755_v29  ;;  %v1943_v40 = vrot.slane %v3390_v28, 3  ;;  %v2033_v55 = vshrl.u32 %v3399_v51, 16  ;;  %v2036_v41 = vshll.u32 %v3399_v51, 16 }
 0x129   : > { %3736 = vmatmul.mubr.msk.bf16.vlgmr.msra.gmra.mxu0 %vm467_vm0, %v1590_v17  ;;  %3741 = vmatprep.subr.bf16.mxu1 %v3926_v22  ;;  %v1759_v42 = vor.u32 %v1757_v37, %v1755_v29  ;;  %v1864_v43 = vsel %vm1037_vm6, %v1855_v34, %v1863_v38  ;;  %v1944_v45 = vrot.slane %v4294_v10, 3  ;;  %v2027_v50 = vrot.slane %v2025_v35, 3 }
 0x12a   : > { %3748 = vmatpush3.bf16.msra.mxu0 %v3925_v47  ;;  %3751 = vmatprep.mubr.msk.bf16.mxu0 %vm467_vm0, %v1756_v53  ;;  %v2030_v52 = vrot.slane %v2028_v36, 4  ;;  %v2035_v60 = vrot.slane %v2033_v55, 3  ;;  %v2038_v61 = vrot.slane %v2036_v41, 4  ;;  %v2142_v3 = vsel %vm2140_vm12, %v2125_v2, 0 }
 0x12b   : > { %3749 = vmatprep.subr.bf16.mxu0 %v3928_v25  ;;  %v1945_v58 = vsel %vm691_vm3, %v1943_v40, %v1944_v45 }
 0x12c   : > { %3742 = vmatpush3.bf16.msra.mxu1 %v3926_v22  ;;  %v2031_v62 = vor.u32 %v2030_v52, %v2027_v50  ;;  %v2039_v63 = vor.u32 %v2038_v61, %v2035_v60 }
 0x12d   : > { %3755 = vmatprep.subr.bf16.mxu1 %v3929_v30 }
 0x12e   : > { %3750 = vmatpush3.bf16.msra.mxu0 %v3928_v25  ;;  %v2040_v1 = vsel %vm773_vm4, %v2031_v62, %v2039_v63 }
 0x12f   : > { %3744 = vmatmul.mubr.msk.bf16.vlgmr.msra.gmra.mxu1 %vm467_vm0, %v3362_v49  ;;  %3763 = vmatprep.subr.bf16.mxu0 %v3932_v54 }
 0x130   : > { %3756 = vmatpush3.bf16.msra.mxu1 %v3929_v30  ;;  %3759 = vmatprep.mubr.msk.bf16.mxu1 %vm467_vm0, %v1864_v43 }
 0x131   : > { %3752 = vmatmul.mubr.msk.bf16.vlgmr.msra.gmra.mxu0 %vm467_vm0, %v1759_v42  ;;  %3757 = vmatprep.subr.bf16.mxu1 %v3933_v39 }
 0x132   : > { %3764 = vmatpush3.bf16.msra.mxu0 %v3932_v54  ;;  %3767 = vmatprep.mubr.msk.bf16.mxu0 %vm467_vm0, %v1945_v58 }
 0x133   : > { %3765 = vmatprep.subr.bf16.mxu0 %v3935_v33 }
 0x134   : > { %3758 = vmatpush3.bf16.msra.mxu1 %v3933_v39 }
 0x135   : > { %3771 = vmatprep.subr.bf16.mxu1 %v3936_v59 }
 0x136   : > { %3766 = vmatpush3.bf16.msra.mxu0 %v3935_v33 }
 0x137   : > { %3760 = vmatmul.mubr.msk.bf16.vlgmr.msra.gmra.mxu1 %vm467_vm0, %v1863_v38  ;;  %3863 = vmatprep.subr.msk.bf16.mxu0 %vm2140_vm12, %v2125_v2 }
 0x138   : > { %3772 = vmatpush3.bf16.msra.mxu1 %v3936_v59  ;;  %3775 = vmatprep.mubr.msk.bf16.mxu1 %vm467_vm0, %v2040_v1 }
 0x139   : > { %3768 = vmatmul.mubr.msk.bf16.vlgmr.msra.gmra.mxu0 %vm467_vm0, %v1944_v45  ;;  %3773 = vmatprep.subr.bf16.mxu1 %v3938_v0 }
 0x13a   : > { %3780 = vmatpush3.bf16.msra.mxu0 %v2142_v3 }
 0x13c   : > { %3774 = vmatpush3.bf16.msra.mxu1 %v3938_v0 }
 0x13f   : > { %3776 = vmatmul.mubr.msk.bf16.vlgmr.msra.gmra.mxu1 %vm467_vm0, %v2039_v63  ;;  %v3404_v63 = vld [vmem:[%s4512_s5] ss:$0 sm:$0xff] }
 0x1df   : > { %v3713_v4 = vpop.f32.mrf.mxu1 }
 0x1e1   : > { %v1358_v5 = vpop.f32.mrf.mxu1  ;;  %v3721_v6 = vpop.f32.mrf.mxu0 }
 0x1e2   : > { %v1451_v17 = vadd.f32 %v3721_v6, %v3713_v4 }
 0x1e3   : > { %v3714_v8 = vpop.f32.mrf.mxu1  ;;  %v1442_v9 = vpop.f32.mrf.mxu0 }
 0x1e4   : > { %v1443_v47 = vadd.f32 %v1442_v9, %v1358_v5 }
 0x1e5   : > { %v1361_v10 = vpop.f32.mrf.mxu1  ;;  %v3722_v44 = vpop.f32.mrf.mxu0 }
 0x1e7   : > { %v1445_v11 = vpop.f32.mrf.mxu0  ;;  %v3729_v12 = vpop.f32.mrf.mxu1 }
 0x1e8   : > { %v1561_v46 = vadd.f32 %v3729_v12, %v1451_v17  ;;  %v1446_v25 = vadd.f32 %v1445_v11, %v1361_v10  ;;  %v4378_v17 = vld [vmem:[%s4515_s8 + $0x28] sm:$0xff]  }
 0x1e9   : > { %v1545_v13 = vpop.f32.mrf.mxu1  ;;  %v3737_v14 = vpop.f32.mrf.mxu0 }
 0x1ea   : > { %v1559_v22 = vadd.f32 %v1545_v13, %v1443_v47  ;;  %v1660_v26 = vadd.f32 %v3737_v14, %v1561_v46  ;;  %v3939_v13 = vld [vmem:[%s4515_s8 + $0x18] sm:$0xff]   ;;  %v3940_v14 = vld [vmem:[%s4515_s8 + $0x8] sm:$0xff]   ;;  %v2194_v47 = vld [vmem:[#allocation2 + $0x10] sm:$0x7] }
 0x1eb   : > { %v3730_v15 = vpop.f32.mrf.mxu1  ;;  %v1644_v16 = vpop.f32.mrf.mxu0  ;;  %3785 = vmatprep.subr.bf16.mxu1 %v3939_v13  ;;  %3793 = vmatprep.subr.bf16.mxu0 %v3940_v14 }
 0x1ec   : > { %v1658_v29 = vadd.f32 %v1644_v16, %v1559_v22  ;;  %v3941_v15 = vld [vmem:[%s4515_s8 + $0x10] sm:$0xff]   ;;  %v3942_v16 = vld [vmem:[%s4515_s8] sm:$0xff]   ;;  %3786 = vmatpush3.bf16.msra.mxu1 %v3939_v13  ;;  %v2197_v22 = vunpack.c.l.bf16 %v2194_v47  ;;  %v2789_v13 = vld [vmem:[#allocation3 + $0x14] sm:$0x3] }
 0x1ed   : > { %v1548_v18 = vpop.f32.mrf.mxu1  ;;  %v3738_v19 = vpop.f32.mrf.mxu0  ;;  %3787 = vmatprep.subr.bf16.mxu1 %v3941_v15 }
 0x1ee   : > { %v1560_v30 = vadd.f32 %v1548_v18, %v1446_v25  ;;  %v4384_v18 = vld [vmem:[%s4515_s8 + $0x38] sm:$0xff]   ;;  %v3405_v19 = vld [vmem:[%s4514_s7] ss:$0 sm:$0xff] }
 0x1ef   : > { %v1647_v20 = vpop.f32.mrf.mxu0  ;;  %v3745_v21 = vpop.f32.mrf.mxu1 }
 0x1f0   : > { %v1736_v31 = vadd.f32 %v3745_v21, %v1660_v26  ;;  %v1659_v35 = vadd.f32 %v1647_v20, %v1560_v30  ;;  %3788 = vmatpush3.bf16.msra.mxu1 %v3941_v15  ;;  %v3519_v20 = vld [vmem:[#allocation2 + $0x8] sm:$0xff]  }
 0x1f1   : > { %v1720_v23 = vpop.f32.mrf.mxu1  ;;  %v3753_v24 = vpop.f32.mrf.mxu0  ;;  %3801 = vmatprep.subr.bf16.mxu1 %v4378_v17  ;;  %v3513_v26 = vunpack.c.l.bf16 %v3519_v20 }
 0x1f2   : > { %v1734_v53 = vadd.f32 %v1720_v23, %v1658_v29  ;;  %v1828_v36 = vadd.f32 %v3753_v24, %v1736_v31 }
 0x1f3   : > { %v3746_v27 = vpop.f32.mrf.mxu1  ;;  %v1812_v28 = vpop.f32.mrf.mxu0 }
 0x1f4   : > { %v1826_v38 = vadd.f32 %v1812_v28, %v1734_v53  ;;  %v3514_v53 = vunpack.c.h.bf16 %v3519_v20 }
 0x1f5   : > { %v1723_v32 = vpop.f32.mrf.mxu1  ;;  %v3754_v51 = vpop.f32.mrf.mxu0 }
 0x1f6   : > { %v1735_v39 = vadd.f32 %v1723_v32, %v1659_v35 }
 0x1f7   : > { %v1815_v34 = vpop.f32.mrf.mxu0  ;;  %v3761_v54 = vpop.f32.mrf.mxu1 }
 0x1f8   : > { %v1933_v40 = vadd.f32 %v3761_v54, %v1828_v36  ;;  %v1827_v33 = vadd.f32 %v1815_v34, %v1735_v39 }
 0x1f9   : > { %v1917_v37 = vpop.f32.mrf.mxu1  ;;  %v3769_v49 = vpop.f32.mrf.mxu0 }
 0x1fa   : > { %v1931_v42 = vadd.f32 %v1917_v37, %v1826_v38  ;;  %v2014_v50 = vadd.f32 %v3769_v49, %v1933_v40  ;;  %v2240_v40 = vld [vmem:[#allocation3 + $0x4] sm:$0xf] }
 0x1fb   : > { %v3762_v55 = vpop.f32.mrf.mxu1  ;;  %v1998_v41 = vpop.f32.mrf.mxu0 }
 0x1fc   : > { %v2012_v58 = vadd.f32 %v1998_v41, %v1931_v42  ;;  %v2414_v55 = vld [vmem:[#allocation3 + $0x4] sm:$0xe] }
 0x1fd   : > { %v1920_v43 = vpop.f32.mrf.mxu1  ;;  %v3770_v45 = vpop.f32.mrf.mxu0 }
 0x1fe   : > { %v1932_v59 = vadd.f32 %v1920_v43, %v1827_v33 }
 0x1ff   : > { %v3777_v52 = vpop.f32.mrf.mxu1  ;;  %v2001_v60 = vpop.f32.mrf.mxu0 }
 0x200   : > { %v2109_v61 = vadd.f32 %v3777_v52, %v2014_v50  ;;  %v2013_v2 = vadd.f32 %v2001_v60, %v1932_v59  ;;  %v2519_v50 = vld [vmem:[#allocation3 + $0x4] sm:$0x8] }
 0x201   : > { %v2093_v62 = vpop.f32.mrf.mxu1 }
 0x202   : > { %v2107_v0 = vadd.f32 %v2093_v62, %v2012_v58  ;;  %v2119_v3 = vadd.f32 %v3404_v63, %v2109_v61 }
 0x203   : > { %v3778_v1 = vpop.f32.mrf.mxu1 }
 0x204   : > { %v2117_v5 = vadd.f32 %v3404_v63, %v2107_v0  ;;  %v2122_v9 = vmax.f32 %v2119_v3, 0.0 }
 0x205   : > { %v2096_v4 = vpop.f32.mrf.mxu1 }
 0x206   : > { %v2108_v6 = vadd.f32 %v2096_v4, %v2013_v2  ;;  %v2120_v10 = vmax.f32 %v2117_v5, 0.0  ;;  %v2124_v12 = vpack.c.bf16 %v2122_v9, %v2122_v9 }
 0x208   : > { %v2118_v8 = vadd.f32 %v3404_v63, %v2108_v6 }
 0x20a   : > { %v2121_v44 = vmax.f32 %v2118_v8, 0.0 }
 0x20c   : > { %v2123_v11 = vpack.c.bf16 %v2121_v44, %v2120_v10 }
 0x20e   : > { %3781 = vmatprep.mubr.msk.bf16.mxu0 %vm2133_vm13, %v2123_v11 }
 0x20f   : > { %3782 = vmatmul.mubr.msk.bf16.vlgmr.msra.gmra.mxu0 %vm2133_vm13, %v2124_v12 }
 0x210   : > { %3794 = vmatpush3.bf16.msra.mxu0 %v3940_v14 }
 0x211   : > { %3795 = vmatprep.subr.bf16.mxu0 %v3942_v16 }
 0x214   : > { %3796 = vmatpush3.bf16.msra.mxu0 %v3942_v16  ;;  %v3948_v16 = vld [vmem:[%s4515_s8 + $0x20] sm:$0xff]  }
 0x215   : > { %3809 = vmatprep.subr.bf16.mxu0 %v4384_v18 }
 0x2cf   : > { %v3783_v46 = vpop.f32.mrf.mxu0 }
 0x2d0   : > { %v2187_v21 = vadd.f32 %v3783_v46, %v3405_v19 }
 0x2d1   : > { %v2178_v23 = vpop.f32.mrf.mxu0 }
 0x2d2   : > { %v2200_v24 = vadd.f32 %v2197_v22, %v2187_v21  ;;  %v2179_v25 = vadd.f32 %v3405_v19, %v2178_v23 }
 0x2d3   : > { %v3784_v27 = vpop.f32.mrf.mxu0 }
 0x2d4   : > { %v2203_v28 = vmul.f32 %v2200_v24, %v4247_v56  ;;  %v2198_v29 = vadd.f32 %v3513_v26, %v2179_v25 }
 0x2d5   : > { %v2181_v30 = vpop.f32.mrf.mxu0 }
 0x2d6   : > { %v3507_v31 = vpack.c.bf16 %v2203_v28, %v2203_v28  ;;  %v2201_v32 = vmul.f32 %v2198_v29, %v4249_v57  ;;  %v2182_v51 = vadd.f32 %v3405_v19, %v2181_v30  ;;  %v3953_v29 = vld [vmem:[%s4515_s8 + $0x30] sm:$0xff]  }
 0x2d8   : > { %2219 = vst.msk [vmem:[#allocation2 + $0x10] sm:$0x7] %vm1221_vm8, %v3507_v31  ;;  %v3505_v34 = vpack.c.bf16 %v2201_v32, %v2201_v32  ;;  %v2199_v54 = vadd.f32 %v3514_v53, %v2182_v51 }
 0x2da   : > { %2217 = vst.msk [vmem:[#allocation2 + $0x8] sm:$0xf] %vm1215_vm7, %v3505_v34  ;;  %v2202_v35 = vmul.f32 %v2199_v54, %v4254_v7  ;;  %v2247_v7 = vld [vmem:[#allocation3 + $0x4] sm:$0xe]  ;;  %v3954_v54 = vld [vmem:[%s4515_s8 + $0x48] sm:$0xff]  }
 0x2dc   : > { %v3506_v36 = vpack.c.bf16 %v2202_v35, %v2202_v35 }
 0x2de   : > { %2218 = vst.msk [vmem:[#allocation2 + $0xc] sm:$0xf] %vm1215_vm7, %v3506_v36 }
 0x2df   : > { %v2224_v37 = vld [vmem:[#allocation2 + $0x10] sm:$0xf] }
 0x2e0   : > { %v2230_v56 = vmax.bf16 %v3979_v48, %v2224_v37 }
 0x2e1   : > { %v2222_v49 = vld [vmem:[#allocation2 + $0x8] sm:$0xf] }
 0x2e2   : > { %2236 = vst.msk [vmem:[#allocation3 + $0x10] sm:$0xf] %vm1215_vm7, %v2230_v56  ;;  %v2228_v57 = vmax.bf16 %v3979_v48, %v2222_v49 }
 0x2e4   : > { %2234 = vst.msk [vmem:[#allocation3 + $0x8] sm:$0xf] %vm1215_vm7, %v2228_v57 }
 0x2e5   : > { %v2223_v38 = vld [vmem:[#allocation2 + $0xc] sm:$0xf] }
 0x2e6   : > { %v2229_v39 = vmax.bf16 %v3979_v48, %v2223_v38 }
 0x2e8   : > { %2235 = vst.msk [vmem:[#allocation3 + $0xc] sm:$0xf] %vm1215_vm7, %v2229_v39 }
 0x2e9   : > { %v2417_v60 = vld [vmem:[#allocation3 + $0x10] sm:$0x1] }
 0x2ea   : > { %v4402_v4 = vld [vmem:[#allocation3 + $0x10] sm:$0x7] }
 0x2eb   : > { %v2241_v41 = vld [vmem:[#allocation3 + $0x8] sm:$0xf]  ;;  %v4409_v46 = vld [vmem:[#allocation3 + $0x10] sm:$0xf] }
 0x2ec   : > { %v2415_v42 = vld [vmem:[#allocation3 + $0x8] sm:$0xf]  ;;  %v3415_v43 = vcombine.low %v2247_v7, %v2241_v41  ;;  %v3421_v45 = vcombine.low %v2240_v40, %v2241_v41  ;;  %v4417_v30 = vld [vmem:[#allocation3 + $0x10] ss:$0 sps:$4 sm:$0xff]   ;;  %v4426_v36 = vcombine.low %v4409_v46, %v2789_v13  ;;  %v3956_v41 = vld [vmem:[%s4515_s8 + $0x58] sm:$0xff]  }
 0x2ed   : > { %v3430_v33 = vcombine.low %v2414_v55, %v2415_v42  ;;  %v3440_v0 = vcombine.low %v2519_v50, %v2415_v42  ;;  %v2786_v34 = vld [vmem:[#allocation3 + $0x8] sm:$0xc]  ;;  %v2710_v49 = vshll.u32 %v4417_v30, 16 }
 0x2ee   : > { %v2261_v52 = vrot.slane %v3415_v43, 1  ;;  %v2334_v58 = vshrl.u32 %v3421_v45, 16  ;;  %v2336_v59 = vshll.u32 %v3421_v45, 16  ;;  %v3957_v45 = vld [vmem:[%s4515_s8 + $0x40] sm:$0xff]  }
 0x2ef   : > { %v2434_v61 = vshrl.u32 %v3430_v33, 16  ;;  %v3944_v62 = vld [vmem:[#allocation3 + $0xc] ss:$0 sps:$4 sm:$0xff]   ;;  %v2437_v3 = vshll.u32 %v3430_v33, 16  ;;  %v2533_v19 = vshrl.u32 %v3440_v0, 16  ;;  %v2536_v47 = vshll.u32 %v3440_v0, 16 }
 0x2f0   : > { %v2416_v63 = vld [vmem:[#allocation3 + $0xc] sm:$0xf]  ;;  %v2338_v48 = vrot.slane %v2336_v59, 1  ;;  %v2262_v5 = vrot.slane %v3944_v62, 1  ;;  %v2341_v6 = vshll.u32 %v3944_v62, 16  ;;  %v2345_v8 = vshrl.u32 %v3944_v62, 16 }
 0x2f1   : > { %v3431_v1 = vcombine.low %v2416_v63, %v2417_v60  ;;  %v2436_v2 = vrot.slane %v2434_v61, 1  ;;  %v3441_v9 = vcombine.low %v2416_v63, %v4402_v4  ;;  %v2439_v44 = vrot.slane %v2437_v3, 2  ;;  %v2787_v24 = vld [vmem:[#allocation3 + $0xc] sm:$0xf]  ;;  %v2891_v50 = vld [vmem:[#allocation3 + $0x8] sm:$0x8] }
 0x2f2   : > { %v2339_v10 = vor.u32 %v2338_v48, %v2334_v58  ;;  %v2263_v14 = vsel %vm599_vm2, %v2261_v52, %v2262_v5  ;;  %v2343_v15 = vrot.slane %v2341_v6, 1  ;;  %v2535_v27 = vrot.slane %v2533_v19, 3  ;;  %v2972_v52 = vld [vmem:[#allocation3 + $0x14] sm:$0x7]  ;;  %v3959_v58 = vld [vmem:[%s4515_s8 + $0x50] sm:$0xff]  }
 0x2f3   : > { %v2442_v11 = vshrl.u32 %v3431_v1, 16  ;;  %v2445_v12 = vshll.u32 %v3431_v1, 16  ;;  %3789 = vmatprep.mubr.msk.bf16.mxu1 %vm467_vm0, %v2263_v14  ;;  %v2440_v20 = vor.u32 %v2439_v44, %v2436_v2  ;;  %v2541_v23 = vshrl.u32 %v3441_v9, 16 }
 0x2f4   : > { %3790 = vmatmul.mubr.msk.bf16.vlgmr.msra.gmra.mxu1 %vm467_vm0, %v2262_v5  ;;  %v2344_v25 = vsel %vm439_vm1, %v2339_v10, %v2343_v15  ;;  %v2347_v26 = vor.u32 %v2345_v8, %v2343_v15  ;;  %v2538_v28 = vrot.slane %v2536_v47, 4  ;;  %v2544_v51 = vshll.u32 %v3441_v9, 16  ;;  %v3964_v5 = vld [vmem:[%s4515_s8 + $0x78] sm:$0xff]  }
 0x2f5   : > { %v2444_v21 = vrot.slane %v2442_v11, 1  ;;  %v2447_v22 = vrot.slane %v2445_v12, 2  ;;  %3802 = vmatpush3.bf16.msra.mxu1 %v4378_v17  ;;  %3797 = vmatprep.mubr.msk.bf16.mxu0 %vm467_vm0, %v2344_v25  ;;  %v2543_v32 = vrot.slane %v2541_v23, 3  ;;  %v3450_v53 = vcombine.low %v2415_v42, %v2416_v63  ;;  %v3960_v63 = vld [vmem:[%s4515_s8 + $0x68] sm:$0xff]   ;;  %v3965_v11 = vld [vmem:[%s4515_s8 + $0x60] sm:$0xff]  }
 0x2f6   : > { %3798 = vmatmul.mubr.msk.bf16.vlgmr.msra.gmra.mxu0 %vm467_vm0, %v2347_v26  ;;  %3803 = vmatprep.subr.bf16.mxu1 %v3948_v16  ;;  %v3469_v35 = vcombine.low %v2786_v34, %v2787_v24  ;;  %v2546_v37 = vrot.slane %v2544_v51, 4  ;;  %v2539_v39 = vor.u32 %v2538_v28, %v2535_v27  ;;  %v2817_v42 = vshll.u32 %v4426_v36, 16  ;;  %v3970_v26 = vld [vmem:[%s4515_s8 + $0x80] sm:$0xff]  }
 0x2f7   : > { %v2448_v31 = vor.u32 %v2447_v22, %v2444_v21  ;;  %3810 = vmatpush3.bf16.msra.mxu0 %v4384_v18  ;;  %v2705_v56 = vshll.u32 %v3450_v53, 16  ;;  %v2703_v7 = vshrl.u32 %v3450_v53, 16  ;;  %v2814_v18 = vshrl.u32 %v4426_v36, 16  ;;  %v3968_v21 = vld [vmem:[%s4515_s8 + $0x88] sm:$0xff]   ;;  %v3082_v28 = vld [vmem:[%s4517_s10] sm:$0xf] }
 0x2f8   : > { %3811 = vmatprep.subr.bf16.mxu0 %v3953_v29  ;;  %v2806_v57 = vshrl.u32 %v3469_v35, 16  ;;  %v2809_v38 = vshll.u32 %v3469_v35, 16  ;;  %v2547_v40 = vor.u32 %v2546_v37, %v2543_v32  ;;  %v3479_v61 = vcombine.low %v2891_v50, %v2787_v24 }
 0x2f9   : > { %v2449_v17 = vsel %vm1475_vm11, %v2440_v20, %v2448_v31  ;;  %3804 = vmatpush3.bf16.msra.mxu1 %v3948_v16  ;;  %v2707_v55 = vrot.slane %v2705_v56, 1  ;;  %v2712_v62 = vrot.slane %v2710_v49, 1  ;;  %v2816_v0 = vrot.slane %v2814_v18, 2 }
 0x2fa   : > { %3805 = vmatprep.mubr.msk.bf16.mxu1 %vm467_vm0, %v2449_v17  ;;  %3817 = vmatprep.subr.bf16.mxu1 %v3954_v54  ;;  %v2548_v43 = vsel %vm773_vm4, %v2539_v39, %v2547_v40  ;;  %v2808_v59 = vrot.slane %v2806_v57, 2  ;;  %v2811_v60 = vrot.slane %v2809_v38, 3  ;;  %v2819_v48 = vrot.slane %v2817_v42, 3 }
 0x2fb   : > { %3812 = vmatpush3.bf16.msra.mxu0 %v3953_v29  ;;  %v2708_v33 = vor.u32 %v2707_v55, %v2703_v7  ;;  %3813 = vmatprep.mubr.msk.bf16.mxu0 %vm467_vm0, %v2548_v43  ;;  %v3488_v1 = vcombine.low %v4409_v46, %v2972_v52  ;;  %v2982_v6 = vshrl.u32 %v3479_v61, 16  ;;  %v2985_v8 = vshll.u32 %v3479_v61, 16 }
 0x2fc   : > { %3806 = vmatmul.mubr.msk.bf16.vlgmr.msra.gmra.mxu1 %vm467_vm0, %v2448_v31  ;;  %3825 = vmatprep.subr.bf16.mxu0 %v3956_v41  ;;  %v2812_v3 = vor.u32 %v2811_v60, %v2808_v59  ;;  %v2714_v9 = vshrl.u32 %v4417_v30, 16  ;;  %v3451_v10 = vcombine.low %v4402_v4, %v4402_v4  ;;  %v2820_v44 = vor.u32 %v2819_v48, %v2816_v0  ;;  %v3967_v4 = vld [vmem:[%s4515_s8 + $0x70] sm:$0xff]  }
 0x2fd   : > { %3818 = vmatpush3.bf16.msra.mxu1 %v3954_v54  ;;  %3821 = vmatprep.mubr.msk.bf16.mxu1 %vm467_vm0, %v3450_v53  ;;  %v2713_v2 = vsel %vm439_vm1, %v2708_v33, %v2712_v62  ;;  %v2900_v12 = vrot.slane %v3479_v61, 3  ;;  %v2990_v13 = vshrl.u32 %v3488_v1, 16  ;;  %v2993_v14 = vshll.u32 %v3488_v1, 16 }
 0x2fe   : > { %3814 = vmatmul.mubr.msk.bf16.vlgmr.msra.gmra.mxu0 %vm467_vm0, %v2547_v40  ;;  %3819 = vmatprep.subr.bf16.mxu1 %v3957_v45  ;;  %v2716_v15 = vor.u32 %v2714_v9, %v2712_v62  ;;  %v2821_v16 = vsel %vm1037_vm6, %v2812_v3, %v2820_v44  ;;  %v2901_v19 = vrot.slane %v4426_v36, 3  ;;  %v2984_v47 = vrot.slane %v2982_v6, 3 }
 0x2ff   : > { %3826 = vmatpush3.bf16.msra.mxu0 %v3956_v41  ;;  %3829 = vmatprep.mubr.msk.bf16.mxu0 %vm467_vm0, %v2713_v2  ;;  %v2987_v46 = vrot.slane %v2985_v8, 4  ;;  %v2992_v22 = vrot.slane %v2990_v13, 3  ;;  %v2995_v23 = vrot.slane %v2993_v14, 4  ;;  %v3097_v29 = vsel %vm2140_vm12, %v3082_v28, 0 }
 0x300   : > { %3827 = vmatprep.subr.bf16.mxu0 %v3959_v58  ;;  %v2902_v20 = vsel %vm691_vm3, %v2900_v12, %v2901_v19 }
 0x301   : > { %3820 = vmatpush3.bf16.msra.mxu1 %v3957_v45  ;;  %v2988_v24 = vor.u32 %v2987_v46, %v2984_v47  ;;  %v2996_v25 = vor.u32 %v2995_v23, %v2992_v22 }
 0x302   : > { %3833 = vmatprep.subr.bf16.mxu1 %v3960_v63 }
 0x303   : > { %3828 = vmatpush3.bf16.msra.mxu0 %v3959_v58  ;;  %v2997_v27 = vsel %vm773_vm4, %v2988_v24, %v2996_v25 }
 0x304   : > { %3822 = vmatmul.mubr.msk.bf16.vlgmr.msra.gmra.mxu1 %vm467_vm0, %v3451_v10  ;;  %3841 = vmatprep.subr.bf16.mxu0 %v3964_v5 }
 0x305   : > { %3834 = vmatpush3.bf16.msra.mxu1 %v3960_v63  ;;  %3837 = vmatprep.mubr.msk.bf16.mxu1 %vm467_vm0, %v2821_v16 }
 0x306   : > { %3830 = vmatmul.mubr.msk.bf16.vlgmr.msra.gmra.mxu0 %vm467_vm0, %v2716_v15  ;;  %3835 = vmatprep.subr.bf16.mxu1 %v3965_v11 }
 0x307   : > { %3842 = vmatpush3.bf16.msra.mxu0 %v3964_v5  ;;  %3845 = vmatprep.mubr.msk.bf16.mxu0 %vm467_vm0, %v2902_v20 }
 0x308   : > { %3843 = vmatprep.subr.bf16.mxu0 %v3967_v4 }
 0x309   : > { %3836 = vmatpush3.bf16.msra.mxu1 %v3965_v11 }
 0x30a   : > { %3849 = vmatprep.subr.bf16.mxu1 %v3968_v21 }
 0x30b   : > { %3844 = vmatpush3.bf16.msra.mxu0 %v3967_v4 }
 0x30c   : > { %3838 = vmatmul.mubr.msk.bf16.vlgmr.msra.gmra.mxu1 %vm467_vm0, %v2820_v44  ;;  %3864 = vmatprep.subr.msk.bf16.mxu0 %vm2140_vm12, %v3082_v28 }
 0x30d   : > { %3850 = vmatpush3.bf16.msra.mxu1 %v3968_v21  ;;  %3853 = vmatprep.mubr.msk.bf16.mxu1 %vm467_vm0, %v2997_v27  ;;  %v3493_v21 = vld [vmem:[%s4516_s9] ss:$0 sm:$0xff] }
 0x30e   : > { %3846 = vmatmul.mubr.msk.bf16.vlgmr.msra.gmra.mxu0 %vm467_vm0, %v2901_v19  ;;  %3851 = vmatprep.subr.bf16.mxu1 %v3970_v26 }
 0x30f   : > { %3858 = vmatpush3.bf16.msra.mxu0 %v3097_v29 }
 0x311   : > { %3852 = vmatpush3.bf16.msra.mxu1 %v3970_v26 }
 0x314   : > { %3854 = vmatmul.mubr.msk.bf16.vlgmr.msra.gmra.mxu1 %vm467_vm0, %v2996_v25 }
 0x3b4   : > { %v3791_v30 = vpop.f32.mrf.mxu1 }
 0x3b6   : > { %v2316_v31 = vpop.f32.mrf.mxu1  ;;  %v3799_v32 = vpop.f32.mrf.mxu0 }
 0x3b7   : > { %v2409_v57 = vadd.f32 %v3799_v32, %v3791_v30 }
 0x3b8   : > { %v3792_v51 = vpop.f32.mrf.mxu1  ;;  %v2400_v53 = vpop.f32.mrf.mxu0 }
 0x3b9   : > { %v2401_v40 = vadd.f32 %v2400_v53, %v2316_v31 }
 0x3ba   : > { %v2319_v34 = vpop.f32.mrf.mxu1  ;;  %v3800_v54 = vpop.f32.mrf.mxu0 }
 0x3bb   : > { %v3149_v54 = vld [vmem:[#allocation2 + $0x10] sm:$0x7] }
 0x3bc   : > { %v2403_v35 = vpop.f32.mrf.mxu0  ;;  %v3807_v36 = vpop.f32.mrf.mxu1 }
 0x3bd   : > { %v2518_v7 = vadd.f32 %v3807_v36, %v2409_v57  ;;  %v2404_v45 = vadd.f32 %v2403_v35, %v2319_v34  ;;  %v3494_v34 = vld [vmem:[%s4518_s11] ss:$0 sm:$0xff]  ;;  %v3520_v36 = vld [vmem:[#allocation2 + $0x8] sm:$0xff]  }
 0x3be   : > { %v2502_v17 = vpop.f32.mrf.mxu1  ;;  %v3815_v37 = vpop.f32.mrf.mxu0 }
 0x3bf   : > { %v2516_v18 = vadd.f32 %v2502_v17, %v2401_v40  ;;  %v2617_v33 = vadd.f32 %v3815_v37, %v2518_v7  ;;  %v3152_v37 = vunpack.c.l.bf16 %v3149_v54 }
 0x3c0   : > { %v3808_v56 = vpop.f32.mrf.mxu1  ;;  %v2601_v49 = vpop.f32.mrf.mxu0 }
 0x3c1   : > { %v2615_v58 = vadd.f32 %v2601_v49, %v2516_v18 }
 0x3c2   : > { %v2505_v38 = vpop.f32.mrf.mxu1  ;;  %v3816_v39 = vpop.f32.mrf.mxu0 }
 0x3c3   : > { %v2517_v59 = vadd.f32 %v2505_v38, %v2404_v45  ;;  %v3517_v38 = vunpack.c.l.bf16 %v3520_v36 }
 0x3c4   : > { %v2604_v55 = vpop.f32.mrf.mxu0  ;;  %v3823_v41 = vpop.f32.mrf.mxu1 }
 0x3c5   : > { %v2693_v60 = vadd.f32 %v3823_v41, %v2617_v33  ;;  %v2616_v1 = vadd.f32 %v2604_v55, %v2517_v59 }
 0x3c6   : > { %v2677_v42 = vpop.f32.mrf.mxu1  ;;  %v3831_v43 = vpop.f32.mrf.mxu0 }
 0x3c7   : > { %v2691_v63 = vadd.f32 %v2677_v42, %v2615_v58  ;;  %v2785_v2 = vadd.f32 %v3831_v43, %v2693_v60  ;;  %v3518_v43 = vunpack.c.h.bf16 %v3520_v36 }
 0x3c8   : > { %v3824_v50 = vpop.f32.mrf.mxu1  ;;  %v2769_v52 = vpop.f32.mrf.mxu0 }
 0x3c9   : > { %v2783_v6 = vadd.f32 %v2769_v52, %v2691_v63 }
 0x3ca   : > { %v2680_v61 = vpop.f32.mrf.mxu1  ;;  %v3832_v62 = vpop.f32.mrf.mxu0 }
 0x3cb   : > { %v2692_v8 = vadd.f32 %v2680_v61, %v2616_v1 }
 0x3cc   : > { %v2772_v0 = vpop.f32.mrf.mxu0  ;;  %v3839_v48 = vpop.f32.mrf.mxu1 }
 0x3cd   : > { %v2890_v9 = vadd.f32 %v3839_v48, %v2785_v2  ;;  %v2784_v14 = vadd.f32 %v2772_v0, %v2692_v8 }
 0x3ce   : > { %v2874_v3 = vpop.f32.mrf.mxu1  ;;  %v3847_v5 = vpop.f32.mrf.mxu0 }
 0x3cf   : > { %v2888_v11 = vadd.f32 %v2874_v3, %v2783_v6  ;;  %v2971_v15 = vadd.f32 %v3847_v5, %v2890_v9 }
 0x3d0   : > { %v3840_v10 = vpop.f32.mrf.mxu1  ;;  %v2955_v44 = vpop.f32.mrf.mxu0 }
 0x3d1   : > { %v2969_v19 = vadd.f32 %v2955_v44, %v2888_v11 }
 0x3d2   : > { %v2877_v12 = vpop.f32.mrf.mxu1  ;;  %v3848_v13 = vpop.f32.mrf.mxu0 }
 0x3d3   : > { %v2889_v4 = vadd.f32 %v2877_v12, %v2784_v14 }
 0x3d4   : > { %v3855_v16 = vpop.f32.mrf.mxu1  ;;  %v2958_v47 = vpop.f32.mrf.mxu0 }
 0x3d5   : > { %v3066_v46 = vadd.f32 %v3855_v16, %v2971_v15  ;;  %v2970_v24 = vadd.f32 %v2958_v47, %v2889_v4 }
 0x3d6   : > { %v3050_v20 = vpop.f32.mrf.mxu1 }
 0x3d7   : > { %v3064_v22 = vadd.f32 %v3050_v20, %v2969_v19  ;;  %v3076_v25 = vadd.f32 %v3493_v21, %v3066_v46 }
 0x3d8   : > { %v3856_v23 = vpop.f32.mrf.mxu1 }
 0x3d9   : > { %v3074_v27 = vadd.f32 %v3493_v21, %v3064_v22  ;;  %v3079_v30 = vmax.f32 %v3076_v25, 0.0 }
 0x3da   : > { %v3053_v26 = vpop.f32.mrf.mxu1 }
 0x3db   : > { %v3065_v28 = vadd.f32 %v3053_v26, %v2970_v24  ;;  %v3077_v31 = vmax.f32 %v3074_v27, 0.0  ;;  %v3081_v53 = vpack.c.bf16 %v3079_v30, %v3079_v30 }
 0x3dd   : > { %v3075_v29 = vadd.f32 %v3493_v21, %v3065_v28 }
 0x3df   : > { %v3078_v32 = vmax.f32 %v3075_v29, 0.0 }
 0x3e1   : > { %v3080_v51 = vpack.c.bf16 %v3078_v32, %v3077_v31 }
 0x3e3   : > { %3859 = vmatprep.mubr.msk.bf16.mxu0 %vm2133_vm13, %v3080_v51 }
 0x3e4   : > { %3860 = vmatmul.mubr.msk.bf16.vlgmr.msra.gmra.mxu0 %vm2133_vm13, %v3081_v53 }
 0x4a4   : > { %v3861_v35 = vpop.f32.mrf.mxu0 }
 0x4a5   : > { %v3142_v17 = vadd.f32 %v3861_v35, %v3494_v34 }
 0x4a6   : > { %v3133_v56 = vpop.f32.mrf.mxu0 }
 0x4a7   : > { %v3155_v49 = vadd.f32 %v3152_v37, %v3142_v17  ;;  %v3134_v57 = vadd.f32 %v3494_v34, %v3133_v56 }
 0x4a8   : > { %v3862_v39 = vpop.f32.mrf.mxu0 }
 0x4a9   : > { %v3158_v40 = vmax.f32 %v3155_v49, 0.0  ;;  %v3153_v7 = vadd.f32 %v3517_v38, %v3134_v57 }
 0x4aa   : > { %v3136_v55 = vpop.f32.mrf.mxu0 }
 0x4ab   : > { %v3510_v41 = vpack.c.bf16 %v3158_v40, %v3158_v40  ;;  %v3156_v18 = vmax.f32 %v3153_v7, 0.0  ;;  %v3137_v42 = vadd.f32 %v3494_v34, %v3136_v55 }
 0x4ad   : > { %3174 = vst.msk [vmem:[%s413_s30 + $0x8] sm:$0x7] %vm1221_vm8, %v3510_v41  ;;  %v3508_v45 = vpack.c.bf16 %v3156_v18, %v3156_v18  ;;  %v3154_v33 = vadd.f32 %v3518_v43, %v3137_v42 }
 0x4af   : > { %3172 = vst.msk [vmem:[%s413_s30] sm:$0xf] %vm1215_vm7, %v3508_v45  ;;  %v3157_v50 = vmax.f32 %v3154_v33, 0.0 }
 0x4b1   : > { %v3509_v52 = vpack.c.bf16 %v3157_v50, %v3157_v50 }
 0x4b3   : > { %3173 = vst.msk [vmem:[%s413_s30 + $0x4] sm:$0xf] %vm1215_vm7, %v3509_v52 }
 0x4b4 PF: > { %s22_s21 = sadd.s32 1, %s3977_s21  }
 0x4b5   : > { %p19_p4 = scmp.ge.s32.totalorder %s22_s21, 4  }
 0x4b7   :  { %21 = sbr.rel (!%p19_p4) target bundleno = 1 (0x1), region = 122 }

</bundles_post_ra>
